<compile_context>
chip_gen: v5e
topology: v5e:2x2
jax: 0.10.0
libtpu: 0.0.40
codegen_flags: <defaults>
</compile_context>

<pallas_src>
import functools

import jax
import jax.numpy as jnp
from jax import lax
from jax.experimental import pallas as pl
from jax.experimental.pallas import tpu as pltpu


def _round_up(x, m):
    return (x + m - 1) // m * m


def _lstm_cls_kernel(x_ref, wih_ref, whh_ref, b_ref, wlin_ref, blin_ref,
                     out_ref, xproj_ref, hs_ref, *, true_batch, n_classes):
    seq_len, b_pad, e_pad = x_ref.shape
    h_pad = whh_ref.shape[0]        # padded hidden (lane-aligned, 128)
    h4 = whh_ref.shape[1]           # 4 * h_pad
    c_pad = wlin_ref.shape[1]       # padded classes (lane-aligned, 128)

    # ---- 1) input projection for ALL timesteps in one MXU call ------------
    x_all = x_ref[...].reshape(seq_len * b_pad, e_pad)
    xproj = (jnp.dot(x_all, wih_ref[...], preferred_element_type=jnp.float32)
             + b_ref[...])                                  # (S*B, 4H)
    xproj_ref[...] = xproj.reshape(seq_len, b_pad, h4)

    whh = whh_ref[...]                                      # (H_pad, 4H)

    # ---- 2) recurrence: only h_prev @ W_hh per step ------------------------
    # hid_prev / ctx_prev default to zeros (as in the PyTorch forward).
    def step(t, carry):
        h_prev, c_prev = carry
        gates = xproj_ref[t] + jnp.dot(h_prev, whh,
                                       preferred_element_type=jnp.float32)
        # PyTorch gate order [i, f, g, o]; each slice is a full 128-lane tile.
        i_g = jax.nn.sigmoid(gates[:, 0 * h_pad:1 * h_pad])
        f_g = jax.nn.sigmoid(gates[:, 1 * h_pad:2 * h_pad])
        g_g = jnp.tanh(gates[:, 2 * h_pad:3 * h_pad])
        o_g = jax.nn.sigmoid(gates[:, 3 * h_pad:4 * h_pad])
        c_new = f_g * c_prev + i_g * g_g
        h_new = o_g * jnp.tanh(c_new)
        hs_ref[t] = h_new
        return (h_new, c_new)

    h0 = jnp.zeros((b_pad, h_pad), jnp.float32)
    c0 = jnp.zeros((b_pad, h_pad), jnp.float32)
    lax.fori_loop(0, seq_len, step, (h0, c0), unroll=True)

    # TODO(synk): nn.Dropout is identity in eval mode; training-mode random
    # dropout is intentionally not applied here.

    # ---- 3) classifier over all hidden states in one MXU call --------------
    hs = hs_ref[...].reshape(seq_len * b_pad, h_pad)
    logits = (jnp.dot(hs, wlin_ref[...], preferred_element_type=jnp.float32)
              + blin_ref[...])                               # (S*B, C_pad)
    logits = logits.reshape(seq_len, b_pad, c_pad)

    # torch.mean(out, dim=1): mean over the REAL batch rows only.
    row_ids = lax.broadcasted_iota(jnp.int32, (seq_len, b_pad, c_pad), 1)
    row_mask = row_ids < true_batch
    mean_logits = (jnp.sum(jnp.where(row_mask, logits, 0.0), axis=1)
                   / jnp.float32(true_batch))                # (S, C_pad)

    # log_softmax over the real classes (padded class lanes masked out).
    col_ids = lax.broadcasted_iota(jnp.int32, (seq_len, c_pad), 1)
    masked = jnp.where(col_ids < n_classes, mean_logits, jnp.float32(-1e30))
    m = jnp.max(masked, axis=-1, keepdims=True)
    lse = m + jnp.log(jnp.sum(jnp.exp(masked - m), axis=-1, keepdims=True))

    # single lane-dense (seq_len, 128) store
    out_ref[...] = masked - lse


def rnn_classifier_forward(inp, params):
    """inp: (seq_len, batch, embeds_dim) float32.  Returns (seq_len, n_classes)."""
    seq_len, batch, embeds_dim = inp.shape
    hidden_dim = params["w_hh"].shape[1]
    n_classes = params["w_lin"].shape[0]

    b_pad = _round_up(max(batch, 8), 8)
    e_pad = _round_up(max(embeds_dim, 128), 128)
    h_pad = _round_up(max(hidden_dim, 128), 128)
    c_pad = _round_up(max(n_classes, 128), 128)

    # ---- pad input (zeros for padded batch rows / embed lanes) -------------
    x_p = jnp.zeros((seq_len, b_pad, e_pad), jnp.float32)
    x_p = x_p.at[:, :batch, :embeds_dim].set(inp.astype(jnp.float32))

    # ---- weights: transpose to (in, out) and place gates on 128-lane tiles -
    wih_t = params["w_ih"].T                                  # (E, 4H)
    whh_t = params["w_hh"].T                                  # (H, 4H)
    b_all = params["b_ih"] + params["b_hh"]                   # (4H,)
    wlin_t = params["w_lin"].T                                # (H, C)
    blin = params["b_lin"]                                    # (C,)

    def pad_gate_mat(w_t, in_pad):
        out = jnp.zeros((in_pad, 4 * h_pad), jnp.float32)
        for k in range(4):
            out = out.at[:w_t.shape[0], k * h_pad:k * h_pad + hidden_dim].set(
                w_t[:, k * hidden_dim:(k + 1) * hidden_dim])
        return out

    wih_p = pad_gate_mat(wih_t, e_pad)                        # (E_pad, 4*H_pad)
    whh_p = pad_gate_mat(whh_t, h_pad)                        # (H_pad, 4*H_pad)
    b_p = jnp.zeros((1, 4 * h_pad), jnp.float32)
    for k in range(4):
        b_p = b_p.at[0, k * h_pad:k * h_pad + hidden_dim].set(
            b_all[k * hidden_dim:(k + 1) * hidden_dim])
    wlin_p = jnp.zeros((h_pad, c_pad), jnp.float32)
    wlin_p = wlin_p.at[:hidden_dim, :n_classes].set(wlin_t)
    blin_p = jnp.zeros((1, c_pad), jnp.float32).at[0, :n_classes].set(blin)

    def full_spec(shape):
        return pl.BlockSpec(shape, lambda i, n=len(shape): (0,) * n)

    kernel = functools.partial(_lstm_cls_kernel,
                               true_batch=batch, n_classes=n_classes)

    out_p = pl.pallas_call(
        kernel,
        out_shape=jax.ShapeDtypeStruct((seq_len, c_pad), jnp.float32),
        grid_spec=pltpu.PrefetchScalarGridSpec(
            num_scalar_prefetch=0,
            grid=(1,),
            in_specs=[
                full_spec((seq_len, b_pad, e_pad)),
                full_spec((e_pad, 4 * h_pad)),
                full_spec((h_pad, 4 * h_pad)),
                full_spec((1, 4 * h_pad)),
                full_spec((h_pad, c_pad)),
                full_spec((1, c_pad)),
            ],
            out_specs=full_spec((seq_len, c_pad)),
            scratch_shapes=[
                pltpu.VMEM((seq_len, b_pad, 4 * h_pad), jnp.float32),  # x-proj
                pltpu.VMEM((seq_len, b_pad, h_pad), jnp.float32),      # h states
            ],
        ),
        compiler_params=pltpu.CompilerParams(
            dimension_semantics=("arbitrary",)),
    )(x_p, wih_p, whh_p, b_p, wlin_p, blin_p)

    return out_p[:, :n_classes]


def _reference_forward(inp, params):
    """Pure-JAX reference matching the PyTorch forward (eval mode)."""
    wih, whh = params["w_ih"], params["w_hh"]
    b = params["b_ih"] + params["b_hh"]
    wlin, blin = params["w_lin"], params["b_lin"]
    H = whh.shape[1]
    batch = inp.shape[1]

    def cell(carry, x_t):
        h, c = carry
        g = x_t @ wih.T + h @ whh.T + b
        i = jax.nn.sigmoid(g[:, 0 * H:1 * H])
        f = jax.nn.sigmoid(g[:, 1 * H:2 * H])
        gg = jnp.tanh(g[:, 2 * H:3 * H])
        o = jax.nn.sigmoid(g[:, 3 * H:4 * H])
        c = f * c + i * gg
        h = o * jnp.tanh(c)
        return (h, c), h

    init = (jnp.zeros((batch, H), jnp.float32), jnp.zeros((batch, H), jnp.float32))
    _, hs = jax.lax.scan(cell, init, inp)            # (seq, batch, H)
    out = hs @ wlin.T + blin                         # (seq, batch, C)
    out = jnp.mean(out, axis=1)                      # (seq, C)
    return jax.nn.log_softmax(out, axis=-1)


def make_params(key, embeds_dim, hidden_dim, n_classes):
    ks = jax.random.split(key, 6)
    s = 0.1
    return {
        "w_ih": s * jax.random.normal(ks[0], (4 * hidden_dim, embeds_dim), jnp.float32),
        "w_hh": s * jax.random.normal(ks[1], (4 * hidden_dim, hidden_dim), jnp.float32),
        "b_ih": s * jax.random.normal(ks[2], (4 * hidden_dim,), jnp.float32),
        "b_hh": s * jax.random.normal(ks[3], (4 * hidden_dim,), jnp.float32),
        "w_lin": s * jax.random.normal(ks[4], (n_classes, hidden_dim), jnp.float32),
        "b_lin": s * jax.random.normal(ks[5], (n_classes,), jnp.float32),
    }


if __name__ == "__main__":
    seq_len, batch, embeds_dim, hidden_dim, n_classes = 8, 2, 16, 32, 10

    key = jax.random.PRNGKey(0)
    k_inp, k_par = jax.random.split(key)
    inp = jax.random.normal(k_inp, (seq_len, batch, embeds_dim), jnp.float32)
    params = make_params(k_par, embeds_dim, hidden_dim, n_classes)

    out = rnn_classifier_forward(inp, params)
    out = jax.block_until_ready(out)

    ref = _reference_forward(inp, params)
    assert out.shape == (seq_len, n_classes)
    assert jnp.allclose(out, ref, atol=1e-4, rtol=1e-4), "mismatch vs JAX reference"

    print("KERNEL_OK")
</pallas_src>

<mosaic_0001>
module attributes {stable_mosaic.version = 11 : i64} {
  func.func @_lstm_cls_kernel(%arg0: i32, %arg1: memref<8x8x128xf32, #tpu.memory_space<vmem>>, %arg2: memref<128x512xf32, #tpu.memory_space<vmem>>, %arg3: memref<128x512xf32, #tpu.memory_space<vmem>>, %arg4: memref<1x512xf32, #tpu.memory_space<vmem>>, %arg5: memref<128x128xf32, #tpu.memory_space<vmem>>, %arg6: memref<1x128xf32, #tpu.memory_space<vmem>>, %arg7: memref<8x128xf32, #tpu.memory_space<vmem>>, %arg8: memref<8x8x512xf32, #tpu.memory_space<vmem>>, %arg9: memref<8x8x128xf32, #tpu.memory_space<vmem>>) attributes {dimension_semantics = [#tpu.dimension_semantics<arbitrary>], iteration_bounds = array<i64: 1>, scalar_prefetch = 0 : i64, scratch_operands = 2 : i64, tpu.core_type = #tpu.core_type<tc>, window_params = [{pipeline_mode = #tpu.pipeline_mode<synchronous>, transform_indices = @transform_0, window_bounds = array<i64: 8, 8, 128>}, {pipeline_mode = #tpu.pipeline_mode<synchronous>, transform_indices = @transform_1, window_bounds = array<i64: 128, 512>}, {pipeline_mode = #tpu.pipeline_mode<synchronous>, transform_indices = @transform_2, window_bounds = array<i64: 128, 512>}, {pipeline_mode = #tpu.pipeline_mode<synchronous>, transform_indices = @transform_3, window_bounds = array<i64: 1, 512>}, {pipeline_mode = #tpu.pipeline_mode<synchronous>, transform_indices = @transform_4, window_bounds = array<i64: 128, 128>}, {pipeline_mode = #tpu.pipeline_mode<synchronous>, transform_indices = @transform_5, window_bounds = array<i64: 1, 128>}, {pipeline_mode = #tpu.pipeline_mode<synchronous>, transform_indices = @transform_6, window_bounds = array<i64: 8, 128>}]} {
    %c0 = arith.constant 0 : index
    %c0_0 = arith.constant 0 : index
    %c0_1 = arith.constant 0 : index
    %0 = vector.load %arg1[%c0, %c0_0, %c0_1] : memref<8x8x128xf32, #tpu.memory_space<vmem>>, vector<8x8x128xf32>
    %1 = vector.shape_cast %0 : vector<8x8x128xf32> to vector<64x128xf32>
    %c0_2 = arith.constant 0 : index
    %c0_3 = arith.constant 0 : index
    %2 = vector.load %arg2[%c0_2, %c0_3] : memref<128x512xf32, #tpu.memory_space<vmem>>, vector<128x512xf32>
    %cst = arith.constant dense<0.000000e+00> : vector<64x512xf32>
    %3 = tpu.matmul %1, %2, %cst {dimension_numbers = #tpu.dot_dimension_numbers<[1], [0], [0], [1], [0, 0, 1, 1], [], []>} : vector<64x128xf32>, vector<128x512xf32>, vector<64x512xf32> -> vector<64x512xf32>
    %c0_4 = arith.constant 0 : index
    %c0_5 = arith.constant 0 : index
    %4 = vector.load %arg4[%c0_4, %c0_5] : memref<1x512xf32, #tpu.memory_space<vmem>>, vector<1x512xf32>
    %5 = vector.broadcast %4 : vector<1x512xf32> to vector<64x512xf32>
    %6 = arith.addf %3, %5 : vector<64x512xf32>
    %7 = vector.shape_cast %6 : vector<64x512xf32> to vector<8x8x512xf32>
    %c0_6 = arith.constant 0 : index
    %c0_7 = arith.constant 0 : index
    %c0_8 = arith.constant 0 : index
    %8 = vector.load %arg8[%c0_6, %c0_7, %c0_8] : memref<8x8x512xf32, #tpu.memory_space<vmem>>, vector<8x8x512xf32>
    tpu.vector_store %arg8[%c0_6, %c0_7, %c0_8], %7 {strides = array<i32>} : memref<8x8x512xf32, #tpu.memory_space<vmem>>, vector<8x8x512xf32>,
    %c0_9 = arith.constant 0 : index
    %c0_10 = arith.constant 0 : index
    %9 = vector.load %arg3[%c0_9, %c0_10] : memref<128x512xf32, #tpu.memory_space<vmem>>, vector<128x512xf32>
    %cst_11 = arith.constant 0.000000e+00 : f32
    %10 = vector.broadcast %cst_11 : f32 to vector<8x128xf32>
    %cst_12 = arith.constant 0.000000e+00 : f32
    %11 = vector.broadcast %cst_12 : f32 to vector<8x128xf32>
    %c0_i32 = arith.constant 0 : i32
    %12 = arith.index_cast %c0_i32 : i32 to index
    %c0_13 = arith.constant 0 : index
    %c0_14 = arith.constant 0 : index
    %13 = vector.load %arg8[%12, %c0_13, %c0_14] : memref<8x8x512xf32, #tpu.memory_space<vmem>>, vector<1x8x512xf32>
    %14 = vector.shape_cast %13 : vector<1x8x512xf32> to vector<8x512xf32>
    %cst_15 = arith.constant dense<0.000000e+00> : vector<8x512xf32>
    %15 = tpu.matmul %10, %9, %cst_15 {dimension_numbers = #tpu.dot_dimension_numbers<[1], [0], [0], [1], [0, 0, 1, 1], [], []>} : vector<8x128xf32>, vector<128x512xf32>, vector<8x512xf32> -> vector<8x512xf32>
    %16 = arith.addf %14, %15 : vector<8x512xf32>
    %17 = vector.extract_strided_slice %16 {offsets = [0, 0], sizes = [8, 128], strides = [1, 1]} : vector<8x512xf32> to vector<8x128xf32>
    %18 = arith.negf %17 : vector<8x128xf32>
    %19 = math.exp %18 : vector<8x128xf32>
    %cst_16 = arith.constant 1.000000e+00 : f32
    %20 = vector.broadcast %cst_16 : f32 to vector<8x128xf32>
    %21 = arith.addf %20, %19 : vector<8x128xf32>
    %22 = arith.divf %20, %21 : vector<8x128xf32>
    %23 = vector.extract_strided_slice %16 {offsets = [0, 128], sizes = [8, 128], strides = [1, 1]} : vector<8x512xf32> to vector<8x128xf32>
    %24 = arith.negf %23 : vector<8x128xf32>
    %25 = math.exp %24 : vector<8x128xf32>
    %cst_17 = arith.constant 1.000000e+00 : f32
    %26 = vector.broadcast %cst_17 : f32 to vector<8x128xf32>
    %27 = arith.addf %26, %25 : vector<8x128xf32>
    %28 = arith.divf %26, %27 : vector<8x128xf32>
    %29 = vector.extract_strided_slice %16 {offsets = [0, 256], sizes = [8, 128], strides = [1, 1]} : vector<8x512xf32> to vector<8x128xf32>
    %30 = math.tanh %29 : vector<8x128xf32>
    %31 = vector.extract_strided_slice %16 {offsets = [0, 384], sizes = [8, 128], strides = [1, 1]} : vector<8x512xf32> to vector<8x128xf32>
    %32 = arith.negf %31 : vector<8x128xf32>
    %33 = math.exp %32 : vector<8x128xf32>
    %cst_18 = arith.constant 1.000000e+00 : f32
    %34 = vector.broadcast %cst_18 : f32 to vector<8x128xf32>
    %35 = arith.addf %34, %33 : vector<8x128xf32>
    %36 = arith.divf %34, %35 : vector<8x128xf32>
    %37 = arith.mulf %28, %11 : vector<8x128xf32>
    %38 = arith.mulf %22, %30 : vector<8x128xf32>
    %39 = arith.addf %37, %38 : vector<8x128xf32>
    %40 = math.tanh %39 : vector<8x128xf32>
    %41 = arith.mulf %36, %40 : vector<8x128xf32>
    %42 = arith.index_cast %c0_i32 : i32 to index
    %c0_19 = arith.constant 0 : index
    %c0_20 = arith.constant 0 : index
    %43 = vector.load %arg9[%42, %c0_19, %c0_20] : memref<8x8x128xf32, #tpu.memory_space<vmem>>, vector<1x8x128xf32>
    %44 = vector.shape_cast %43 : vector<1x8x128xf32> to vector<8x128xf32>
    %45 = vector.shape_cast %41 : vector<8x128xf32> to vector<1x8x128xf32>
    tpu.vector_store %arg9[%42, %c0_19, %c0_20], %45 {strides = array<i32>} : memref<8x8x128xf32, #tpu.memory_space<vmem>>, vector<1x8x128xf32>,
    %c1_i32 = arith.constant 1 : i32
    %46 = arith.index_cast %c1_i32 : i32 to index
    %c0_21 = arith.constant 0 : index
    %c0_22 = arith.constant 0 : index
    %47 = vector.load %arg8[%46, %c0_21, %c0_22] : memref<8x8x512xf32, #tpu.memory_space<vmem>>, vector<1x8x512xf32>
    %48 = vector.shape_cast %47 : vector<1x8x512xf32> to vector<8x512xf32>
    %cst_23 = arith.constant dense<0.000000e+00> : vector<8x512xf32>
    %49 = tpu.matmul %41, %9, %cst_23 {dimension_numbers = #tpu.dot_dimension_numbers<[1], [0], [0], [1], [0, 0, 1, 1], [], []>} : vector<8x128xf32>, vector<128x512xf32>, vector<8x512xf32> -> vector<8x512xf32>
    %50 = arith.addf %48, %49 : vector<8x512xf32>
    %51 = vector.extract_strided_slice %50 {offsets = [0, 0], sizes = [8, 128], strides = [1, 1]} : vector<8x512xf32> to vector<8x128xf32>
    %52 = arith.negf %51 : vector<8x128xf32>
    %53 = math.exp %52 : vector<8x128xf32>
    %cst_24 = arith.constant 1.000000e+00 : f32
    %54 = vector.broadcast %cst_24 : f32 to vector<8x128xf32>
    %55 = arith.addf %54, %53 : vector<8x128xf32>
    %56 = arith.divf %54, %55 : vector<8x128xf32>
    %57 = vector.extract_strided_slice %50 {offsets = [0, 128], sizes = [8, 128], strides = [1, 1]} : vector<8x512xf32> to vector<8x128xf32>
    %58 = arith.negf %57 : vector<8x128xf32>
    %59 = math.exp %58 : vector<8x128xf32>
    %cst_25 = arith.constant 1.000000e+00 : f32
    %60 = vector.broadcast %cst_25 : f32 to vector<8x128xf32>
    %61 = arith.addf %60, %59 : vector<8x128xf32>
    %62 = arith.divf %60, %61 : vector<8x128xf32>
    %63 = vector.extract_strided_slice %50 {offsets = [0, 256], sizes = [8, 128], strides = [1, 1]} : vector<8x512xf32> to vector<8x128xf32>
    %64 = math.tanh %63 : vector<8x128xf32>
    %65 = vector.extract_strided_slice %50 {offsets = [0, 384], sizes = [8, 128], strides = [1, 1]} : vector<8x512xf32> to vector<8x128xf32>
    %66 = arith.negf %65 : vector<8x128xf32>
    %67 = math.exp %66 : vector<8x128xf32>
    %cst_26 = arith.constant 1.000000e+00 : f32
    %68 = vector.broadcast %cst_26 : f32 to vector<8x128xf32>
    %69 = arith.addf %68, %67 : vector<8x128xf32>
    %70 = arith.divf %68, %69 : vector<8x128xf32>
    %71 = arith.mulf %62, %39 : vector<8x128xf32>
    %72 = arith.mulf %56, %64 : vector<8x128xf32>
    %73 = arith.addf %71, %72 : vector<8x128xf32>
    %74 = math.tanh %73 : vector<8x128xf32>
    %75 = arith.mulf %70, %74 : vector<8x128xf32>
    %76 = arith.index_cast %c1_i32 : i32 to index
    %c0_27 = arith.constant 0 : index
    %c0_28 = arith.constant 0 : index
    %77 = vector.load %arg9[%76, %c0_27, %c0_28] : memref<8x8x128xf32, #tpu.memory_space<vmem>>, vector<1x8x128xf32>
    %78 = vector.shape_cast %77 : vector<1x8x128xf32> to vector<8x128xf32>
    %79 = vector.shape_cast %75 : vector<8x128xf32> to vector<1x8x128xf32>
    tpu.vector_store %arg9[%76, %c0_27, %c0_28], %79 {strides = array<i32>} : memref<8x8x128xf32, #tpu.memory_space<vmem>>, vector<1x8x128xf32>,
    %c2_i32 = arith.constant 2 : i32
    %80 = arith.index_cast %c2_i32 : i32 to index
    %c0_29 = arith.constant 0 : index
    %c0_30 = arith.constant 0 : index
    %81 = vector.load %arg8[%80, %c0_29, %c0_30] : memref<8x8x512xf32, #tpu.memory_space<vmem>>, vector<1x8x512xf32>
    %82 = vector.shape_cast %81 : vector<1x8x512xf32> to vector<8x512xf32>
    %cst_31 = arith.constant dense<0.000000e+00> : vector<8x512xf32>
    %83 = tpu.matmul %75, %9, %cst_31 {dimension_numbers = #tpu.dot_dimension_numbers<[1], [0], [0], [1], [0, 0, 1, 1], [], []>} : vector<8x128xf32>, vector<128x512xf32>, vector<8x512xf32> -> vector<8x512xf32>
    %84 = arith.addf %82, %83 : vector<8x512xf32>
    %85 = vector.extract_strided_slice %84 {offsets = [0, 0], sizes = [8, 128], strides = [1, 1]} : vector<8x512xf32> to vector<8x128xf32>
    %86 = arith.negf %85 : vector<8x128xf32>
    %87 = math.exp %86 : vector<8x128xf32>
    %cst_32 = arith.constant 1.000000e+00 : f32
    %88 = vector.broadcast %cst_32 : f32 to vector<8x128xf32>
    %89 = arith.addf %88, %87 : vector<8x128xf32>
    %90 = arith.divf %88, %89 : vector<8x128xf32>
    %91 = vector.extract_strided_slice %84 {offsets = [0, 128], sizes = [8, 128], strides = [1, 1]} : vector<8x512xf32> to vector<8x128xf32>
    %92 = arith.negf %91 : vector<8x128xf32>
    %93 = math.exp %92 : vector<8x128xf32>
    %cst_33 = arith.constant 1.000000e+00 : f32
    %94 = vector.broadcast %cst_33 : f32 to vector<8x128xf32>
    %95 = arith.addf %94, %93 : vector<8x128xf32>
    %96 = arith.divf %94, %95 : vector<8x128xf32>
    %97 = vector.extract_strided_slice %84 {offsets = [0, 256], sizes = [8, 128], strides = [1, 1]} : vector<8x512xf32> to vector<8x128xf32>
    %98 = math.tanh %97 : vector<8x128xf32>
    %99 = vector.extract_strided_slice %84 {offsets = [0, 384], sizes = [8, 128], strides = [1, 1]} : vector<8x512xf32> to vector<8x128xf32>
    %100 = arith.negf %99 : vector<8x128xf32>
    %101 = math.exp %100 : vector<8x128xf32>
    %cst_34 = arith.constant 1.000000e+00 : f32
    %102 = vector.broadcast %cst_34 : f32 to vector<8x128xf32>
    %103 = arith.addf %102, %101 : vector<8x128xf32>
    %104 = arith.divf %102, %103 : vector<8x128xf32>
    %105 = arith.mulf %96, %73 : vector<8x128xf32>
    %106 = arith.mulf %90, %98 : vector<8x128xf32>
    %107 = arith.addf %105, %106 : vector<8x128xf32>
    %108 = math.tanh %107 : vector<8x128xf32>
    %109 = arith.mulf %104, %108 : vector<8x128xf32>
    %110 = arith.index_cast %c2_i32 : i32 to index
    %c0_35 = arith.constant 0 : index
    %c0_36 = arith.constant 0 : index
    %111 = vector.load %arg9[%110, %c0_35, %c0_36] : memref<8x8x128xf32, #tpu.memory_space<vmem>>, vector<1x8x128xf32>
    %112 = vector.shape_cast %111 : vector<1x8x128xf32> to vector<8x128xf32>
    %113 = vector.shape_cast %109 : vector<8x128xf32> to vector<1x8x128xf32>
    tpu.vector_store %arg9[%110, %c0_35, %c0_36], %113 {strides = array<i32>} : memref<8x8x128xf32, #tpu.memory_space<vmem>>, vector<1x8x128xf32>,
    %c3_i32 = arith.constant 3 : i32
    %114 = arith.index_cast %c3_i32 : i32 to index
    %c0_37 = arith.constant 0 : index
    %c0_38 = arith.constant 0 : index
    %115 = vector.load %arg8[%114, %c0_37, %c0_38] : memref<8x8x512xf32, #tpu.memory_space<vmem>>, vector<1x8x512xf32>
    %116 = vector.shape_cast %115 : vector<1x8x512xf32> to vector<8x512xf32>
    %cst_39 = arith.constant dense<0.000000e+00> : vector<8x512xf32>
    %117 = tpu.matmul %109, %9, %cst_39 {dimension_numbers = #tpu.dot_dimension_numbers<[1], [0], [0], [1], [0, 0, 1, 1], [], []>} : vector<8x128xf32>, vector<128x512xf32>, vector<8x512xf32> -> vector<8x512xf32>
    %118 = arith.addf %116, %117 : vector<8x512xf32>
    %119 = vector.extract_strided_slice %118 {offsets = [0, 0], sizes = [8, 128], strides = [1, 1]} : vector<8x512xf32> to vector<8x128xf32>
    %120 = arith.negf %119 : vector<8x128xf32>
    %121 = math.exp %120 : vector<8x128xf32>
    %cst_40 = arith.constant 1.000000e+00 : f32
    %122 = vector.broadcast %cst_40 : f32 to vector<8x128xf32>
    %123 = arith.addf %122, %121 : vector<8x128xf32>
    %124 = arith.divf %122, %123 : vector<8x128xf32>
    %125 = vector.extract_strided_slice %118 {offsets = [0, 128], sizes = [8, 128], strides = [1, 1]} : vector<8x512xf32> to vector<8x128xf32>
    %126 = arith.negf %125 : vector<8x128xf32>
    %127 = math.exp %126 : vector<8x128xf32>
    %cst_41 = arith.constant 1.000000e+00 : f32
    %128 = vector.broadcast %cst_41 : f32 to vector<8x128xf32>
    %129 = arith.addf %128, %127 : vector<8x128xf32>
    %130 = arith.divf %128, %129 : vector<8x128xf32>
    %131 = vector.extract_strided_slice %118 {offsets = [0, 256], sizes = [8, 128], strides = [1, 1]} : vector<8x512xf32> to vector<8x128xf32>
    %132 = math.tanh %131 : vector<8x128xf32>
    %133 = vector.extract_strided_slice %118 {offsets = [0, 384], sizes = [8, 128], strides = [1, 1]} : vector<8x512xf32> to vector<8x128xf32>
    %134 = arith.negf %133 : vector<8x128xf32>
    %135 = math.exp %134 : vector<8x128xf32>
    %cst_42 = arith.constant 1.000000e+00 : f32
    %136 = vector.broadcast %cst_42 : f32 to vector<8x128xf32>
    %137 = arith.addf %136, %135 : vector<8x128xf32>
    %138 = arith.divf %136, %137 : vector<8x128xf32>
    %139 = arith.mulf %130, %107 : vector<8x128xf32>
    %140 = arith.mulf %124, %132 : vector<8x128xf32>
    %141 = arith.addf %139, %140 : vector<8x128xf32>
    %142 = math.tanh %141 : vector<8x128xf32>
    %143 = arith.mulf %138, %142 : vector<8x128xf32>
    %144 = arith.index_cast %c3_i32 : i32 to index
    %c0_43 = arith.constant 0 : index
    %c0_44 = arith.constant 0 : index
    %145 = vector.load %arg9[%144, %c0_43, %c0_44] : memref<8x8x128xf32, #tpu.memory_space<vmem>>, vector<1x8x128xf32>
    %146 = vector.shape_cast %145 : vector<1x8x128xf32> to vector<8x128xf32>
    %147 = vector.shape_cast %143 : vector<8x128xf32> to vector<1x8x128xf32>
    tpu.vector_store %arg9[%144, %c0_43, %c0_44], %147 {strides = array<i32>} : memref<8x8x128xf32, #tpu.memory_space<vmem>>, vector<1x8x128xf32>,
    %c4_i32 = arith.constant 4 : i32
    %148 = arith.index_cast %c4_i32 : i32 to index
    %c0_45 = arith.constant 0 : index
    %c0_46 = arith.constant 0 : index
    %149 = vector.load %arg8[%148, %c0_45, %c0_46] : memref<8x8x512xf32, #tpu.memory_space<vmem>>, vector<1x8x512xf32>
    %150 = vector.shape_cast %149 : vector<1x8x512xf32> to vector<8x512xf32>
    %cst_47 = arith.constant dense<0.000000e+00> : vector<8x512xf32>
    %151 = tpu.matmul %143, %9, %cst_47 {dimension_numbers = #tpu.dot_dimension_numbers<[1], [0], [0], [1], [0, 0, 1, 1], [], []>} : vector<8x128xf32>, vector<128x512xf32>, vector<8x512xf32> -> vector<8x512xf32>
    %152 = arith.addf %150, %151 : vector<8x512xf32>
    %153 = vector.extract_strided_slice %152 {offsets = [0, 0], sizes = [8, 128], strides = [1, 1]} : vector<8x512xf32> to vector<8x128xf32>
    %154 = arith.negf %153 : vector<8x128xf32>
    %155 = math.exp %154 : vector<8x128xf32>
    %cst_48 = arith.constant 1.000000e+00 : f32
    %156 = vector.broadcast %cst_48 : f32 to vector<8x128xf32>
    %157 = arith.addf %156, %155 : vector<8x128xf32>
    %158 = arith.divf %156, %157 : vector<8x128xf32>
    %159 = vector.extract_strided_slice %152 {offsets = [0, 128], sizes = [8, 128], strides = [1, 1]} : vector<8x512xf32> to vector<8x128xf32>
    %160 = arith.negf %159 : vector<8x128xf32>
    %161 = math.exp %160 : vector<8x128xf32>
    %cst_49 = arith.constant 1.000000e+00 : f32
    %162 = vector.broadcast %cst_49 : f32 to vector<8x128xf32>
    %163 = arith.addf %162, %161 : vector<8x128xf32>
    %164 = arith.divf %162, %163 : vector<8x128xf32>
    %165 = vector.extract_strided_slice %152 {offsets = [0, 256], sizes = [8, 128], strides = [1, 1]} : vector<8x512xf32> to vector<8x128xf32>
    %166 = math.tanh %165 : vector<8x128xf32>
    %167 = vector.extract_strided_slice %152 {offsets = [0, 384], sizes = [8, 128], strides = [1, 1]} : vector<8x512xf32> to vector<8x128xf32>
    %168 = arith.negf %167 : vector<8x128xf32>
    %169 = math.exp %168 : vector<8x128xf32>
    %cst_50 = arith.constant 1.000000e+00 : f32
    %170 = vector.broadcast %cst_50 : f32 to vector<8x128xf32>
    %171 = arith.addf %170, %169 : vector<8x128xf32>
    %172 = arith.divf %170, %171 : vector<8x128xf32>
    %173 = arith.mulf %164, %141 : vector<8x128xf32>
    %174 = arith.mulf %158, %166 : vector<8x128xf32>
    %175 = arith.addf %173, %174 : vector<8x128xf32>
    %176 = math.tanh %175 : vector<8x128xf32>
    %177 = arith.mulf %172, %176 : vector<8x128xf32>
    %178 = arith.index_cast %c4_i32 : i32 to index
    %c0_51 = arith.constant 0 : index
    %c0_52 = arith.constant 0 : index
    %179 = vector.load %arg9[%178, %c0_51, %c0_52] : memref<8x8x128xf32, #tpu.memory_space<vmem>>, vector<1x8x128xf32>
    %180 = vector.shape_cast %179 : vector<1x8x128xf32> to vector<8x128xf32>
    %181 = vector.shape_cast %177 : vector<8x128xf32> to vector<1x8x128xf32>
    tpu.vector_store %arg9[%178, %c0_51, %c0_52], %181 {strides = array<i32>} : memref<8x8x128xf32, #tpu.memory_space<vmem>>, vector<1x8x128xf32>,
    %c5_i32 = arith.constant 5 : i32
    %182 = arith.index_cast %c5_i32 : i32 to index
    %c0_53 = arith.constant 0 : index
    %c0_54 = arith.constant 0 : index
    %183 = vector.load %arg8[%182, %c0_53, %c0_54] : memref<8x8x512xf32, #tpu.memory_space<vmem>>, vector<1x8x512xf32>
    %184 = vector.shape_cast %183 : vector<1x8x512xf32> to vector<8x512xf32>
    %cst_55 = arith.constant dense<0.000000e+00> : vector<8x512xf32>
    %185 = tpu.matmul %177, %9, %cst_55 {dimension_numbers = #tpu.dot_dimension_numbers<[1], [0], [0], [1], [0, 0, 1, 1], [], []>} : vector<8x128xf32>, vector<128x512xf32>, vector<8x512xf32> -> vector<8x512xf32>
    %186 = arith.addf %184, %185 : vector<8x512xf32>
    %187 = vector.extract_strided_slice %186 {offsets = [0, 0], sizes = [8, 128], strides = [1, 1]} : vector<8x512xf32> to vector<8x128xf32>
    %188 = arith.negf %187 : vector<8x128xf32>
    %189 = math.exp %188 : vector<8x128xf32>
    %cst_56 = arith.constant 1.000000e+00 : f32
    %190 = vector.broadcast %cst_56 : f32 to vector<8x128xf32>
    %191 = arith.addf %190, %189 : vector<8x128xf32>
    %192 = arith.divf %190, %191 : vector<8x128xf32>
    %193 = vector.extract_strided_slice %186 {offsets = [0, 128], sizes = [8, 128], strides = [1, 1]} : vector<8x512xf32> to vector<8x128xf32>
    %194 = arith.negf %193 : vector<8x128xf32>
    %195 = math.exp %194 : vector<8x128xf32>
    %cst_57 = arith.constant 1.000000e+00 : f32
    %196 = vector.broadcast %cst_57 : f32 to vector<8x128xf32>
    %197 = arith.addf %196, %195 : vector<8x128xf32>
    %198 = arith.divf %196, %197 : vector<8x128xf32>
    %199 = vector.extract_strided_slice %186 {offsets = [0, 256], sizes = [8, 128], strides = [1, 1]} : vector<8x512xf32> to vector<8x128xf32>
    %200 = math.tanh %199 : vector<8x128xf32>
    %201 = vector.extract_strided_slice %186 {offsets = [0, 384], sizes = [8, 128], strides = [1, 1]} : vector<8x512xf32> to vector<8x128xf32>
    %202 = arith.negf %201 : vector<8x128xf32>
    %203 = math.exp %202 : vector<8x128xf32>
    %cst_58 = arith.constant 1.000000e+00 : f32
    %204 = vector.broadcast %cst_58 : f32 to vector<8x128xf32>
    %205 = arith.addf %204, %203 : vector<8x128xf32>
    %206 = arith.divf %204, %205 : vector<8x128xf32>
    %207 = arith.mulf %198, %175 : vector<8x128xf32>
    %208 = arith.mulf %192, %200 : vector<8x128xf32>
    %209 = arith.addf %207, %208 : vector<8x128xf32>
    %210 = math.tanh %209 : vector<8x128xf32>
    %211 = arith.mulf %206, %210 : vector<8x128xf32>
    %212 = arith.index_cast %c5_i32 : i32 to index
    %c0_59 = arith.constant 0 : index
    %c0_60 = arith.constant 0 : index
    %213 = vector.load %arg9[%212, %c0_59, %c0_60] : memref<8x8x128xf32, #tpu.memory_space<vmem>>, vector<1x8x128xf32>
    %214 = vector.shape_cast %213 : vector<1x8x128xf32> to vector<8x128xf32>
    %215 = vector.shape_cast %211 : vector<8x128xf32> to vector<1x8x128xf32>
    tpu.vector_store %arg9[%212, %c0_59, %c0_60], %215 {strides = array<i32>} : memref<8x8x128xf32, #tpu.memory_space<vmem>>, vector<1x8x128xf32>,
    %c6_i32 = arith.constant 6 : i32
    %216 = arith.index_cast %c6_i32 : i32 to index
    %c0_61 = arith.constant 0 : index
    %c0_62 = arith.constant 0 : index
    %217 = vector.load %arg8[%216, %c0_61, %c0_62] : memref<8x8x512xf32, #tpu.memory_space<vmem>>, vector<1x8x512xf32>
    %218 = vector.shape_cast %217 : vector<1x8x512xf32> to vector<8x512xf32>
    %cst_63 = arith.constant dense<0.000000e+00> : vector<8x512xf32>
    %219 = tpu.matmul %211, %9, %cst_63 {dimension_numbers = #tpu.dot_dimension_numbers<[1], [0], [0], [1], [0, 0, 1, 1], [], []>} : vector<8x128xf32>, vector<128x512xf32>, vector<8x512xf32> -> vector<8x512xf32>
    %220 = arith.addf %218, %219 : vector<8x512xf32>
    %221 = vector.extract_strided_slice %220 {offsets = [0, 0], sizes = [8, 128], strides = [1, 1]} : vector<8x512xf32> to vector<8x128xf32>
    %222 = arith.negf %221 : vector<8x128xf32>
    %223 = math.exp %222 : vector<8x128xf32>
    %cst_64 = arith.constant 1.000000e+00 : f32
    %224 = vector.broadcast %cst_64 : f32 to vector<8x128xf32>
    %225 = arith.addf %224, %223 : vector<8x128xf32>
    %226 = arith.divf %224, %225 : vector<8x128xf32>
    %227 = vector.extract_strided_slice %220 {offsets = [0, 128], sizes = [8, 128], strides = [1, 1]} : vector<8x512xf32> to vector<8x128xf32>
    %228 = arith.negf %227 : vector<8x128xf32>
    %229 = math.exp %228 : vector<8x128xf32>
    %cst_65 = arith.constant 1.000000e+00 : f32
    %230 = vector.broadcast %cst_65 : f32 to vector<8x128xf32>
    %231 = arith.addf %230, %229 : vector<8x128xf32>
    %232 = arith.divf %230, %231 : vector<8x128xf32>
    %233 = vector.extract_strided_slice %220 {offsets = [0, 256], sizes = [8, 128], strides = [1, 1]} : vector<8x512xf32> to vector<8x128xf32>
    %234 = math.tanh %233 : vector<8x128xf32>
    %235 = vector.extract_strided_slice %220 {offsets = [0, 384], sizes = [8, 128], strides = [1, 1]} : vector<8x512xf32> to vector<8x128xf32>
    %236 = arith.negf %235 : vector<8x128xf32>
    %237 = math.exp %236 : vector<8x128xf32>
    %cst_66 = arith.constant 1.000000e+00 : f32
    %238 = vector.broadcast %cst_66 : f32 to vector<8x128xf32>
    %239 = arith.addf %238, %237 : vector<8x128xf32>
    %240 = arith.divf %238, %239 : vector<8x128xf32>
    %241 = arith.mulf %232, %209 : vector<8x128xf32>
    %242 = arith.mulf %226, %234 : vector<8x128xf32>
    %243 = arith.addf %241, %242 : vector<8x128xf32>
    %244 = math.tanh %243 : vector<8x128xf32>
    %245 = arith.mulf %240, %244 : vector<8x128xf32>
    %246 = arith.index_cast %c6_i32 : i32 to index
    %c0_67 = arith.constant 0 : index
    %c0_68 = arith.constant 0 : index
    %247 = vector.load %arg9[%246, %c0_67, %c0_68] : memref<8x8x128xf32, #tpu.memory_space<vmem>>, vector<1x8x128xf32>
    %248 = vector.shape_cast %247 : vector<1x8x128xf32> to vector<8x128xf32>
    %249 = vector.shape_cast %245 : vector<8x128xf32> to vector<1x8x128xf32>
    tpu.vector_store %arg9[%246, %c0_67, %c0_68], %249 {strides = array<i32>} : memref<8x8x128xf32, #tpu.memory_space<vmem>>, vector<1x8x128xf32>,
    %c7_i32 = arith.constant 7 : i32
    %250 = arith.index_cast %c7_i32 : i32 to index
    %c0_69 = arith.constant 0 : index
    %c0_70 = arith.constant 0 : index
    %251 = vector.load %arg8[%250, %c0_69, %c0_70] : memref<8x8x512xf32, #tpu.memory_space<vmem>>, vector<1x8x512xf32>
    %252 = vector.shape_cast %251 : vector<1x8x512xf32> to vector<8x512xf32>
    %cst_71 = arith.constant dense<0.000000e+00> : vector<8x512xf32>
    %253 = tpu.matmul %245, %9, %cst_71 {dimension_numbers = #tpu.dot_dimension_numbers<[1], [0], [0], [1], [0, 0, 1, 1], [], []>} : vector<8x128xf32>, vector<128x512xf32>, vector<8x512xf32> -> vector<8x512xf32>
    %254 = arith.addf %252, %253 : vector<8x512xf32>
    %255 = vector.extract_strided_slice %254 {offsets = [0, 0], sizes = [8, 128], strides = [1, 1]} : vector<8x512xf32> to vector<8x128xf32>
    %256 = arith.negf %255 : vector<8x128xf32>
    %257 = math.exp %256 : vector<8x128xf32>
    %cst_72 = arith.constant 1.000000e+00 : f32
    %258 = vector.broadcast %cst_72 : f32 to vector<8x128xf32>
    %259 = arith.addf %258, %257 : vector<8x128xf32>
    %260 = arith.divf %258, %259 : vector<8x128xf32>
    %261 = vector.extract_strided_slice %254 {offsets = [0, 128], sizes = [8, 128], strides = [1, 1]} : vector<8x512xf32> to vector<8x128xf32>
    %262 = arith.negf %261 : vector<8x128xf32>
    %263 = math.exp %262 : vector<8x128xf32>
    %cst_73 = arith.constant 1.000000e+00 : f32
    %264 = vector.broadcast %cst_73 : f32 to vector<8x128xf32>
    %265 = arith.addf %264, %263 : vector<8x128xf32>
    %266 = arith.divf %264, %265 : vector<8x128xf32>
    %267 = vector.extract_strided_slice %254 {offsets = [0, 256], sizes = [8, 128], strides = [1, 1]} : vector<8x512xf32> to vector<8x128xf32>
    %268 = math.tanh %267 : vector<8x128xf32>
    %269 = vector.extract_strided_slice %254 {offsets = [0, 384], sizes = [8, 128], strides = [1, 1]} : vector<8x512xf32> to vector<8x128xf32>
    %270 = arith.negf %269 : vector<8x128xf32>
    %271 = math.exp %270 : vector<8x128xf32>
    %cst_74 = arith.constant 1.000000e+00 : f32
    %272 = vector.broadcast %cst_74 : f32 to vector<8x128xf32>
    %273 = arith.addf %272, %271 : vector<8x128xf32>
    %274 = arith.divf %272, %273 : vector<8x128xf32>
    %275 = arith.mulf %266, %243 : vector<8x128xf32>
    %276 = arith.mulf %260, %268 : vector<8x128xf32>
    %277 = arith.addf %275, %276 : vector<8x128xf32>
    %278 = math.tanh %277 : vector<8x128xf32>
    %279 = arith.mulf %274, %278 : vector<8x128xf32>
    %280 = arith.index_cast %c7_i32 : i32 to index
    %c0_75 = arith.constant 0 : index
    %c0_76 = arith.constant 0 : index
    %281 = vector.load %arg9[%280, %c0_75, %c0_76] : memref<8x8x128xf32, #tpu.memory_space<vmem>>, vector<1x8x128xf32>
    %282 = vector.shape_cast %281 : vector<1x8x128xf32> to vector<8x128xf32>
    %283 = vector.shape_cast %279 : vector<8x128xf32> to vector<1x8x128xf32>
    tpu.vector_store %arg9[%280, %c0_75, %c0_76], %283 {strides = array<i32>} : memref<8x8x128xf32, #tpu.memory_space<vmem>>, vector<1x8x128xf32>,
    %c8_i32 = arith.constant 8 : i32
    %c0_77 = arith.constant 0 : index
    %c0_78 = arith.constant 0 : index
    %c0_79 = arith.constant 0 : index
    %284 = vector.load %arg9[%c0_77, %c0_78, %c0_79] : memref<8x8x128xf32, #tpu.memory_space<vmem>>, vector<8x8x128xf32>
    %285 = vector.shape_cast %284 : vector<8x8x128xf32> to vector<64x128xf32>
    %c0_80 = arith.constant 0 : index
    %c0_81 = arith.constant 0 : index
    %286 = vector.load %arg5[%c0_80, %c0_81] : memref<128x128xf32, #tpu.memory_space<vmem>>, vector<128x128xf32>
    %cst_82 = arith.constant dense<0.000000e+00> : vector<64x128xf32>
    %287 = tpu.matmul %285, %286, %cst_82 {dimension_numbers = #tpu.dot_dimension_numbers<[1], [0], [0], [1], [0, 0, 1, 1], [], []>} : vector<64x128xf32>, vector<128x128xf32>, vector<64x128xf32> -> vector<64x128xf32>
    %c0_83 = arith.constant 0 : index
    %c0_84 = arith.constant 0 : index
    %288 = vector.load %arg6[%c0_83, %c0_84] : memref<1x128xf32, #tpu.memory_space<vmem>>, vector<1x128xf32>
    %289 = vector.broadcast %288 : vector<1x128xf32> to vector<64x128xf32>
    %290 = arith.addf %287, %289 : vector<64x128xf32>
    %291 = vector.shape_cast %290 : vector<64x128xf32> to vector<8x8x128xf32>
    %292 = tpu.iota {dimensions = array<i32: 1>} : vector<8x8x128xi32>
    %c2_i32_85 = arith.constant 2 : i32
    %293 = vector.broadcast %c2_i32_85 : i32 to vector<8x8x128xi32>
    %294 = arith.cmpi slt, %292, %293 : vector<8x8x128xi32>
    %cst_86 = arith.constant 0.000000e+00 : f32
    %295 = vector.broadcast %cst_86 : f32 to vector<8x8x128xf32>
    %296 = arith.select %294, %291, %295 : vector<8x8x128xi1>, vector<8x8x128xf32>
    %cst_87 = arith.constant dense<0.000000e+00> : vector<8x128xf32>
    %297 = vector.multi_reduction <add>, %296, %cst_87 [1] : vector<8x8x128xf32> to vector<8x128xf32>
    %cst_88 = arith.constant 2.000000e+00 : f32
    %298 = vector.broadcast %cst_88 : f32 to vector<8x128xf32>
    %299 = arith.divf %297, %298 : vector<8x128xf32>
    %300 = tpu.iota {dimensions = array<i32: 1>} : vector<8x128xi32>
    %c10_i32 = arith.constant 10 : i32
    %301 = vector.broadcast %c10_i32 : i32 to vector<8x128xi32>
    %302 = arith.cmpi slt, %300, %301 : vector<8x128xi32>
    %cst_89 = arith.constant -1.000000e+30 : f32
    %303 = vector.broadcast %cst_89 : f32 to vector<8x128xf32>
    %304 = arith.select %302, %299, %303 : vector<8x128xi1>, vector<8x128xf32>
    %cst_90 = arith.constant dense<0xFF800000> : vector<8xf32>
    %305 = vector.multi_reduction <maximumf>, %304, %cst_90 [1] : vector<8x128xf32> to vector<8xf32>
    %306 = vector.shape_cast %305 : vector<8xf32> to vector<8x1xf32>
    %307 = vector.broadcast %306 : vector<8x1xf32> to vector<8x128xf32>
    %308 = arith.subf %304, %307 : vector<8x128xf32>
    %309 = math.exp %308 : vector<8x128xf32>
    %cst_91 = arith.constant dense<0.000000e+00> : vector<8xf32>
    %310 = vector.multi_reduction <add>, %309, %cst_91 [1] : vector<8x128xf32> to vector<8xf32>
    %311 = vector.shape_cast %310 : vector<8xf32> to vector<8x1xf32>
    %312 = math.log %311 : vector<8x1xf32>
    %313 = arith.addf %306, %312 : vector<8x1xf32>
    %314 = vector.broadcast %313 : vector<8x1xf32> to vector<8x128xf32>
    %315 = arith.subf %304, %314 : vector<8x128xf32>
    %c0_92 = arith.constant 0 : index
    %c0_93 = arith.constant 0 : index
    %316 = vector.load %arg7[%c0_92, %c0_93] : memref<8x128xf32, #tpu.memory_space<vmem>>, vector<8x128xf32>
    tpu.vector_store %arg7[%c0_92, %c0_93], %315 {strides = array<i32>} : memref<8x128xf32, #tpu.memory_space<vmem>>, vector<8x128xf32>,
    return
  }
  func.func @transform_0(%arg0: i32) -> (i32, i32, i32) {
    %c0_i32 = arith.constant 0 : i32
    %c0_i32_0 = arith.constant 0 : i32
    %c0_i32_1 = arith.constant 0 : i32
    %c0_i32_2 = arith.constant 0 : i32
    return %c0_i32, %c0_i32_0, %c0_i32_1 : i32, i32, i32
  }
  func.func @transform_1(%arg0: i32) -> (i32, i32) {
    %c0_i32 = arith.constant 0 : i32
    %c0_i32_0 = arith.constant 0 : i32
    %c0_i32_1 = arith.constant 0 : i32
    return %c0_i32, %c0_i32_0 : i32, i32
  }
  func.func @transform_2(%arg0: i32) -> (i32, i32) {
    %c0_i32 = arith.constant 0 : i32
    %c0_i32_0 = arith.constant 0 : i32
    %c0_i32_1 = arith.constant 0 : i32
    return %c0_i32, %c0_i32_0 : i32, i32
  }
  func.func @transform_3(%arg0: i32) -> (i32, i32) {
    %c0_i32 = arith.constant 0 : i32
    %c0_i32_0 = arith.constant 0 : i32
    %c0_i32_1 = arith.constant 0 : i32
    return %c0_i32, %c0_i32_0 : i32, i32
  }
  func.func @transform_4(%arg0: i32) -> (i32, i32) {
    %c0_i32 = arith.constant 0 : i32
    %c0_i32_0 = arith.constant 0 : i32
    %c0_i32_1 = arith.constant 0 : i32
    return %c0_i32, %c0_i32_0 : i32, i32
  }
  func.func @transform_5(%arg0: i32) -> (i32, i32) {
    %c0_i32 = arith.constant 0 : i32
    %c0_i32_0 = arith.constant 0 : i32
    %c0_i32_1 = arith.constant 0 : i32
    return %c0_i32, %c0_i32_0 : i32, i32
  }
  func.func @transform_6(%arg0: i32) -> (i32, i32) {
    %c0_i32 = arith.constant 0 : i32
    %c0_i32_0 = arith.constant 0 : i32
    %c0_i32_1 = arith.constant 0 : i32
    return %c0_i32, %c0_i32_0 : i32, i32
  }
}

</mosaic_0001>

<bundles_post_ra>
// kernel: tpu_custom_call.1
= control target key start
LH: loop header
LB: loop body
LE: loop exit
PB: predicated region body
PF: predicated region fallthrough
CT: control target
= control target key end

     0   :  { %11 = vsyncpa [#allocation5], 0  ;;  %s3331_s0 = inlined_call_operand.hbm [shape: f32[8,8,128], index: 0, kind: input, shape index: {}]   ;;  %s3332_s1 = inlined_call_operand.hbm [shape: f32[128,512], index: 1, kind: input, shape index: {}]   ;;  %s3333_s2 = inlined_call_operand.hbm [shape: f32[128,512], index: 2, kind: input, shape index: {}]   ;;  %s3334_s3 = inlined_call_operand.hbm [shape: f32[1,512], index: 3, kind: input, shape index: {}]   ;;  %s3335_s4 = inlined_call_operand.hbm [shape: f32[128,128], index: 4, kind: input, shape index: {}]   ;;  %s3336_s5 = inlined_call_operand.vmem [shape: f32[1,128], index: 5, kind: input, shape index: {}]   ;;  %s3337_s6 = inlined_call_operand.hbm [shape: f32[8,128], index: 6, kind: output, shape index: {}]  }
   0x1   :  { %12 = vsyncpa [#allocation8], 0 }
   0x2   :  { %13 = vsyncpa [#allocation11], 0  ;;  %s32_s23 = sshll.u32 %s3332_s1, 4  ;;  %s33_s23 = int_to_ptr.hbm [resolvable:$true] %s32_s23 }
   0x3   :  { %14 = vsyncpa [#allocation6], 0  ;;  %s2292_s24 = smov [#allocation7]   ;;  %s59_s28 = sshll.u32 %s3334_s3, 4  ;;  %s60_s28 = int_to_ptr.hbm [resolvable:$true] %s59_s28 }
   0x4   :  { %s34_s25 = sshll.u32 %s2292_s24, 4  ;;  %s2293_s29 = smov 512   ;;  %s35_s25 = int_to_ptr.vmem [resolvable:$true] %s34_s25 }
   0x5   :  { %s2294_s30 = smov 32   ;;  %s2295_s7 = smov [#allocation10]  }
   0x6   :  { %40 = dma.hbm_to_vmem [thread:$0]  %s33_s23, 8192, %s35_s25, [#allocation8], %s2293_s29, %s2293_s29, %s2294_s30  }
   0x7   :  { %s61_s8 = sshll.u32 %s2295_s7, 4  ;;  %s19_s11 = sshll.u32 %s3331_s0, 4  ;;  %s62_s8 = int_to_ptr.vmem [resolvable:$true] %s61_s8  ;;  %s20_s11 = int_to_ptr.hbm [resolvable:$true] %s19_s11 }
   0x8   :  { %64 = dma.hbm_to_vmem [thread:$0]  %s60_s28, 64, %s62_s8, [#allocation11]  }
   0x9   :  { %s2296_s1 = smov [#allocation4]   ;;  %s45_s3 = sshll.u32 %s3333_s2, 4  ;;  %s46_s3 = int_to_ptr.hbm [resolvable:$true] %s45_s3 }
   0xa   :  { %s21_s12 = sshll.u32 %s2296_s1, 4  ;;  %s2297_s15 = smov 128   ;;  %s22_s12 = int_to_ptr.vmem [resolvable:$true] %s21_s12 }
   0xb   :  { %s2298_s16 = smov 8   ;;  %s2299_s17 = smov [#allocation9]  }
   0xc   :  { %27 = dma.hbm_to_vmem [thread:$0]  %s20_s11, 1024, %s22_s12, [#allocation5], %s2297_s15, %s2297_s15, %s2298_s16  }
   0xd   :  { %s47_s18 = sshll.u32 %s2299_s17, 4  ;;  %s69_s0 = sshll.u32 %s3335_s4, 4  ;;  %s48_s18 = int_to_ptr.vmem [resolvable:$true] %s47_s18  ;;  %s70_s0 = int_to_ptr.hbm [resolvable:$true] %s69_s0 }
   0xe   :  { %53 = dma.hbm_to_vmem [thread:$0]  %s46_s3, 8192, %s48_s18, [#allocation8], %s2293_s29, %s2293_s29, %s2294_s30  }
   0xf   :  { %s2300_s21 = smov [#allocation12]  }
  0x10   :  { %s71_s22 = sshll.u32 %s2300_s21, 4  ;;  %s72_s22 = int_to_ptr.vmem [resolvable:$true] %s71_s22 }
  0x11   :  { %77 = dma.hbm_to_vmem [thread:$0]  %s70_s0, 2048, %s72_s22, [#allocation11], %s2297_s15, %s2297_s15, %s2298_s16  }
  0x12   :  { %2284 = dma.done.wait [#allocation5], 1024  }
  0x13   :  { %2285 = vsyncadd [#allocation5], 4294966272 }
  0x14   :  { %2286 = dma.done.wait [#allocation8], 16384  }
  0x15   :  { %2287 = vsyncadd [#allocation8], 4294950912 }
  0x16   :  { %2288 = dma.done.wait [#allocation11], 2112  }
  0x17   :  { %2289 = vsyncadd [#allocation11], 4294965184  ;;  %v168_v0 = vld [vmem:[#allocation7 + $0x1e0] sm:$0xff]  ;;  %v171_v1 = vld [vmem:[#allocation7 + $0x1f8] sm:$0xff]  ;;  %v3338_v57 = vmov 0.0   ;;  %s1861_s26 = sshll.u32 %s3337_s6, 4  ;;  %s1862_s26 = int_to_ptr.hbm [resolvable:$true] %s1861_s26 }
  0x18   :  { %v164_v2 = vld [vmem:[#allocation7 + $0x1c0] sm:$0xff]  ;;  %182 = vmatpush.msra.mxu1 %v168_v0  ;;  %1897 = vmatpush.msra.mxu2 %v168_v0  ;;  %v167_v3 = vld [vmem:[#allocation7 + $0x1d8] sm:$0xff]  ;;  %v169_v49 = vld [vmem:[#allocation7 + $0x1e8] sm:$0xff] }
  0x19   :  { %v2354_v4 = vld [vmem:[#allocation9 + $0x1e0] sm:$0xff]  ;;  %305 = vmatpush.msra.mxu3 %v171_v1  ;;  %v163_v7 = vld [vmem:[#allocation7 + $0x1b8] sm:$0xff]  ;;  %v170_v50 = vld [vmem:[#allocation7 + $0x1f0] sm:$0xff] }
  0x1a   :  { %446 = vmatpush.msra.mxu0 %v2354_v4  ;;  %v160_v5 = vld [vmem:[#allocation7 + $0x1a0] sm:$0xff]  ;;  %183 = vmatpush.msra.mxu1 %v164_v2  ;;  %v159_v10 = vld [vmem:[#allocation7 + $0x198] sm:$0xff]  ;;  %v165_v52 = vld [vmem:[#allocation7 + $0x1c8] sm:$0xff] }
  0x1b   :  { %v2357_v6 = vld [vmem:[#allocation9 + $0x1c0] sm:$0xff]  ;;  %1898 = vmatpush.msra.mxu2 %v164_v2  ;;  %306 = vmatpush.msra.mxu3 %v167_v3  ;;  %v155_v13 = vld [vmem:[#allocation7 + $0x178] sm:$0xff]  ;;  %v166_v53 = vld [vmem:[#allocation7 + $0x1d0] sm:$0xff] }
  0x1c   :  { %v2359_v8 = vld [vmem:[#allocation9 + $0x1a0] sm:$0xff]  ;;  %447 = vmatpush.msra.mxu0 %v2357_v6  ;;  %184 = vmatpush.msra.mxu1 %v160_v5  ;;  %v151_v16 = vld [vmem:[#allocation7 + $0x158] sm:$0xff]  ;;  %v161_v54 = vld [vmem:[#allocation7 + $0x1a8] sm:$0xff] }
  0x1d   :  { %v156_v9 = vld [vmem:[#allocation7 + $0x180] sm:$0xff]  ;;  %1899 = vmatpush.msra.mxu2 %v160_v5  ;;  %307 = vmatpush.msra.mxu3 %v163_v7  ;;  %v147_v19 = vld [vmem:[#allocation7 + $0x138] sm:$0xff]  ;;  %v162_v56 = vld [vmem:[#allocation7 + $0x1b0] sm:$0xff] }
  0x1e   :  { %v2362_v11 = vld [vmem:[#allocation9 + $0x180] sm:$0xff]  ;;  %448 = vmatpush.msra.mxu0 %v2359_v8  ;;  %185 = vmatpush.msra.mxu1 %v156_v9  ;;  %v143_v22 = vld [vmem:[#allocation7 + $0x118] sm:$0xff]  ;;  %v157_v58 = vld [vmem:[#allocation7 + $0x188] sm:$0xff] }
  0x1f   :  { %v152_v12 = vld [vmem:[#allocation7 + $0x160] sm:$0xff]  ;;  %1900 = vmatpush.msra.mxu2 %v156_v9  ;;  %308 = vmatpush.msra.mxu3 %v159_v10  ;;  %v139_v25 = vld [vmem:[#allocation7 + $0xf8] sm:$0xff]  ;;  %v158_v60 = vld [vmem:[#allocation7 + $0x190] sm:$0xff] }
  0x20   :  { %v2365_v14 = vld [vmem:[#allocation9 + $0x160] sm:$0xff]  ;;  %449 = vmatpush.msra.mxu0 %v2362_v11  ;;  %186 = vmatpush.msra.mxu1 %v152_v12  ;;  %v135_v28 = vld [vmem:[#allocation7 + $0xd8] sm:$0xff]  ;;  %v2414_v61 = vld [vmem:[#allocation4 + $0x8] sm:$0xff] }
  0x21   :  { %v148_v15 = vld [vmem:[#allocation7 + $0x140] sm:$0xff]  ;;  %1901 = vmatpush.msra.mxu2 %v152_v12  ;;  %309 = vmatpush.msra.mxu3 %v155_v13  ;;  %v131_v31 = vld [vmem:[#allocation7 + $0xb8] sm:$0xff]  ;;  %v2417_v62 = vld [vmem:[#allocation4 + $0x28] sm:$0xff] }
  0x22   :  { %v2368_v17 = vld [vmem:[#allocation9 + $0x140] sm:$0xff]  ;;  %450 = vmatpush.msra.mxu0 %v2365_v14  ;;  %187 = vmatpush.msra.mxu1 %v148_v15  ;;  %v127_v34 = vld [vmem:[#allocation7 + $0x98] sm:$0xff]  ;;  %v153_v63 = vld [vmem:[#allocation7 + $0x168] sm:$0xff] }
  0x23   :  { %v144_v18 = vld [vmem:[#allocation7 + $0x120] sm:$0xff]  ;;  %1902 = vmatpush.msra.mxu2 %v148_v15  ;;  %310 = vmatpush.msra.mxu3 %v151_v16  ;;  %v123_v37 = vld [vmem:[#allocation7 + $0x78] sm:$0xff]  ;;  %v154_v0 = vld [vmem:[#allocation7 + $0x170] sm:$0xff] }
  0x24   :  { %v2371_v20 = vld [vmem:[#allocation9 + $0x120] sm:$0xff]  ;;  %451 = vmatpush.msra.mxu0 %v2368_v17  ;;  %188 = vmatpush.msra.mxu1 %v144_v18  ;;  %v119_v40 = vld [vmem:[#allocation7 + $0x58] sm:$0xff]  ;;  %v149_v1 = vld [vmem:[#allocation7 + $0x148] sm:$0xff] }
  0x25   :  { %v140_v21 = vld [vmem:[#allocation7 + $0x100] sm:$0xff]  ;;  %1903 = vmatpush.msra.mxu2 %v144_v18  ;;  %311 = vmatpush.msra.mxu3 %v147_v19  ;;  %v115_v43 = vld [vmem:[#allocation7 + $0x38] sm:$0xff]  ;;  %v150_v3 = vld [vmem:[#allocation7 + $0x150] sm:$0xff] }
  0x26   :  { %v2374_v23 = vld [vmem:[#allocation9 + $0x100] sm:$0xff]  ;;  %452 = vmatpush.msra.mxu0 %v2371_v20  ;;  %189 = vmatpush.msra.mxu1 %v140_v21  ;;  %v111_v46 = vld [vmem:[#allocation7 + $0x18] sm:$0xff]  ;;  %v145_v5 = vld [vmem:[#allocation7 + $0x128] sm:$0xff] }
  0x27   :  { %v136_v24 = vld [vmem:[#allocation7 + $0xe0] sm:$0xff]  ;;  %1904 = vmatpush.msra.mxu2 %v140_v21  ;;  %312 = vmatpush.msra.mxu3 %v143_v22  ;;  %v2408_v55 = vld [vmem:[#allocation9 + $0x1f8] sm:$0xff]  ;;  %v146_v9 = vld [vmem:[#allocation7 + $0x130] sm:$0xff] }
  0x28   :  { %v2377_v26 = vld [vmem:[#allocation9 + $0xe0] sm:$0xff]  ;;  %453 = vmatpush.msra.mxu0 %v2374_v23  ;;  %190 = vmatpush.msra.mxu1 %v136_v24  ;;  %v2412_v59 = vld [vmem:[#allocation9 + $0x1d8] sm:$0xff]  ;;  %v141_v10 = vld [vmem:[#allocation7 + $0x108] sm:$0xff] }
  0x29   :  { %v132_v27 = vld [vmem:[#allocation7 + $0xc0] sm:$0xff]  ;;  %1905 = vmatpush.msra.mxu2 %v136_v24  ;;  %313 = vmatpush.msra.mxu3 %v139_v25  ;;  %v2422_v2 = vld [vmem:[#allocation9 + $0x1b8] sm:$0xff]  ;;  %v142_v13 = vld [vmem:[#allocation7 + $0x110] sm:$0xff] }
  0x2a   :  { %v2380_v29 = vld [vmem:[#allocation9 + $0xc0] sm:$0xff]  ;;  %454 = vmatpush.msra.mxu0 %v2377_v26  ;;  %191 = vmatpush.msra.mxu1 %v132_v27  ;;  %v2426_v7 = vld [vmem:[#allocation9 + $0x198] sm:$0xff]  ;;  %v2432_v15 = vld [vmem:[#allocation4 + $0x10] sm:$0xff] }
  0x2b   :  { %3418 = vst [vmem:[#allocation18_spill] sm:$0xff] %v2380_v29  ;;  %v128_v30 = vld [vmem:[#allocation7 + $0xa0] sm:$0xff]  ;;  %1906 = vmatpush.msra.mxu2 %v132_v27  ;;  %314 = vmatpush.msra.mxu3 %v135_v28  ;;  %v2429_v12 = vld [vmem:[#allocation9 + $0x178] sm:$0xff]  ;;  %v2435_v16 = vld [vmem:[#allocation4 + $0x30] sm:$0xff] }
  0x2c   :  { %v2383_v32 = vld [vmem:[#allocation9 + $0xa0] sm:$0xff]  ;;  %455 = vmatpush.msra.mxu0 %v2380_v29  ;;  %192 = vmatpush.msra.mxu1 %v128_v30  ;;  %v137_v18 = vld [vmem:[#allocation7 + $0xe8] sm:$0xff]  ;;  %v138_v19 = vld [vmem:[#allocation7 + $0xf0] sm:$0xff] }
  0x2d   :  { %3419 = vst [vmem:[#allocation19_spill] sm:$0xff] %v2383_v32  ;;  %v124_v33 = vld [vmem:[#allocation7 + $0x80] sm:$0xff]  ;;  %1907 = vmatpush.msra.mxu2 %v128_v30  ;;  %315 = vmatpush.msra.mxu3 %v131_v31  ;;  %v133_v21 = vld [vmem:[#allocation7 + $0xc8] sm:$0xff]  ;;  %v2440_v22 = vld [vmem:[#allocation9 + $0x158] sm:$0xff] }
  0x2e   :  { %v2386_v35 = vld [vmem:[#allocation9 + $0x80] sm:$0xff]  ;;  %456 = vmatpush.msra.mxu0 %v2383_v32  ;;  %193 = vmatpush.msra.mxu1 %v124_v33  ;;  %v134_v24 = vld [vmem:[#allocation7 + $0xd0] sm:$0xff]  ;;  %v129_v25 = vld [vmem:[#allocation7 + $0xa8] sm:$0xff] }
  0x2f   :  { %3420 = vst [vmem:[#allocation20_spill] sm:$0xff] %v2386_v35  ;;  %v120_v36 = vld [vmem:[#allocation7 + $0x60] sm:$0xff]  ;;  %1908 = vmatpush.msra.mxu2 %v124_v33  ;;  %316 = vmatpush.msra.mxu3 %v127_v34  ;;  %v2444_v27 = vld [vmem:[#allocation9 + $0x138] sm:$0xff]  ;;  %v130_v28 = vld [vmem:[#allocation7 + $0xb0] sm:$0xff] }
  0x30   :  { %v2389_v38 = vld [vmem:[#allocation9 + $0x60] sm:$0xff]  ;;  %457 = vmatpush.msra.mxu0 %v2386_v35  ;;  %194 = vmatpush.msra.mxu1 %v120_v36  ;;  %v125_v30 = vld [vmem:[#allocation7 + $0x88] sm:$0xff]  ;;  %v2447_v31 = vld [vmem:[#allocation9 + $0x118] sm:$0xff] }
  0x31   :  { %3421 = vst [vmem:[#allocation21_spill] sm:$0xff] %v2389_v38  ;;  %v116_v39 = vld [vmem:[#allocation7 + $0x40] sm:$0xff]  ;;  %1909 = vmatpush.msra.mxu2 %v120_v36  ;;  %317 = vmatpush.msra.mxu3 %v123_v37  ;;  %v126_v33 = vld [vmem:[#allocation7 + $0x90] sm:$0xff]  ;;  %v2450_v34 = vld [vmem:[#allocation4 + $0x18] sm:$0xff] }
  0x32   :  { %v2392_v41 = vld [vmem:[#allocation9 + $0x40] sm:$0xff]  ;;  %458 = vmatpush.msra.mxu0 %v2389_v38  ;;  %195 = vmatpush.msra.mxu1 %v116_v39  ;;  %v2453_v36 = vld [vmem:[#allocation4 + $0x38] sm:$0xff]  ;;  %v121_v37 = vld [vmem:[#allocation7 + $0x68] sm:$0xff] }
  0x33   :  { %3422 = vst [vmem:[#allocation22_spill] sm:$0xff] %v2392_v41  ;;  %v112_v42 = vld [vmem:[#allocation7 + $0x20] sm:$0xff]  ;;  %1910 = vmatpush.msra.mxu2 %v116_v39  ;;  %318 = vmatpush.msra.mxu3 %v119_v40  ;;  %v122_v39 = vld [vmem:[#allocation7 + $0x70] sm:$0xff]  ;;  %v117_v40 = vld [vmem:[#allocation7 + $0x48] sm:$0xff] }
  0x34   :  { %v2395_v44 = vld [vmem:[#allocation9 + $0x20] sm:$0xff]  ;;  %459 = vmatpush.msra.mxu0 %v2392_v41  ;;  %196 = vmatpush.msra.mxu1 %v112_v42 }
  0x35   :  { %v108_v45 = vld [vmem:[#allocation7] sm:$0xff]  ;;  %1911 = vmatpush.msra.mxu2 %v112_v42  ;;  %319 = vmatpush.msra.mxu3 %v115_v43  ;;  %v2458_v42 = vld [vmem:[#allocation9 + $0xf8] sm:$0xff]  ;;  %v118_v43 = vld [vmem:[#allocation7 + $0x50] sm:$0xff] }
  0x36   :  { %v2398_v47 = vld [vmem:[#allocation4] sm:$0xff]  ;;  %460 = vmatpush.msra.mxu0 %v2395_v44  ;;  %197 = vmatpush.msra.mxu1 %v108_v45 }
  0x37   :  { %v2401_v48 = vld [vmem:[#allocation4 + $0x20] sm:$0xff]  ;;  %1912 = vmatpush.msra.mxu2 %v108_v45  ;;  %320 = vmatpush.msra.mxu3 %v111_v46  ;;  %v113_v45 = vld [vmem:[#allocation7 + $0x28] sm:$0xff]  ;;  %v2462_v46 = vld [vmem:[#allocation9 + $0xd8] sm:$0xff] }
  0x38   :  { %198 = vmatmul.f32.vlgmr.msra.gmra.mxu1 %v2398_v47  ;;  %v2404_v51 = vld [vmem:[#allocation9] sm:$0xff]  ;;  %210 = vmatmul.f32.vlgmr.msra.gmra.mxu2 %v2401_v48 }
  0x39   :  { %223 = vmatpush.msrb.mxu1 %v169_v49  ;;  %321 = vmatmul.f32.vlgmr.msra.gmra.mxu3 %v2398_v47  ;;  %v114_v49 = vld [vmem:[#allocation7 + $0x30] sm:$0xff] }
  0x3a   :  { %264 = vmatpush.msrb.mxu2 %v170_v50  ;;  %461 = vmatpush.msra.mxu0 %v2404_v51  ;;  %v109_v50 = vld [vmem:[#allocation7 + $0x8] sm:$0xff] }
  0x3b   :  { %224 = vmatpush.msrb.mxu1 %v165_v52  ;;  %462 = vmatmul.f32.vlgmr.msra.gmra.mxu0 %v3338_v57  ;;  %v2465_v52 = vld [vmem:[#allocation9 + $0xb8] sm:$0xff]  ;;  %v2584_v57 = vld [vmem:[#allocation9 + $0x70] sm:$0xff] }
  0x3c   :  { %265 = vmatpush.msrb.mxu2 %v166_v53  ;;  %506 = vmatpush.msrb.mxu3 %v2408_v55  ;;  %v110_v53 = vld [vmem:[#allocation7 + $0x10] sm:$0xff]  ;;  %3428 = vst [vmem:[#allocation28_spill] sm:$0xff] %v2584_v57 }
  0x3d   :  { %225 = vmatpush.msrb.mxu1 %v161_v54  ;;  %599 = vmatpush.msrb.mxu0 %v2354_v4  ;;  %v2469_v54 = vld [vmem:[#allocation9 + $0x1e8] sm:$0xff] }
  0x3e   :  { %266 = vmatpush.msrb.mxu2 %v162_v56  ;;  %507 = vmatpush.msrb.mxu3 %v2412_v59  ;;  %v2472_v56 = vld [vmem:[#allocation9 + $0x1f0] sm:$0xff] }
  0x3f   :  { %226 = vmatpush.msrb.mxu1 %v157_v58  ;;  %600 = vmatpush.msrb.mxu0 %v2357_v6  ;;  %v2476_v58 = vld [vmem:[#allocation9 + $0x1c8] sm:$0xff] }
  0x40   :  { %267 = vmatpush.msrb.mxu2 %v158_v60  ;;  %201 = vmatmul.f32.gmra.mxu1 %v2414_v61  ;;  %v2478_v60 = vld [vmem:[#allocation9 + $0x98] sm:$0xff] }
  0x41   :  { %213 = vmatmul.f32.gmra.mxu2 %v2417_v62  ;;  %227 = vmatpush.msrb.mxu1 %v153_v63  ;;  %v2482_v63 = vld [vmem:[#allocation9 + $0x1d0] sm:$0xff] }
  0x42   :  { %324 = vmatmul.f32.gmra.mxu3 %v2414_v61  ;;  %268 = vmatpush.msrb.mxu2 %v154_v0  ;;  %v2485_v0 = vld [vmem:[#allocation9 + $0x1a8] sm:$0xff] }
  0x43   :  { %228 = vmatpush.msrb.mxu1 %v149_v1  ;;  %508 = vmatpush.msrb.mxu3 %v2422_v2  ;;  %v2488_v1 = vld [vmem:[#allocation9 + $0x78] sm:$0xff] }
  0x44   :  { %269 = vmatpush.msrb.mxu2 %v150_v3  ;;  %601 = vmatpush.msrb.mxu0 %v2359_v8  ;;  %3423 = vst [vmem:[#allocation23_spill] sm:$0xff] %v2488_v1  ;;  %v2491_v3 = vld [vmem:[#allocation9 + $0x1b0] sm:$0xff] }
  0x45   :  { %229 = vmatpush.msrb.mxu1 %v145_v5  ;;  %509 = vmatpush.msrb.mxu3 %v2426_v7  ;;  %v2494_v5 = vld [vmem:[#allocation9 + $0x188] sm:$0xff] }
  0x46   :  { %270 = vmatpush.msrb.mxu2 %v146_v9  ;;  %602 = vmatpush.msrb.mxu0 %v2362_v11  ;;  %v2502_v9 = vld [vmem:[#allocation9 + $0x190] sm:$0xff] }
  0x47   :  { %230 = vmatpush.msrb.mxu1 %v141_v10  ;;  %510 = vmatpush.msrb.mxu3 %v2429_v12  ;;  %v2504_v10 = vld [vmem:[#allocation9 + $0x168] sm:$0xff] }
  0x48   :  { %271 = vmatpush.msrb.mxu2 %v142_v13  ;;  %204 = vmatmul.f32.gmra.mxu1 %v2432_v15  ;;  %v2510_v13 = vld [vmem:[#allocation9 + $0x170] sm:$0xff] }
  0x49   :  { %216 = vmatmul.f32.gmra.mxu2 %v2435_v16  ;;  %231 = vmatpush.msrb.mxu1 %v137_v18  ;;  %v2513_v18 = vld [vmem:[#allocation9 + $0x148] sm:$0xff] }
  0x4a   :  { %327 = vmatmul.f32.gmra.mxu3 %v2432_v15  ;;  %272 = vmatpush.msrb.mxu2 %v138_v19  ;;  %v2516_v19 = vld [vmem:[#allocation9 + $0x38] sm:$0xff] }
  0x4b   :  { %232 = vmatpush.msrb.mxu1 %v133_v21  ;;  %511 = vmatpush.msrb.mxu3 %v2440_v22  ;;  %3425 = vst [vmem:[#allocation25_spill] sm:$0xff] %v2516_v19  ;;  %v2520_v21 = vld [vmem:[#allocation9 + $0x150] sm:$0xff] }
  0x4c   :  { %273 = vmatpush.msrb.mxu2 %v134_v24  ;;  %603 = vmatpush.msrb.mxu0 %v2365_v14  ;;  %v2523_v24 = vld [vmem:[#allocation9 + $0x128] sm:$0xff] }
  0x4d   :  { %233 = vmatpush.msrb.mxu1 %v129_v25  ;;  %512 = vmatpush.msrb.mxu3 %v2444_v27  ;;  %v2526_v25 = vld [vmem:[#allocation9 + $0x18] sm:$0xff] }
  0x4e   :  { %274 = vmatpush.msrb.mxu2 %v130_v28  ;;  %604 = vmatpush.msrb.mxu0 %v2368_v17  ;;  %3426 = vst [vmem:[#allocation26_spill] sm:$0xff] %v2526_v25  ;;  %v2530_v28 = vld [vmem:[#allocation9 + $0x130] sm:$0xff] }
  0x4f   :  { %234 = vmatpush.msrb.mxu1 %v125_v30  ;;  %513 = vmatpush.msrb.mxu3 %v2447_v31  ;;  %v2532_v30 = vld [vmem:[#allocation9 + $0x108] sm:$0xff] }
  0x50   :  { %275 = vmatpush.msrb.mxu2 %v126_v33  ;;  %207 = vmatmul.f32.gmra.mxu1 %v2450_v34  ;;  %v2540_v33 = vld [vmem:[#allocation9 + $0xe8] sm:$0xff] }
  0x51   :  { %219 = vmatmul.f32.gmra.mxu2 %v2453_v36  ;;  %235 = vmatpush.msrb.mxu1 %v121_v37  ;;  %v2545_v37 = vld [vmem:[#allocation9 + $0xf0] sm:$0xff] }
  0x52   :  { %330 = vmatmul.f32.gmra.mxu3 %v2450_v34  ;;  %276 = vmatpush.msrb.mxu2 %v122_v39  ;;  %v2549_v39 = vld [vmem:[#allocation9 + $0xc8] sm:$0xff] }
  0x53   :  { %236 = vmatpush.msrb.mxu1 %v117_v40  ;;  %514 = vmatpush.msrb.mxu3 %v2458_v42  ;;  %v2554_v40 = vld [vmem:[#allocation9 + $0xd0] sm:$0xff] }
  0x54   :  { %277 = vmatpush.msrb.mxu2 %v118_v43  ;;  %605 = vmatpush.msrb.mxu0 %v2371_v20  ;;  %v2557_v43 = vld [vmem:[#allocation9 + $0xa8] sm:$0xff] }
  0x55   :  { %237 = vmatpush.msrb.mxu1 %v113_v45  ;;  %515 = vmatpush.msrb.mxu3 %v2462_v46  ;;  %v2561_v45 = vld [vmem:[#allocation9 + $0xb0] sm:$0xff] }
  0x56   :  { %278 = vmatpush.msrb.mxu2 %v114_v49  ;;  %606 = vmatpush.msrb.mxu0 %v2374_v23  ;;  %v2564_v49 = vld [vmem:[#allocation9 + $0x88] sm:$0xff] }
  0x57   :  { %238 = vmatpush.msrb.mxu1 %v109_v50  ;;  %516 = vmatpush.msrb.mxu3 %v2465_v52  ;;  %v2572_v50 = vld [vmem:[#allocation9 + $0x68] sm:$0xff] }
  0x58   :  { %279 = vmatpush.msrb.mxu2 %v110_v53  ;;  %239 = vmatmul.f32.vlgmr.msrb.gmra.mxu1 %v2398_v47  ;;  %v2579_v53 = vld [vmem:[#allocation9 + $0x48] sm:$0xff] }
  0x59   :  { %280 = vmatmul.f32.vlgmr.msrb.gmra.mxu2 %v2398_v47  ;;  %466 = vmatpush.msra.mxu1 %v2469_v54  ;;  %v2497_v47 = vld [vmem:[#allocation9 + $0x58] sm:$0xff]  ;;  %3427 = vst [vmem:[#allocation27_spill] sm:$0xff] %v2579_v53 }
  0x5a   :  { %333 = vmatmul.f32.gmra.mxu3 %v2401_v48  ;;  %486 = vmatpush.msra.mxu2 %v2472_v56  ;;  %3424 = vst [vmem:[#allocation24_spill] sm:$0xff] %v2497_v47 }
  0x5b   :  { %467 = vmatpush.msra.mxu1 %v2476_v58  ;;  %517 = vmatpush.msrb.mxu3 %v2478_v60 }
  0x5c   :  { %487 = vmatpush.msra.mxu2 %v2482_v63  ;;  %607 = vmatpush.msrb.mxu0 %v2377_v26 }
  0x5d   :  { %468 = vmatpush.msra.mxu1 %v2485_v0  ;;  %518 = vmatpush.msrb.mxu3 %v2488_v1 }
  0x5e   :  { %488 = vmatpush.msra.mxu2 %v2491_v3  ;;  %608 = vmatpush.msrb.mxu0 %v2380_v29  ;;  %v2601_v29 = vld [vmem:[#allocation9 + $0x10] sm:$0xff] }
  0x5f   :  { %469 = vmatpush.msra.mxu1 %v2494_v5  ;;  %519 = vmatpush.msrb.mxu3 %v2497_v47  ;;  %3433 = vst [vmem:[#allocation33_spill] sm:$0xff] %v2601_v29 }
  0x60   :  { %242 = vmatmul.f32.gmra.mxu1 %v2414_v61  ;;  %489 = vmatpush.msra.mxu2 %v2502_v9 }
  0x61   :  { %283 = vmatmul.f32.gmra.mxu2 %v2414_v61  ;;  %470 = vmatpush.msra.mxu1 %v2504_v10  ;;  %v2538_v61 = vld [vmem:[#allocation9 + $0x110] sm:$0xff] }
  0x62   :  { %336 = vmatmul.f32.gmra.mxu3 %v2417_v62  ;;  %490 = vmatpush.msra.mxu2 %v2510_v13 }
  0x63   :  { %471 = vmatpush.msra.mxu1 %v2513_v18  ;;  %520 = vmatpush.msrb.mxu3 %v2516_v19 }
  0x64   :  { %491 = vmatpush.msra.mxu2 %v2520_v21  ;;  %609 = vmatpush.msrb.mxu0 %v2383_v32  ;;  %v2593_v32 = vld [vmem:[#allocation9 + $0x30] sm:$0xff] }
  0x65   :  { %472 = vmatpush.msra.mxu1 %v2523_v24  ;;  %521 = vmatpush.msrb.mxu3 %v2526_v25  ;;  %3431 = vst [vmem:[#allocation31_spill] sm:$0xff] %v2593_v32 }
  0x66   :  { %492 = vmatpush.msra.mxu2 %v2530_v28  ;;  %610 = vmatpush.msrb.mxu0 %v2386_v35  ;;  %v2586_v35 = vld [vmem:[#allocation9 + $0x50] sm:$0xff] }
  0x67   :  { %659 = vmatpush.msra.mxu3 %v2408_v55  ;;  %473 = vmatpush.msra.mxu1 %v2532_v30  ;;  %3429 = vst [vmem:[#allocation29_spill] sm:$0xff] %v2586_v35 }
  0x68   :  { %245 = vmatmul.f32.gmra.mxu1 %v2432_v15  ;;  %493 = vmatpush.msra.mxu2 %v2538_v61 }
  0x69   :  { %286 = vmatmul.f32.gmra.mxu2 %v2432_v15  ;;  %474 = vmatpush.msra.mxu1 %v2540_v33  ;;  %v2569_v15 = vld [vmem:[#allocation9 + $0x90] sm:$0xff] }
  0x6a   :  { %339 = vmatmul.f32.gmra.mxu3 %v2435_v16  ;;  %494 = vmatpush.msra.mxu2 %v2545_v37 }
  0x6b   :  { %475 = vmatpush.msra.mxu1 %v2549_v39  ;;  %660 = vmatpush.msra.mxu3 %v2412_v59 }
  0x6c   :  { %495 = vmatpush.msra.mxu2 %v2554_v40  ;;  %611 = vmatpush.msrb.mxu0 %v2389_v38  ;;  %v2589_v38 = vld [vmem:[#allocation9 + $0x28] sm:$0xff] }
  0x6d   :  { %476 = vmatpush.msra.mxu1 %v2557_v43  ;;  %661 = vmatpush.msra.mxu3 %v2422_v2  ;;  %3430 = vst [vmem:[#allocation30_spill] sm:$0xff] %v2589_v38 }
  0x6e   :  { %496 = vmatpush.msra.mxu2 %v2561_v45  ;;  %612 = vmatpush.msrb.mxu0 %v2392_v41  ;;  %v3434_v41 = vmov 0.0  }
  0x6f   :  { %477 = vmatpush.msra.mxu1 %v2564_v49  ;;  %662 = vmatpush.msra.mxu3 %v2426_v7 }
  0x70   :  { %248 = vmatmul.f32.gmra.mxu1 %v2450_v34  ;;  %497 = vmatpush.msra.mxu2 %v2569_v15 }
  0x71   :  { %289 = vmatmul.f32.gmra.mxu2 %v2450_v34  ;;  %478 = vmatpush.msra.mxu1 %v2572_v50  ;;  %v2597_v34 = vld [vmem:[#allocation9 + $0x8] sm:$0xff] }
  0x72   :  { %342 = vmatmul.f32.gmra.mxu3 %v2453_v36  ;;  %498 = vmatpush.msra.mxu2 %v2584_v57  ;;  %3432 = vst [vmem:[#allocation32_spill] sm:$0xff] %v2597_v34 }
  0x73   :  { %479 = vmatpush.msra.mxu1 %v2579_v53  ;;  %663 = vmatpush.msra.mxu3 %v2429_v12 }
  0x74   :  { %499 = vmatpush.msra.mxu2 %v2586_v35  ;;  %613 = vmatpush.msrb.mxu0 %v2395_v44 }
  0x75   :  { %480 = vmatpush.msra.mxu1 %v2589_v38  ;;  %664 = vmatpush.msra.mxu3 %v2440_v22 }
  0x76   :  { %500 = vmatpush.msra.mxu2 %v2593_v32  ;;  %614 = vmatpush.msrb.mxu0 %v2404_v51 }
  0x77   :  { %481 = vmatpush.msra.mxu1 %v2597_v34  ;;  %665 = vmatpush.msra.mxu3 %v2444_v27 }
  0x78   :  { %251 = vmatmul.f32.gmra.mxu1 %v2401_v48  ;;  %501 = vmatpush.msra.mxu2 %v2601_v29 }
  0x79   :  { %292 = vmatmul.f32.gmra.mxu2 %v2401_v48  ;;  %619 = vmatpush.msrb.mxu1 %v2469_v54 }
  0x7a   :  { %522 = vmatmul.f32.vlgmr.msrb.gmra.mxu3 %v3434_v41  ;;  %639 = vmatpush.msrb.mxu2 %v2472_v56 }
  0x7b   :  { %620 = vmatpush.msrb.mxu1 %v2476_v58  ;;  %666 = vmatpush.msra.mxu3 %v2447_v31 }
  0x7c   :  { %640 = vmatpush.msrb.mxu2 %v2482_v63  ;;  %753 = vmatpush.msra.mxu0 %v2354_v4  ;;  %v3435_v4 = vld [vmem:[#allocation18_spill] sm:$0xff] }
  0x7d   :  { %621 = vmatpush.msrb.mxu1 %v2485_v0  ;;  %667 = vmatpush.msra.mxu3 %v2458_v42 }
  0x7e   :  { %641 = vmatpush.msrb.mxu2 %v2491_v3  ;;  %754 = vmatpush.msra.mxu0 %v2357_v6  ;;  %v3436_v6 = vld [vmem:[#allocation19_spill] sm:$0xff] }
  0x7f   :  { %622 = vmatpush.msrb.mxu1 %v2494_v5  ;;  %668 = vmatpush.msra.mxu3 %v2462_v46 }
  0x80   :  { %254 = vmatmul.f32.gmra.mxu1 %v2417_v62  ;;  %642 = vmatpush.msrb.mxu2 %v2502_v9 }
  0x81   :  { %295 = vmatmul.f32.gmra.mxu2 %v2417_v62  ;;  %623 = vmatpush.msrb.mxu1 %v2504_v10 }
  0x82   :  { %643 = vmatpush.msrb.mxu2 %v2510_v13  ;;  %669 = vmatpush.msra.mxu3 %v2465_v52 }
  0x83   :  { %624 = vmatpush.msrb.mxu1 %v2513_v18  ;;  %755 = vmatpush.msra.mxu0 %v2359_v8  ;;  %v3437_v8 = vld [vmem:[#allocation20_spill] sm:$0xff] }
  0x84   :  { %644 = vmatpush.msrb.mxu2 %v2520_v21  ;;  %670 = vmatpush.msra.mxu3 %v2478_v60 }
  0x85   :  { %625 = vmatpush.msrb.mxu1 %v2523_v24  ;;  %756 = vmatpush.msra.mxu0 %v2362_v11  ;;  %v3438_v11 = vld [vmem:[#allocation21_spill] sm:$0xff] }
  0x86   :  { %645 = vmatpush.msrb.mxu2 %v2530_v28  ;;  %671 = vmatpush.msra.mxu3 %v2488_v1 }
  0x87   :  { %626 = vmatpush.msrb.mxu1 %v2532_v30  ;;  %757 = vmatpush.msra.mxu0 %v2365_v14  ;;  %v3439_v14 = vld [vmem:[#allocation22_spill] sm:$0xff] }
  0x88   :  { %257 = vmatmul.f32.gmra.mxu1 %v2435_v16  ;;  %646 = vmatpush.msrb.mxu2 %v2538_v61 }
  0x89   :  { %298 = vmatmul.f32.gmra.mxu2 %v2435_v16  ;;  %627 = vmatpush.msrb.mxu1 %v2540_v33 }
  0x8a   :  { %647 = vmatpush.msrb.mxu2 %v2545_v37  ;;  %672 = vmatpush.msra.mxu3 %v2497_v47 }
  0x8b   :  { %628 = vmatpush.msrb.mxu1 %v2549_v39  ;;  %758 = vmatpush.msra.mxu0 %v2368_v17 }
  0x8c   :  { %648 = vmatpush.msrb.mxu2 %v2554_v40  ;;  %673 = vmatpush.msra.mxu3 %v2516_v19 }
  0x8d   :  { %629 = vmatpush.msrb.mxu1 %v2557_v43  ;;  %759 = vmatpush.msra.mxu0 %v2371_v20  ;;  %v172_v20 = vld [vmem:[#allocation10] sm:$0xf] }
  0x8e   :  { %649 = vmatpush.msrb.mxu2 %v2561_v45  ;;  %674 = vmatpush.msra.mxu3 %v2526_v25  ;;  %v177_v62 = vperm.slane %v172_v20, 3 }
  0x8f   :  { %630 = vmatpush.msrb.mxu1 %v2564_v49  ;;  %760 = vmatpush.msra.mxu0 %v2374_v23  ;;  %v174_v23 = vperm.slane %v172_v20, 0 }
  0x90   :  { %813 = vmatpush.msrb.mxu3 %v2408_v55  ;;  %260 = vmatmul.f32.gmra.mxu1 %v2453_v36 }
  0x91   :  { %650 = vmatpush.msrb.mxu2 %v2569_v15  ;;  %631 = vmatpush.msrb.mxu1 %v2572_v50 }
  0x92   :  { %301 = vmatmul.f32.gmra.mxu2 %v2453_v36  ;;  %814 = vmatpush.msrb.mxu3 %v2412_v59 }
  0x93   :  { %651 = vmatpush.msrb.mxu2 %v2584_v57  ;;  %632 = vmatpush.msrb.mxu1 %v2579_v53 }
  0x94   :  { %815 = vmatpush.msrb.mxu3 %v2422_v2  ;;  %761 = vmatpush.msra.mxu0 %v2377_v26 }
  0x95   :  { %652 = vmatpush.msrb.mxu2 %v2586_v35  ;;  %633 = vmatpush.msrb.mxu1 %v2589_v38 }
  0x96   :  { %816 = vmatpush.msrb.mxu3 %v2426_v7  ;;  %762 = vmatpush.msra.mxu0 %v3435_v4 }
  0x97   :  { %653 = vmatpush.msrb.mxu2 %v2593_v32  ;;  %634 = vmatpush.msrb.mxu1 %v2597_v34 }
  0x98   :  { %482 = vmatmul.f32.vlgmr.msra.gmra.mxu1 %v3434_v41  ;;  %817 = vmatpush.msrb.mxu3 %v2429_v12 }
  0x99   :  { %654 = vmatpush.msrb.mxu2 %v2601_v29  ;;  %773 = vmatpush.msra.mxu1 %v2469_v54 }
  0x9a   :  { %502 = vmatmul.f32.vlgmr.msra.gmra.mxu2 %v3434_v41  ;;  %818 = vmatpush.msrb.mxu3 %v2440_v22 }
  0x9b   :  { %793 = vmatpush.msra.mxu2 %v2472_v56  ;;  %774 = vmatpush.msra.mxu1 %v2476_v58 }
  0x9c   :  { %763 = vmatpush.msra.mxu0 %v3436_v6  ;;  %819 = vmatpush.msrb.mxu3 %v2444_v27 }
  0x9d   :  { %794 = vmatpush.msra.mxu2 %v2482_v63  ;;  %775 = vmatpush.msra.mxu1 %v2485_v0 }
  0x9e   :  { %764 = vmatpush.msra.mxu0 %v3437_v8  ;;  %820 = vmatpush.msrb.mxu3 %v2447_v31 }
  0x9f   :  { %795 = vmatpush.msra.mxu2 %v2491_v3  ;;  %776 = vmatpush.msra.mxu1 %v2494_v5 }
  0xa0   :  { %765 = vmatpush.msra.mxu0 %v3438_v11  ;;  %821 = vmatpush.msrb.mxu3 %v2458_v42 }
  0xa1   :  { %796 = vmatpush.msra.mxu2 %v2502_v9  ;;  %777 = vmatpush.msra.mxu1 %v2504_v10 }
  0xa2   :  { %766 = vmatpush.msra.mxu0 %v3439_v14  ;;  %822 = vmatpush.msrb.mxu3 %v2462_v46 }
  0xa3   :  { %797 = vmatpush.msra.mxu2 %v2510_v13  ;;  %778 = vmatpush.msra.mxu1 %v2513_v18 }
  0xa4   :  { %767 = vmatpush.msra.mxu0 %v2395_v44  ;;  %823 = vmatpush.msrb.mxu3 %v2465_v52 }
  0xa5   :  { %798 = vmatpush.msra.mxu2 %v2520_v21  ;;  %779 = vmatpush.msra.mxu1 %v2523_v24 }
  0xa6   :  { %768 = vmatpush.msra.mxu0 %v2404_v51  ;;  %824 = vmatpush.msrb.mxu3 %v2478_v60 }
  0xa7   :  { %799 = vmatpush.msra.mxu2 %v2530_v28  ;;  %780 = vmatpush.msra.mxu1 %v2532_v30 }
  0xa8   :  { %825 = vmatpush.msrb.mxu3 %v2488_v1 }
  0xa9   :  { %800 = vmatpush.msra.mxu2 %v2538_v61  ;;  %781 = vmatpush.msra.mxu1 %v2540_v33 }
  0xaa   :  { %826 = vmatpush.msrb.mxu3 %v2497_v47 }
  0xab   :  { %801 = vmatpush.msra.mxu2 %v2545_v37  ;;  %782 = vmatpush.msra.mxu1 %v2549_v39 }
  0xac   :  { %827 = vmatpush.msrb.mxu3 %v2516_v19 }
  0xad   :  { %802 = vmatpush.msra.mxu2 %v2554_v40  ;;  %783 = vmatpush.msra.mxu1 %v2557_v43 }
  0xae   :  { %828 = vmatpush.msrb.mxu3 %v2526_v25 }
  0xaf   :  { %803 = vmatpush.msra.mxu2 %v2561_v45  ;;  %784 = vmatpush.msra.mxu1 %v2564_v49 }
  0xb1   :  { %804 = vmatpush.msra.mxu2 %v2569_v15  ;;  %785 = vmatpush.msra.mxu1 %v2572_v50 }
  0xb3   :  { %805 = vmatpush.msra.mxu2 %v2584_v57  ;;  %786 = vmatpush.msra.mxu1 %v2579_v53 }
  0xb5   :  { %806 = vmatpush.msra.mxu2 %v2586_v35  ;;  %v199_v17 = vpop.f32.mrf.mxu1  ;;  %787 = vmatpush.msra.mxu1 %v2589_v38 }
  0xb7   :  { %807 = vmatpush.msra.mxu2 %v2593_v32  ;;  %788 = vmatpush.msra.mxu1 %v2597_v34 }
  0xb9   :  { %808 = vmatpush.msra.mxu2 %v2601_v29 }
  0xbb   :  { %v211_v26 = vpop.f32.mrf.mxu2 }
  0xbc   :  { %v2726_v41 = vadd.f32 %v211_v26, %v174_v23  ;;  %v322_v44 = vpop.f32.mrf.mxu3 }
  0xbd   :  { %v202_v48 = vpop.f32.mrf.mxu1 }
  0xbe   :  { %3440 = vst [vmem:[#allocation18_spill] sm:$0xff] %v2726_v41  ;;  %v2728_v51 = vadd.f32 %v202_v48, %v174_v23 }
  0xc0   :  { %3441 = vst [vmem:[#allocation19_spill] sm:$0xff] %v2728_v51 }
  0xc4   :  { %v214_v16 = vpop.f32.mrf.mxu2 }
  0xc5   :  { %v2730_v36 = vadd.f32 %v214_v16, %v174_v23  ;;  %v325_v4 = vpop.f32.mrf.mxu3  ;;  %v205_v6 = vpop.f32.mrf.mxu1 }
  0xc6   :  { %v2732_v8 = vadd.f32 %v325_v4, %v177_v62  ;;  %v2734_v11 = vadd.f32 %v205_v6, %v174_v23  ;;  %v175_v4 = vperm.slane %v172_v20, 1 }
  0xc7   :  { %3442 = vst [vmem:[#allocation20_spill] sm:$0xff] %v2730_v36 }
  0xc8   :  { %3443 = vst [vmem:[#allocation21_spill] sm:$0xff] %v2732_v8 }
  0xc9   :  { %3444 = vst [vmem:[#allocation22_spill] sm:$0xff] %v2734_v11 }
  0xcc   :  { %v217_v14 = vpop.f32.mrf.mxu2 }
  0xcd   :  { %v2736_v25 = vadd.f32 %v217_v14, %v174_v23  ;;  %v328_v29 = vpop.f32.mrf.mxu3  ;;  %v208_v26 = vpop.f32.mrf.mxu1 }
  0xce   :  { %v2738_v41 = vadd.f32 %v328_v29, %v177_v62  ;;  %v2740_v34 = vadd.f32 %v208_v26, %v174_v23  ;;  %v176_v29 = vperm.slane %v172_v20, 2 }
  0xcf   :  { %3445 = vst [vmem:[#allocation34_spill] sm:$0xff] %v2736_v25 }
  0xd0   :  { %3446 = vst [vmem:[#allocation35_spill] sm:$0xff] %v2738_v41 }
  0xd1   :  { %3447 = vst [vmem:[#allocation36_spill] sm:$0xff] %v2740_v34 }
  0xd4   :  { %v220_v48 = vpop.f32.mrf.mxu2 }
  0xd5   :  { %v2742_v51 = vadd.f32 %v220_v48, %v174_v23  ;;  %v331_v16 = vpop.f32.mrf.mxu3  ;;  %v240_v36 = vpop.f32.mrf.mxu1 }
  0xd6   :  { %v2744_v19 = vadd.f32 %v331_v16, %v177_v62 }
  0xd7   :  { %3448 = vst [vmem:[#allocation37_spill] sm:$0xff] %v2742_v51 }
  0xd8   :  { %3449 = vst [vmem:[#allocation38_spill] sm:$0xff] %v2744_v19 }
  0xdc   :  { %v2746_v8 = vpop.f32.mrf.mxu2 }
  0xdd   :  { %v334_v6 = vpop.f32.mrf.mxu3  ;;  %v243_v11 = vpop.f32.mrf.mxu1 }
  0xde   :  { %v2748_v14 = vadd.f32 %v334_v6, %v177_v62  ;;  %v2750_v25 = vadd.f32 %v243_v11, %v175_v4 }
  0xe0   :  { %3450 = vst [vmem:[#allocation39_spill] sm:$0xff] %v2748_v14 }
  0xe1   :  { %3451 = vst [vmem:[#allocation40_spill] sm:$0xff] %v2750_v25 }
  0xe4   :  { %v284_v41 = vpop.f32.mrf.mxu2 }
  0xe5   :  { %v2752_v26 = vadd.f32 %v284_v41, %v176_v29  ;;  %v337_v34 = vpop.f32.mrf.mxu3  ;;  %v246_v48 = vpop.f32.mrf.mxu1 }
  0xe6   :  { %v2754_v51 = vadd.f32 %v337_v34, %v177_v62  ;;  %v2756_v32 = vadd.f32 %v246_v48, %v175_v4 }
  0xe7   :  { %3452 = vst [vmem:[#allocation41_spill] sm:$0xff] %v2752_v26 }
  0xe8   :  { %3453 = vst [vmem:[#allocation42_spill] sm:$0xff] %v2754_v51 }
  0xe9   :  { %3454 = vst [vmem:[#allocation43_spill] sm:$0xff] %v2756_v32 }
  0xec   :  { %v287_v16 = vpop.f32.mrf.mxu2 }
  0xed   :  { %v2758_v19 = vadd.f32 %v287_v16, %v176_v29  ;;  %v340_v38 = vpop.f32.mrf.mxu3  ;;  %v249_v47 = vpop.f32.mrf.mxu1 }
  0xee   :  { %v2760_v35 = vadd.f32 %v340_v38, %v177_v62  ;;  %v2762_v6 = vadd.f32 %v249_v47, %v175_v4  ;;  %v463_v38 = vpop.f32.mrf.mxu0 }
  0xef   :  { %3455 = vst [vmem:[#allocation44_spill] sm:$0xff] %v2758_v19  ;;  %v200_v19 = vadd.f32 %v199_v17, %v174_v23 }
  0xf0   :  { %3456 = vst [vmem:[#allocation45_spill] sm:$0xff] %v2760_v35 }
  0xf1   :  { %3457 = vst [vmem:[#allocation46_spill] sm:$0xff] %v2762_v6  ;;  %v526_v35 = vadd.f32 %v463_v38, %v200_v19  ;;  %v241_v38 = vadd.f32 %v240_v36, %v175_v4  ;;  %v282_v36 = vadd.f32 %v2746_v8, %v176_v29 }
  0xf4   :  { %v290_v11 = vpop.f32.mrf.mxu2 }
  0xf5   :  { %v2764_v20 = vadd.f32 %v290_v11, %v176_v29  ;;  %v343_v41 = vpop.f32.mrf.mxu3  ;;  %v252_v14 = vpop.f32.mrf.mxu1 }
  0xf6   :  { %v2766_v26 = vadd.f32 %v343_v41, %v177_v62  ;;  %v2768_v34 = vadd.f32 %v252_v14, %v175_v4  ;;  %v323_v14 = vadd.f32 %v322_v44, %v177_v62 }
  0xf7   :  { %3458 = vst [vmem:[#allocation47_spill] sm:$0xff] %v2764_v20  ;;  %v1873_v20 = vmul.f32 -1.442695, %v526_v35 }
  0xf8   :  { %3459 = vst [vmem:[#allocation48_spill] sm:$0xff] %v2766_v26 }
  0xf9   :  { %3460 = vst [vmem:[#allocation49_spill] sm:$0xff] %v2768_v34  ;;  %1926 = vpow2.f32 %v1873_v20 }
  0xfc   :  { %v293_v48 = vpop.f32.mrf.mxu2 }
  0xfd   :  { %v2770_v51 = vadd.f32 %v293_v48, %v176_v29  ;;  %v255_v16 = vpop.f32.mrf.mxu1  ;;  %v523_v41 = vpop.f32.mrf.mxu3 }
  0xfe   :  { %v2772_v32 = vadd.f32 %v255_v16, %v175_v4  ;;  %v529_v34 = vadd.f32 %v523_v41, %v323_v14 }
  0xff   :  { %3461 = vst [vmem:[#allocation50_spill] sm:$0xff] %v2770_v51  ;;  %v1927_v23 = vpop.eup %1926 }
 0x100   :  { %3462 = vst [vmem:[#allocation51_spill] sm:$0xff] %v2772_v32  ;;  %v1875_v16 = vmul.f32 -1.442695, %v529_v34  ;;  %v533_v19 = vadd.f32 1.0, %v1927_v23 }
 0x102   :  { %1928 = vpow2.f32 %v1875_v16  ;;  %vm539_vm1 = vweird.f32 %v533_v19 }
 0x103   :  { %1930 = vrcp.f32 %v533_v19 }
 0x104   :  { %v296_v47 = vpop.f32.mrf.mxu2 }
 0x105   :  { %v2774_v6 = vadd.f32 %v296_v47, %v176_v29  ;;  %v258_v11 = vpop.f32.mrf.mxu1 }
 0x106   :  { %v2776_v25 = vadd.f32 %v258_v11, %v175_v4 }
 0x107   :  { %3463 = vst [vmem:[#allocation52_spill] sm:$0xff] %v2774_v6 }
 0x108   :  { %3464 = vst [vmem:[#allocation53_spill] sm:$0xff] %v2776_v25  ;;  %v1929_v44 = vpop.eup %1928 }
 0x109   :  { %v1931_v62 = vpop.eup %1930 }
 0x10a   :  { %v535_v14 = vmul.f32 %v1931_v62, %v533_v19  ;;  %vm540_vm0 = vweird.f32 %v1931_v62 }
 0x10b   :  { %vm541_vm3 = vmor %vm539_vm1, %vm540_vm0 }
 0x10c   :  { %v299_v26 = vpop.f32.mrf.mxu2  ;;  %v536_v34 = vsub.f32 1.0, %v535_v14 }
 0x10d   :  { %v2778_v48 = vadd.f32 %v299_v26, %v176_v29  ;;  %v261_v51 = vpop.f32.mrf.mxu1  ;;  %v572_v26 = vadd.f32 1.0, %v1929_v44 }
 0x10e   :  { %v2780_v17 = vadd.f32 %v261_v51, %v175_v4 }
 0x10f   :  { %3465 = vst [vmem:[#allocation54_spill] sm:$0xff] %v2778_v48  ;;  %v543_v48 = vand.u32 2147483647, %v533_v19  ;;  %v584_v1 = vand.u32 2147483648, %v572_v26  ;;  %vm578_vm9 = vweird.f32 %v572_v26 }
 0x110   :  { %3466 = vst [vmem:[#allocation55_spill] sm:$0xff] %v2780_v17  ;;  %v545_v17 = vand.u32 2147483648, %v533_v19 }
 0x111   :  { %vm544_vm6 = vcmp.eq.f32.partialorder %v543_v48, 8.507059e+37 }
 0x115   :  { %v302_v47 = vpop.f32.mrf.mxu2  ;;  %v483_v35 = vpop.f32.mrf.mxu1 }
 0x116   :  { %v2782_v6 = vadd.f32 %v302_v47, %v176_v29  ;;  %v527_v11 = vadd.f32 %v483_v35, %v241_v38  ;;  %v537_v47 = vmul.f32 %v1931_v62, %v536_v34 }
 0x118   :  { %3467 = vst [vmem:[#allocation56_spill] sm:$0xff] %v2782_v6  ;;  %v1874_v20 = vmul.f32 -1.442695, %v527_v11 }
 0x11a   :  { %1932 = vpow2.f32 %v1874_v20  ;;  %v538_v20 = vadd.f32 %v1931_v62, %v537_v47 }
 0x11b   :  { %1934 = vrcp.f32 %v572_v26 }
 0x11c   :  { %v542_v8 = vsel %vm541_vm3, %v1931_v62, %v538_v20  ;;  %v582_v62 = vand.u32 2147483647, %v572_v26  ;;  %v3475_v20 = vld [vmem:[#allocation29_spill] sm:$0xff] }
 0x11d   :  { %v503_v23 = vpop.f32.mrf.mxu2 }
 0x11e   :  { %v528_v4 = vadd.f32 %v503_v23, %v282_v36  ;;  %v546_v36 = vor.u32 1.1754944e-38, %v545_v17  ;;  %vm583_vm11 = vcmp.eq.f32.partialorder %v582_v62, 8.507059e+37 }
 0x120   :  { %v1933_v41 = vpop.eup %1932 }
 0x121   :  { %v552_v51 = vadd.f32 1.0, %v1933_v41  ;;  %v1935_v16 = vpop.eup %1934 }
 0x122   :  { %v574_v35 = vmul.f32 %v1935_v16, %v572_v26  ;;  %vm579_vm8 = vweird.f32 %v1935_v16  ;;  %v3472_v26 = vld [vmem:[#allocation23_spill] sm:$0xff] }
 0x123   :  { %1936 = vrcp.f32 %v552_v51  ;;  %v564_v44 = vand.u32 2147483648, %v552_v51  ;;  %v562_v14 = vand.u32 2147483647, %v552_v51  ;;  %vm558_vm4 = vweird.f32 %v552_v51  ;;  %vm580_vm10 = vmor %vm578_vm9, %vm579_vm8 }
 0x124   :  { %1938 = vtanh.f32 %v528_v4  ;;  %v575_v25 = vsub.f32 1.0, %v574_v35 }
 0x125   :  { %v565_v23 = vor.u32 1.1754944e-38, %v564_v44  ;;  %vm563_vm7 = vcmp.eq.f32.partialorder %v562_v14, 8.507059e+37  ;;  %v3476_v44 = vld [vmem:[#allocation24_spill] sm:$0xff]  ;;  %v3479_v14 = vld [vmem:[#allocation31_spill] sm:$0xff] }
 0x126   :  { %v576_v47 = vmul.f32 %v1935_v16, %v575_v25 }
 0x128   :  { %v577_v35 = vadd.f32 %v1935_v16, %v576_v47 }
 0x129   :  { %v1937_v6 = vpop.eup %1936 }
 0x12a   :  { %v554_v38 = vmul.f32 %v1937_v6, %v552_v51  ;;  %vm559_vm2 = vweird.f32 %v1937_v6  ;;  %v1939_v34 = vpop.eup %1938  ;;  %v581_v17 = vsel %vm580_vm10, %v1935_v16, %v577_v35  ;;  %v585_v51 = vor.u32 1.1754944e-38, %v584_v1  ;;  %v2800_v1 = vld [vmem:[#allocation9 + $0x1c0] sm:$0xff]  ;;  %v3474_v16 = vld [vmem:[#allocation27_spill] sm:$0xff] }
 0x12b   :  { %vm560_vm5 = vmor %vm558_vm4, %vm559_vm2  ;;  %v3486_v35 = vld [vmem:[#allocation40_spill] sm:$0xff] }
 0x12c   :  { %v555_v11 = vsub.f32 1.0, %v554_v38  ;;  %v547_v38 = vsel %vm544_vm6, %v546_v36, %v542_v8  ;;  %v586_v48 = vsel %vm583_vm11, %v585_v51, %v581_v17  ;;  %v3480_v8 = vld [vmem:[#allocation25_spill] sm:$0xff]  ;;  %v3484_v36 = vld [vmem:[#allocation26_spill] sm:$0xff] }
 0x12e   :  { %v556_v41 = vmul.f32 %v1937_v6, %v555_v11  ;;  %v589_v11 = vmul.f32 %v1939_v34, %v547_v38  ;;  %v3482_v34 = vld [vmem:[#allocation32_spill] sm:$0xff]  ;;  %v3485_v38 = vld [vmem:[#allocation19_spill] sm:$0xff] }
 0x130   :  { %v557_v29 = vadd.f32 %v1937_v6, %v556_v41  ;;  %v3478_v41 = vld [vmem:[#allocation30_spill] sm:$0xff] }
 0x132   :  { %v561_v4 = vsel %vm560_vm5, %v1937_v6, %v557_v29  ;;  %v2884_v29 = vld [vmem:[#allocation9] sm:$0xff] }
 0x133   :  { %v566_v32 = vsel %vm563_vm7, %v565_v23, %v561_v4  ;;  %3481 = vst [vmem:[#allocation25_spill] sm:$0xff] %v2884_v29  ;;  %v3483_v23 = vld [vmem:[#allocation33_spill] sm:$0xff] }
 0x134   :  { %v588_v53 = vmul.f32 0.0, %v566_v32  ;;  %v2794_v32 = vld [vmem:[#allocation9 + $0x1e0] sm:$0xff] }
 0x136   :  { %v2785_v19 = vadd.f32 %v589_v11, %v588_v53  ;;  %v2806_v53 = vld [vmem:[#allocation9 + $0x1a0] sm:$0xff] }
 0x138   :  { %1940 = vtanh.f32 %v2785_v19 }
 0x13e   :  { %v1941_v6 = vpop.eup %1940 }
 0x13f   :  { %v2788_v25 = vmul.f32 %v1941_v6, %v586_v48  ;;  %v3487_v48 = vld [vmem:[#allocation21_spill] sm:$0xff] }
 0x141   :  { %3468 = vst [vmem:[#allocation57_spill] sm:$0xff] %v2788_v25  ;;  %615 = vmatmul.f32.vlgmr.msrb.gmra.mxu0 %v2788_v25  ;;  %635 = vmatmul.f32.vlgmr.msrb.gmra.mxu1 %v2788_v25 }
 0x142   :  { %655 = vmatmul.f32.vlgmr.msrb.gmra.mxu2 %v2788_v25  ;;  %675 = vmatmul.f32.vlgmr.msra.gmra.mxu3 %v2788_v25 }
 0x143   :  { %907 = vmatpush.msrb.mxu0 %v2794_v32  ;;  %927 = vmatpush.msrb.mxu1 %v2469_v54 }
 0x144   :  { %947 = vmatpush.msrb.mxu2 %v2472_v56  ;;  %967 = vmatpush.msra.mxu3 %v2408_v55  ;;  %v2812_v55 = vld [vmem:[#allocation9 + $0x180] sm:$0xff] }
 0x145   :  { %908 = vmatpush.msrb.mxu0 %v2800_v1  ;;  %928 = vmatpush.msrb.mxu1 %v2476_v58 }
 0x146   :  { %948 = vmatpush.msrb.mxu2 %v2482_v63  ;;  %968 = vmatpush.msra.mxu3 %v2412_v59  ;;  %v2818_v59 = vld [vmem:[#allocation9 + $0x160] sm:$0xff] }
 0x147   :  { %909 = vmatpush.msrb.mxu0 %v2806_v53  ;;  %929 = vmatpush.msrb.mxu1 %v2485_v0 }
 0x148   :  { %949 = vmatpush.msrb.mxu2 %v2491_v3  ;;  %969 = vmatpush.msra.mxu3 %v2422_v2  ;;  %v2824_v2 = vld [vmem:[#allocation9 + $0x140] sm:$0xff] }
 0x149   :  { %910 = vmatpush.msrb.mxu0 %v2812_v55  ;;  %930 = vmatpush.msrb.mxu1 %v2494_v5 }
 0x14a   :  { %950 = vmatpush.msrb.mxu2 %v2502_v9  ;;  %970 = vmatpush.msra.mxu3 %v2426_v7  ;;  %v2830_v7 = vld [vmem:[#allocation9 + $0x120] sm:$0xff] }
 0x14b   :  { %911 = vmatpush.msrb.mxu0 %v2818_v59  ;;  %931 = vmatpush.msrb.mxu1 %v2504_v10 }
 0x14c   :  { %951 = vmatpush.msrb.mxu2 %v2510_v13  ;;  %971 = vmatpush.msra.mxu3 %v2429_v12  ;;  %v2836_v12 = vld [vmem:[#allocation9 + $0x100] sm:$0xff] }
 0x14d   :  { %912 = vmatpush.msrb.mxu0 %v2824_v2  ;;  %932 = vmatpush.msrb.mxu1 %v2513_v18 }
 0x14e   :  { %952 = vmatpush.msrb.mxu2 %v2520_v21  ;;  %972 = vmatpush.msra.mxu3 %v2440_v22  ;;  %v2842_v22 = vld [vmem:[#allocation9 + $0xe0] sm:$0xff] }
 0x14f   :  { %913 = vmatpush.msrb.mxu0 %v2830_v7  ;;  %933 = vmatpush.msrb.mxu1 %v2523_v24 }
 0x150   :  { %953 = vmatpush.msrb.mxu2 %v2530_v28  ;;  %973 = vmatpush.msra.mxu3 %v2444_v27  ;;  %v2848_v27 = vld [vmem:[#allocation9 + $0xc0] sm:$0xff] }
 0x151   :  { %914 = vmatpush.msrb.mxu0 %v2836_v12  ;;  %934 = vmatpush.msrb.mxu1 %v2532_v30 }
 0x152   :  { %954 = vmatpush.msrb.mxu2 %v2538_v61  ;;  %974 = vmatpush.msra.mxu3 %v2447_v31  ;;  %v2854_v31 = vld [vmem:[#allocation9 + $0xa0] sm:$0xff] }
 0x153   :  { %915 = vmatpush.msrb.mxu0 %v2842_v22  ;;  %935 = vmatpush.msrb.mxu1 %v2540_v33  ;;  %3469 = vst [vmem:[#allocation58_spill] sm:$0xff] %v2854_v31 }
 0x154   :  { %955 = vmatpush.msrb.mxu2 %v2545_v37  ;;  %975 = vmatpush.msra.mxu3 %v2458_v42  ;;  %v2860_v42 = vld [vmem:[#allocation9 + $0x80] sm:$0xff] }
 0x155   :  { %916 = vmatpush.msrb.mxu0 %v2848_v27  ;;  %936 = vmatpush.msrb.mxu1 %v2549_v39  ;;  %3470 = vst [vmem:[#allocation59_spill] sm:$0xff] %v2860_v42 }
 0x156   :  { %956 = vmatpush.msrb.mxu2 %v2554_v40  ;;  %976 = vmatpush.msra.mxu3 %v2462_v46  ;;  %v2866_v46 = vld [vmem:[#allocation9 + $0x60] sm:$0xff] }
 0x157   :  { %917 = vmatpush.msrb.mxu0 %v2854_v31  ;;  %937 = vmatpush.msrb.mxu1 %v2557_v43  ;;  %3471 = vst [vmem:[#allocation60_spill] sm:$0xff] %v2866_v46 }
 0x158   :  { %957 = vmatpush.msrb.mxu2 %v2561_v45  ;;  %977 = vmatpush.msra.mxu3 %v2465_v52  ;;  %v2872_v52 = vld [vmem:[#allocation9 + $0x40] sm:$0xff] }
 0x159   :  { %918 = vmatpush.msrb.mxu0 %v2860_v42  ;;  %938 = vmatpush.msrb.mxu1 %v2564_v49  ;;  %3473 = vst [vmem:[#allocation23_spill] sm:$0xff] %v2872_v52 }
 0x15a   :  { %958 = vmatpush.msrb.mxu2 %v2569_v15  ;;  %978 = vmatpush.msra.mxu3 %v2478_v60  ;;  %v2878_v60 = vld [vmem:[#allocation9 + $0x20] sm:$0xff] }
 0x15b   :  { %919 = vmatpush.msrb.mxu0 %v2866_v46  ;;  %939 = vmatpush.msrb.mxu1 %v2572_v50  ;;  %3477 = vst [vmem:[#allocation24_spill] sm:$0xff] %v2878_v60 }
 0x15c   :  { %959 = vmatpush.msrb.mxu2 %v2584_v57  ;;  %979 = vmatpush.msra.mxu3 %v3472_v26 }
 0x15d   :  { %920 = vmatpush.msrb.mxu0 %v2872_v52  ;;  %940 = vmatpush.msrb.mxu1 %v3474_v16 }
 0x15e   :  { %960 = vmatpush.msrb.mxu2 %v3475_v20  ;;  %980 = vmatpush.msra.mxu3 %v3476_v44 }
 0x15f   :  { %921 = vmatpush.msrb.mxu0 %v2878_v60  ;;  %941 = vmatpush.msrb.mxu1 %v3478_v41 }
 0x160   :  { %961 = vmatpush.msrb.mxu2 %v3479_v14  ;;  %981 = vmatpush.msra.mxu3 %v3480_v8 }
 0x161   :  { %922 = vmatpush.msrb.mxu0 %v2884_v29  ;;  %942 = vmatpush.msrb.mxu1 %v3482_v34 }
 0x162   :  { %962 = vmatpush.msrb.mxu2 %v3483_v23  ;;  %982 = vmatpush.msra.mxu3 %v3484_v36 }
 0x1be   :  { %v616_v4 = vpop.f32.mrf.mxu0  ;;  %v636_v47 = vpop.f32.mrf.mxu1 }
 0x1bf   :  { %v679_v11 = vadd.f32 %v616_v4, %v3485_v38  ;;  %v680_v62 = vadd.f32 %v636_v47, %v3486_v35  ;;  %v3488_v47 = vld [vmem:[#allocation41_spill] sm:$0xff] }
 0x1c1   :  { %v1876_v17 = vmul.f32 -1.442695, %v679_v11  ;;  %v1877_v51 = vmul.f32 -1.442695, %v680_v62 }
 0x1c3   :  { %1942 = vpow2.f32 %v1876_v17 }
 0x1c4   :  { %1944 = vpow2.f32 %v1877_v51 }
 0x1c5   :  { %v676_v6 = vpop.f32.mrf.mxu3  ;;  %v656_v36 = vpop.f32.mrf.mxu2 }
 0x1c6   :  { %v682_v26 = vadd.f32 %v676_v6, %v3487_v48  ;;  %v681_v11 = vadd.f32 %v656_v36, %v3488_v47 }
 0x1c8   :  { %v1878_v44 = vmul.f32 -1.442695, %v682_v26 }
 0x1c9   :  { %v1943_v8 = vpop.eup %1942 }
 0x1ca   :  { %v1945_v25 = vpop.eup %1944  ;;  %v686_v34 = vadd.f32 1.0, %v1943_v8  ;;  %1946 = vpow2.f32 %v1878_v44 }
 0x1cb   :  { %v705_v23 = vadd.f32 1.0, %v1945_v25 }
 0x1cc   :  { %1948 = vrcp.f32 %v686_v34  ;;  %v698_v48 = vand.u32 2147483648, %v686_v34  ;;  %v696_v25 = vand.u32 2147483647, %v686_v34  ;;  %vm692_vm14 = vweird.f32 %v686_v34 }
 0x1cd   :  { %1950 = vrcp.f32 %v705_v23  ;;  %v717_v26 = vand.u32 2147483648, %v705_v23  ;;  %v715_v14 = vand.u32 2147483647, %v705_v23  ;;  %vm711_vm15 = vweird.f32 %v705_v23 }
 0x1ce   :  { %v699_v36 = vor.u32 1.1754944e-38, %v698_v48  ;;  %vm697_vm2 = vcmp.eq.f32.partialorder %v696_v25, 8.507059e+37 }
 0x1cf   :  { %vm716_vm3 = vcmp.eq.f32.partialorder %v715_v14, 8.507059e+37 }
 0x1d0   :  { %v1947_v29 = vpop.eup %1946 }
 0x1d1   :  { %v725_v4 = vadd.f32 1.0, %v1947_v29 }
 0x1d2   :  { %v1949_v38 = vpop.eup %1948 }
 0x1d3   :  { %v1951_v35 = vpop.eup %1950  ;;  %v688_v62 = vmul.f32 %v1949_v38, %v686_v34  ;;  %1952 = vrcp.f32 %v725_v4  ;;  %vm693_vm12 = vweird.f32 %v1949_v38  ;;  %v737_v48 = vand.u32 2147483648, %v725_v4 }
 0x1d4   :  { %v707_v17 = vmul.f32 %v1951_v35, %v705_v23  ;;  %1954 = vtanh.f32 %v681_v11  ;;  %vm712_vm13 = vweird.f32 %v1951_v35  ;;  %vm694_vm0 = vmor %vm692_vm14, %vm693_vm12  ;;  %vm731_vm5 = vweird.f32 %v725_v4 }
 0x1d5   :  { %v689_v51 = vsub.f32 1.0, %v688_v62  ;;  %vm713_vm1 = vmor %vm711_vm15, %vm712_vm13  ;;  %v718_v62 = vor.u32 1.1754944e-38, %v717_v26  ;;  %v738_v25 = vor.u32 1.1754944e-38, %v737_v48 }
 0x1d6   :  { %v708_v6 = vsub.f32 1.0, %v707_v17 }
 0x1d7   :  { %v690_v8 = vmul.f32 %v1949_v38, %v689_v51 }
 0x1d8   :  { %v709_v44 = vmul.f32 %v1951_v35, %v708_v6 }
 0x1d9   :  { %v1953_v41 = vpop.eup %1952  ;;  %v691_v29 = vadd.f32 %v1949_v38, %v690_v8 }
 0x1da   :  { %v710_v47 = vadd.f32 %v1951_v35, %v709_v44  ;;  %v727_v60 = vmul.f32 %v1953_v41, %v725_v4  ;;  %v1955_v11 = vpop.eup %1954  ;;  %vm732_vm4 = vweird.f32 %v1953_v41 }
 0x1db   :  { %v695_v17 = vsel %vm694_vm0, %v1949_v38, %v691_v29  ;;  %v735_v38 = vand.u32 2147483647, %v725_v4  ;;  %vm733_vm6 = vmor %vm731_vm5, %vm732_vm4 }
 0x1dc   :  { %v700_v20 = vsel %vm697_vm2, %v699_v36, %v695_v17  ;;  %v714_v51 = vsel %vm713_vm1, %v1951_v35, %v710_v47  ;;  %v728_v16 = vsub.f32 1.0, %v727_v60  ;;  %v3509_v47 = vld [vmem:[#allocation35_spill] sm:$0xff] }
 0x1dd   :  { %v719_v6 = vsel %vm716_vm3, %v718_v62, %v714_v51  ;;  %v742_v52 = vmul.f32 %v1955_v11, %v700_v20  ;;  %vm736_vm7 = vcmp.eq.f32.partialorder %v735_v38, 8.507059e+37 }
 0x1de   :  { %v741_v57 = vmul.f32 %v719_v6, %v2785_v19  ;;  %v729_v8 = vmul.f32 %v1953_v41, %v728_v16  ;;  %v2913_v19 = vld [vmem:[#allocation9 + $0x1d8] sm:$0xff]  ;;  %v3507_v16 = vld [vmem:[#allocation22_spill] sm:$0xff] }
 0x1e0   :  { %v2895_v34 = vadd.f32 %v742_v52, %v741_v57  ;;  %v730_v23 = vadd.f32 %v1953_v41, %v729_v8  ;;  %v2907_v57 = vld [vmem:[#allocation9 + $0x1f8] sm:$0xff] }
 0x1e2   :  { %1956 = vtanh.f32 %v2895_v34  ;;  %v734_v26 = vsel %vm733_vm6, %v1953_v41, %v730_v23  ;;  %v3508_v41 = vld [vmem:[#allocation43_spill] sm:$0xff] }
 0x1e3   :  { %v739_v60 = vsel %vm736_vm7, %v738_v25, %v734_v26  ;;  %v3510_v25 = vld [vmem:[#allocation44_spill] sm:$0xff] }
 0x1e8   :  { %v1957_v14 = vpop.eup %1956 }
 0x1e9   :  { %v2898_v35 = vmul.f32 %v1957_v14, %v739_v60 }
 0x1eb   :  { %3489 = vst [vmem:[#allocation26_spill] sm:$0xff] %v2898_v35  ;;  %769 = vmatmul.f32.vlgmr.msra.gmra.mxu0 %v2898_v35  ;;  %789 = vmatmul.f32.vlgmr.msra.gmra.mxu1 %v2898_v35 }
 0x1ec   :  { %809 = vmatmul.f32.vlgmr.msra.gmra.mxu2 %v2898_v35  ;;  %829 = vmatmul.f32.vlgmr.msrb.gmra.mxu3 %v2898_v35  ;;  %v3135_v35 = vld [vmem:[#allocation9 + $0x8] sm:$0xff] }
 0x1ed   :  { %1061 = vmatpush.msra.mxu0 %v2794_v32  ;;  %1081 = vmatpush.msra.mxu1 %v2469_v54  ;;  %v2919_v54 = vld [vmem:[#allocation9 + $0x1b8] sm:$0xff]  ;;  %3523 = vst [vmem:[#allocation65_spill] sm:$0xff] %v3135_v35 }
 0x1ee   :  { %1101 = vmatpush.msra.mxu2 %v2472_v56  ;;  %1121 = vmatpush.msrb.mxu3 %v2907_v57  ;;  %v2925_v56 = vld [vmem:[#allocation9 + $0x198] sm:$0xff] }
 0x1ef   :  { %1062 = vmatpush.msra.mxu0 %v2800_v1  ;;  %1082 = vmatpush.msra.mxu1 %v2476_v58  ;;  %v2931_v58 = vld [vmem:[#allocation9 + $0x178] sm:$0xff] }
 0x1f0   :  { %1102 = vmatpush.msra.mxu2 %v2482_v63  ;;  %1122 = vmatpush.msrb.mxu3 %v2913_v19  ;;  %v2937_v63 = vld [vmem:[#allocation9 + $0x158] sm:$0xff] }
 0x1f1   :  { %1063 = vmatpush.msra.mxu0 %v2806_v53  ;;  %1083 = vmatpush.msra.mxu1 %v2485_v0  ;;  %v2943_v0 = vld [vmem:[#allocation9 + $0x138] sm:$0xff] }
 0x1f2   :  { %1103 = vmatpush.msra.mxu2 %v2491_v3  ;;  %1123 = vmatpush.msrb.mxu3 %v2919_v54  ;;  %v2949_v3 = vld [vmem:[#allocation9 + $0x118] sm:$0xff] }
 0x1f3   :  { %1064 = vmatpush.msra.mxu0 %v2812_v55  ;;  %1084 = vmatpush.msra.mxu1 %v2494_v5  ;;  %v2955_v5 = vld [vmem:[#allocation9 + $0xf8] sm:$0xff] }
 0x1f4   :  { %1104 = vmatpush.msra.mxu2 %v2502_v9  ;;  %1124 = vmatpush.msrb.mxu3 %v2925_v56  ;;  %v2961_v9 = vld [vmem:[#allocation9 + $0xd8] sm:$0xff] }
 0x1f5   :  { %1065 = vmatpush.msra.mxu0 %v2818_v59  ;;  %1085 = vmatpush.msra.mxu1 %v2504_v10  ;;  %3490 = vst [vmem:[#allocation19_spill] sm:$0xff] %v2961_v9  ;;  %v2967_v10 = vld [vmem:[#allocation9 + $0xb8] sm:$0xff] }
 0x1f6   :  { %1105 = vmatpush.msra.mxu2 %v2510_v13  ;;  %1125 = vmatpush.msrb.mxu3 %v2931_v58  ;;  %3491 = vst [vmem:[#allocation40_spill] sm:$0xff] %v2967_v10  ;;  %v2973_v13 = vld [vmem:[#allocation9 + $0x98] sm:$0xff] }
 0x1f7   :  { %1066 = vmatpush.msra.mxu0 %v2824_v2  ;;  %1086 = vmatpush.msra.mxu1 %v2513_v18  ;;  %3492 = vst [vmem:[#allocation21_spill] sm:$0xff] %v2973_v13  ;;  %v3493_v18 = vld [vmem:[#allocation28_spill] sm:$0xff] }
 0x1f8   :  { %1106 = vmatpush.msra.mxu2 %v2520_v21  ;;  %1126 = vmatpush.msrb.mxu3 %v2937_v63  ;;  %v2979_v21 = vld [vmem:[#allocation9 + $0x78] sm:$0xff] }
 0x1f9   :  { %1067 = vmatpush.msra.mxu0 %v2830_v7  ;;  %1087 = vmatpush.msra.mxu1 %v2523_v24  ;;  %3494 = vst [vmem:[#allocation41_spill] sm:$0xff] %v2979_v21  ;;  %v3495_v24 = vld [vmem:[#allocation23_spill] sm:$0xff] }
 0x1fa   :  { %1107 = vmatpush.msra.mxu2 %v2530_v28  ;;  %1127 = vmatpush.msrb.mxu3 %v2943_v0  ;;  %v3496_v28 = vld [vmem:[#allocation27_spill] sm:$0xff] }
 0x1fb   :  { %1068 = vmatpush.msra.mxu0 %v2836_v12  ;;  %1088 = vmatpush.msra.mxu1 %v2532_v30  ;;  %v3497_v30 = vld [vmem:[#allocation29_spill] sm:$0xff] }
 0x1fc   :  { %1108 = vmatpush.msra.mxu2 %v2538_v61  ;;  %1128 = vmatpush.msrb.mxu3 %v2949_v3  ;;  %v2985_v61 = vld [vmem:[#allocation9 + $0x58] sm:$0xff] }
 0x1fd   :  { %1069 = vmatpush.msra.mxu0 %v2842_v22  ;;  %1089 = vmatpush.msra.mxu1 %v2540_v33  ;;  %3498 = vst [vmem:[#allocation28_spill] sm:$0xff] %v2985_v61  ;;  %v3499_v33 = vld [vmem:[#allocation24_spill] sm:$0xff] }
 0x1fe   :  { %1109 = vmatpush.msra.mxu2 %v2545_v37  ;;  %1129 = vmatpush.msrb.mxu3 %v2955_v5  ;;  %v3500_v37 = vld [vmem:[#allocation30_spill] sm:$0xff] }
 0x1ff   :  { %1070 = vmatpush.msra.mxu0 %v2848_v27  ;;  %1090 = vmatpush.msra.mxu1 %v2549_v39  ;;  %v3501_v39 = vld [vmem:[#allocation31_spill] sm:$0xff] }
 0x200   :  { %1110 = vmatpush.msra.mxu2 %v2554_v40  ;;  %1130 = vmatpush.msrb.mxu3 %v2961_v9  ;;  %v2991_v40 = vld [vmem:[#allocation9 + $0x38] sm:$0xff] }
 0x201   :  { %1071 = vmatpush.msra.mxu0 %v2854_v31  ;;  %1091 = vmatpush.msra.mxu1 %v2557_v43  ;;  %3502 = vst [vmem:[#allocation27_spill] sm:$0xff] %v2991_v40  ;;  %v3503_v43 = vld [vmem:[#allocation25_spill] sm:$0xff] }
 0x202   :  { %1111 = vmatpush.msra.mxu2 %v2561_v45  ;;  %1131 = vmatpush.msrb.mxu3 %v2967_v10  ;;  %v3504_v45 = vld [vmem:[#allocation32_spill] sm:$0xff] }
 0x203   :  { %1072 = vmatpush.msra.mxu0 %v2860_v42  ;;  %1092 = vmatpush.msra.mxu1 %v2564_v49  ;;  %v3505_v49 = vld [vmem:[#allocation33_spill] sm:$0xff] }
 0x204   :  { %1112 = vmatpush.msra.mxu2 %v2569_v15  ;;  %1132 = vmatpush.msrb.mxu3 %v2973_v13  ;;  %v2997_v15 = vld [vmem:[#allocation9 + $0x18] sm:$0xff] }
 0x205   :  { %1073 = vmatpush.msra.mxu0 %v2866_v46  ;;  %1093 = vmatpush.msra.mxu1 %v2572_v50  ;;  %3506 = vst [vmem:[#allocation29_spill] sm:$0xff] %v2997_v15 }
 0x206   :  { %1113 = vmatpush.msra.mxu2 %v3493_v18  ;;  %1133 = vmatpush.msrb.mxu3 %v2979_v21 }
 0x207   :  { %1074 = vmatpush.msra.mxu0 %v3495_v24  ;;  %1094 = vmatpush.msra.mxu1 %v3496_v28 }
 0x208   :  { %1114 = vmatpush.msra.mxu2 %v3497_v30  ;;  %1134 = vmatpush.msrb.mxu3 %v2985_v61 }
 0x209   :  { %1075 = vmatpush.msra.mxu0 %v3499_v33  ;;  %1095 = vmatpush.msra.mxu1 %v3500_v37 }
 0x20a   :  { %1115 = vmatpush.msra.mxu2 %v3501_v39  ;;  %1135 = vmatpush.msrb.mxu3 %v2991_v40 }
 0x20b   :  { %1076 = vmatpush.msra.mxu0 %v3503_v43  ;;  %1096 = vmatpush.msra.mxu1 %v3504_v45 }
 0x20c   :  { %1116 = vmatpush.msra.mxu2 %v3505_v49  ;;  %1136 = vmatpush.msrb.mxu3 %v2997_v15 }
 0x268   :  { %v770_v50 = vpop.f32.mrf.mxu0  ;;  %v790_v52 = vpop.f32.mrf.mxu1 }
 0x269   :  { %v833_v20 = vadd.f32 %v770_v50, %v3507_v16  ;;  %v834_v4 = vadd.f32 %v790_v52, %v3508_v41 }
 0x26b   :  { %v1879_v44 = vmul.f32 -1.442695, %v833_v20  ;;  %v1880_v29 = vmul.f32 -1.442695, %v834_v4 }
 0x26d   :  { %1958 = vpow2.f32 %v1879_v44 }
 0x26e   :  { %1960 = vpow2.f32 %v1880_v29 }
 0x26f   :  { %v830_v36 = vpop.f32.mrf.mxu3  ;;  %v810_v23 = vpop.f32.mrf.mxu2 }
 0x270   :  { %v836_v62 = vadd.f32 %v830_v36, %v3509_v47  ;;  %v835_v14 = vadd.f32 %v810_v23, %v3510_v25 }
 0x272   :  { %v1881_v17 = vmul.f32 -1.442695, %v836_v62 }
 0x273   :  { %v1959_v11 = vpop.eup %1958 }
 0x274   :  { %v1961_v51 = vpop.eup %1960  ;;  %v840_v6 = vadd.f32 1.0, %v1959_v11  ;;  %1962 = vpow2.f32 %v1881_v17 }
 0x275   :  { %v859_v8 = vadd.f32 1.0, %v1961_v51 }
 0x276   :  { %1964 = vrcp.f32 %v840_v6  ;;  %v852_v39 = vand.u32 2147483648, %v840_v6  ;;  %v850_v50 = vand.u32 2147483647, %v840_v6  ;;  %vm846_vm10 = vweird.f32 %v840_v6 }
 0x277   :  { %1966 = vrcp.f32 %v859_v8  ;;  %v871_v45 = vand.u32 2147483648, %v859_v8  ;;  %v869_v16 = vand.u32 2147483647, %v859_v8  ;;  %vm865_vm11 = vweird.f32 %v859_v8 }
 0x278   :  { %v853_v4 = vor.u32 1.1754944e-38, %v852_v39  ;;  %vm851_vm14 = vcmp.eq.f32.partialorder %v850_v50, 8.507059e+37  ;;  %v3031_v50 = vld [vmem:[#allocation9 + $0x1a8] sm:$0xff] }
 0x279   :  { %v872_v36 = vor.u32 1.1754944e-38, %v871_v45  ;;  %vm870_vm15 = vcmp.eq.f32.partialorder %v869_v16, 8.507059e+37  ;;  %v3023_v45 = vld [vmem:[#allocation9 + $0x1c8] sm:$0xff] }
 0x27a   :  { %v1963_v48 = vpop.eup %1962  ;;  %v3039_v16 = vld [vmem:[#allocation9 + $0x188] sm:$0xff] }
 0x27b   :  { %v879_v38 = vadd.f32 1.0, %v1963_v48 }
 0x27c   :  { %v1965_v26 = vpop.eup %1964 }
 0x27d   :  { %v1967_v60 = vpop.eup %1966  ;;  %v842_v18 = vmul.f32 %v1965_v26, %v840_v6  ;;  %1968 = vrcp.f32 %v879_v38  ;;  %vm847_vm8 = vweird.f32 %v1965_v26  ;;  %vm885_vm1 = vweird.f32 %v879_v38 }
 0x27e   :  { %v861_v28 = vmul.f32 %v1967_v60, %v859_v8  ;;  %1970 = vtanh.f32 %v835_v14  ;;  %vm866_vm9 = vweird.f32 %v1967_v60  ;;  %vm848_vm12 = vmor %vm846_vm10, %vm847_vm8 }
 0x27f   :  { %v843_v30 = vsub.f32 1.0, %v842_v18  ;;  %vm867_vm13 = vmor %vm865_vm11, %vm866_vm9  ;;  %v891_v18 = vand.u32 2147483648, %v879_v38 }
 0x280   :  { %v862_v37 = vsub.f32 1.0, %v861_v28 }
 0x281   :  { %v844_v49 = vmul.f32 %v1965_v26, %v843_v30  ;;  %v892_v30 = vor.u32 1.1754944e-38, %v891_v18  ;;  %v3106_v18 = vld [vmem:[#allocation9 + $0x90] sm:$0xff] }
 0x282   :  { %v863_v52 = vmul.f32 %v1967_v60, %v862_v37  ;;  %3516 = vst [vmem:[#allocation43_spill] sm:$0xff] %v3106_v18 }
 0x283   :  { %v1969_v20 = vpop.eup %1968  ;;  %v845_v41 = vadd.f32 %v1965_v26, %v844_v49  ;;  %v3026_v49 = vld [vmem:[#allocation9 + $0x1d0] sm:$0xff] }
 0x284   :  { %v864_v44 = vadd.f32 %v1967_v60, %v863_v52  ;;  %v881_v29 = vmul.f32 %v1969_v20, %v879_v38  ;;  %v1971_v62 = vpop.eup %1970  ;;  %vm886_vm0 = vweird.f32 %v1969_v20  ;;  %v3034_v52 = vld [vmem:[#allocation9 + $0x1b0] sm:$0xff] }
 0x285   :  { %v849_v47 = vsel %vm848_vm12, %v1965_v26, %v845_v41  ;;  %v889_v26 = vand.u32 2147483647, %v879_v38  ;;  %vm887_vm2 = vmor %vm885_vm1, %vm886_vm0  ;;  %v3018_v38 = vld [vmem:[#allocation9 + $0x1f0] sm:$0xff]  ;;  %v3047_v41 = vld [vmem:[#allocation9 + $0x168] sm:$0xff] }
 0x286   :  { %v854_v17 = vsel %vm851_vm14, %v853_v4, %v849_v47  ;;  %v868_v11 = vsel %vm867_vm13, %v1967_v60, %v864_v44  ;;  %v882_v51 = vsub.f32 1.0, %v881_v29  ;;  %v3050_v4 = vld [vmem:[#allocation9 + $0x170] sm:$0xff]  ;;  %v3055_v44 = vld [vmem:[#allocation9 + $0x148] sm:$0xff] }
 0x287   :  { %v873_v23 = vsel %vm870_vm15, %v872_v36, %v868_v11  ;;  %v896_v48 = vmul.f32 %v1971_v62, %v854_v17  ;;  %vm890_vm3 = vcmp.eq.f32.partialorder %v889_v26, 8.507059e+37  ;;  %v3058_v29 = vld [vmem:[#allocation9 + $0x150] sm:$0xff]  ;;  %v3063_v36 = vld [vmem:[#allocation9 + $0x128] sm:$0xff] }
 0x288   :  { %v895_v25 = vmul.f32 %v873_v23, %v2895_v34  ;;  %v883_v14 = vmul.f32 %v1969_v20, %v882_v51  ;;  %v3015_v34 = vld [vmem:[#allocation9 + $0x1e8] sm:$0xff]  ;;  %v3066_v47 = vld [vmem:[#allocation9 + $0x130] sm:$0xff] }
 0x289   :  { %v3071_v62 = vld [vmem:[#allocation9 + $0x108] sm:$0xff]  ;;  %v3074_v17 = vld [vmem:[#allocation9 + $0x110] sm:$0xff] }
 0x28a   :  { %v3005_v6 = vadd.f32 %v896_v48, %v895_v25  ;;  %v884_v8 = vadd.f32 %v1969_v20, %v883_v14  ;;  %v3079_v11 = vld [vmem:[#allocation9 + $0xe8] sm:$0xff]  ;;  %v3082_v51 = vld [vmem:[#allocation9 + $0xf0] sm:$0xff] }
 0x28b   :  { %v3087_v23 = vld [vmem:[#allocation9 + $0xc8] sm:$0xff]  ;;  %v3090_v48 = vld [vmem:[#allocation9 + $0xd0] sm:$0xff] }
 0x28c   :  { %1972 = vtanh.f32 %v3005_v6  ;;  %v888_v28 = vsel %vm887_vm2, %v1969_v20, %v884_v8  ;;  %v3042_v20 = vld [vmem:[#allocation9 + $0x190] sm:$0xff]  ;;  %3512 = vst [vmem:[#allocation31_spill] sm:$0xff] %v3090_v48  ;;  %v3095_v25 = vld [vmem:[#allocation9 + $0xa8] sm:$0xff] }
 0x28d   :  { %v893_v37 = vsel %vm890_vm3, %v892_v30, %v888_v28  ;;  %3513 = vst [vmem:[#allocation32_spill] sm:$0xff] %v3095_v25  ;;  %v3098_v14 = vld [vmem:[#allocation9 + $0xb0] sm:$0xff]  ;;  %v3103_v8 = vld [vmem:[#allocation9 + $0x88] sm:$0xff] }
 0x28e   :  { %3514 = vst [vmem:[#allocation33_spill] sm:$0xff] %v3098_v14  ;;  %v3111_v26 = vld [vmem:[#allocation9 + $0x68] sm:$0xff]  ;;  %v3114_v28 = vld [vmem:[#allocation9 + $0x70] sm:$0xff] }
 0x28f   :  { %3515 = vst [vmem:[#allocation22_spill] sm:$0xff] %v3103_v8  ;;  %v3119_v30 = vld [vmem:[#allocation9 + $0x48] sm:$0xff] }
 0x290   :  { %3517 = vst [vmem:[#allocation35_spill] sm:$0xff] %v3111_v26 }
 0x291   :  { %3518 = vst [vmem:[#allocation44_spill] sm:$0xff] %v3114_v28 }
 0x292   :  { %v1973_v60 = vpop.eup %1972  ;;  %3519 = vst [vmem:[#allocation61_spill] sm:$0xff] %v3119_v30 }
 0x293   :  { %v3008_v39 = vmul.f32 %v1973_v60, %v893_v37  ;;  %v3122_v60 = vld [vmem:[#allocation9 + $0x50] sm:$0xff]  ;;  %v3127_v37 = vld [vmem:[#allocation9 + $0x28] sm:$0xff] }
 0x294   :  { %3520 = vst [vmem:[#allocation62_spill] sm:$0xff] %v3122_v60 }
 0x295   :  { %3511 = vst [vmem:[#allocation30_spill] sm:$0xff] %v3008_v39  ;;  %923 = vmatmul.f32.vlgmr.msrb.gmra.mxu0 %v3008_v39  ;;  %943 = vmatmul.f32.vlgmr.msrb.gmra.mxu1 %v3008_v39 }
 0x296   :  { %963 = vmatmul.f32.vlgmr.msrb.gmra.mxu2 %v3008_v39  ;;  %983 = vmatmul.f32.vlgmr.msra.gmra.mxu3 %v3008_v39  ;;  %3521 = vst [vmem:[#allocation63_spill] sm:$0xff] %v3127_v37  ;;  %v3130_v39 = vld [vmem:[#allocation9 + $0x30] sm:$0xff] }
 0x297   :  { %1215 = vmatpush.msrb.mxu0 %v2794_v32  ;;  %1235 = vmatpush.msrb.mxu1 %v3015_v34  ;;  %3522 = vst [vmem:[#allocation64_spill] sm:$0xff] %v3130_v39 }
 0x298   :  { %1255 = vmatpush.msrb.mxu2 %v3018_v38  ;;  %1275 = vmatpush.msra.mxu3 %v2907_v57 }
 0x299   :  { %1216 = vmatpush.msrb.mxu0 %v2800_v1  ;;  %1236 = vmatpush.msrb.mxu1 %v3023_v45 }
 0x29a   :  { %1256 = vmatpush.msrb.mxu2 %v3026_v49  ;;  %1276 = vmatpush.msra.mxu3 %v2913_v19 }
 0x29b   :  { %1217 = vmatpush.msrb.mxu0 %v2806_v53  ;;  %1237 = vmatpush.msrb.mxu1 %v3031_v50 }
 0x29c   :  { %1257 = vmatpush.msrb.mxu2 %v3034_v52  ;;  %1277 = vmatpush.msra.mxu3 %v2919_v54 }
 0x29d   :  { %1218 = vmatpush.msrb.mxu0 %v2812_v55  ;;  %1238 = vmatpush.msrb.mxu1 %v3039_v16 }
 0x29e   :  { %1258 = vmatpush.msrb.mxu2 %v3042_v20  ;;  %1278 = vmatpush.msra.mxu3 %v2925_v56 }
 0x29f   :  { %1219 = vmatpush.msrb.mxu0 %v2818_v59  ;;  %1239 = vmatpush.msrb.mxu1 %v3047_v41 }
 0x2a0   :  { %1259 = vmatpush.msrb.mxu2 %v3050_v4  ;;  %1279 = vmatpush.msra.mxu3 %v2931_v58 }
 0x2a1   :  { %1220 = vmatpush.msrb.mxu0 %v2824_v2  ;;  %1240 = vmatpush.msrb.mxu1 %v3055_v44 }
 0x2a2   :  { %1260 = vmatpush.msrb.mxu2 %v3058_v29  ;;  %1280 = vmatpush.msra.mxu3 %v2937_v63 }
 0x2a3   :  { %1221 = vmatpush.msrb.mxu0 %v2830_v7  ;;  %1241 = vmatpush.msrb.mxu1 %v3063_v36 }
 0x2a4   :  { %1261 = vmatpush.msrb.mxu2 %v3066_v47  ;;  %1281 = vmatpush.msra.mxu3 %v2943_v0 }
 0x2a5   :  { %1222 = vmatpush.msrb.mxu0 %v2836_v12  ;;  %1242 = vmatpush.msrb.mxu1 %v3071_v62 }
 0x2a6   :  { %1262 = vmatpush.msrb.mxu2 %v3074_v17  ;;  %1282 = vmatpush.msra.mxu3 %v2949_v3 }
 0x2a7   :  { %1223 = vmatpush.msrb.mxu0 %v2842_v22  ;;  %1243 = vmatpush.msrb.mxu1 %v3079_v11 }
 0x2a8   :  { %1263 = vmatpush.msrb.mxu2 %v3082_v51  ;;  %1283 = vmatpush.msra.mxu3 %v2955_v5 }
 0x2a9   :  { %1224 = vmatpush.msrb.mxu0 %v2848_v27  ;;  %1244 = vmatpush.msrb.mxu1 %v3087_v23 }
 0x2aa   :  { %1264 = vmatpush.msrb.mxu2 %v3090_v48  ;;  %1284 = vmatpush.msra.mxu3 %v2961_v9 }
 0x2ab   :  { %1225 = vmatpush.msrb.mxu0 %v2854_v31  ;;  %1245 = vmatpush.msrb.mxu1 %v3095_v25 }
 0x2ac   :  { %1265 = vmatpush.msrb.mxu2 %v3098_v14  ;;  %1285 = vmatpush.msra.mxu3 %v2967_v10 }
 0x2ad   :  { %1226 = vmatpush.msrb.mxu0 %v2860_v42  ;;  %1246 = vmatpush.msrb.mxu1 %v3103_v8 }
 0x2ae   :  { %1266 = vmatpush.msrb.mxu2 %v3106_v18  ;;  %1286 = vmatpush.msra.mxu3 %v2973_v13 }
 0x2af   :  { %1227 = vmatpush.msrb.mxu0 %v2866_v46  ;;  %1247 = vmatpush.msrb.mxu1 %v3111_v26 }
 0x2b0   :  { %1267 = vmatpush.msrb.mxu2 %v3114_v28  ;;  %1287 = vmatpush.msra.mxu3 %v2979_v21  ;;  %v3527_v28 = vld [vmem:[#allocation38_spill] sm:$0xff] }
 0x2b1   :  { %1228 = vmatpush.msrb.mxu0 %v3495_v24  ;;  %1248 = vmatpush.msrb.mxu1 %v3119_v30  ;;  %v3526_v24 = vld [vmem:[#allocation46_spill] sm:$0xff] }
 0x2b2   :  { %1268 = vmatpush.msrb.mxu2 %v3122_v60  ;;  %1288 = vmatpush.msra.mxu3 %v2985_v61  ;;  %v3138_v60 = vld [vmem:[#allocation9 + $0x10] sm:$0xff]  ;;  %v3525_v61 = vld [vmem:[#allocation36_spill] sm:$0xff] }
 0x2b3   :  { %1229 = vmatpush.msrb.mxu0 %v3499_v33  ;;  %1249 = vmatpush.msrb.mxu1 %v3127_v37  ;;  %3524 = vst [vmem:[#allocation66_spill] sm:$0xff] %v3138_v60 }
 0x2b4   :  { %1269 = vmatpush.msrb.mxu2 %v3130_v39  ;;  %1289 = vmatpush.msra.mxu3 %v2991_v40 }
 0x2b5   :  { %1230 = vmatpush.msrb.mxu0 %v3503_v43  ;;  %1250 = vmatpush.msrb.mxu1 %v3135_v35 }
 0x2b6   :  { %1270 = vmatpush.msrb.mxu2 %v3138_v60  ;;  %1290 = vmatpush.msra.mxu3 %v2997_v15 }
 0x312   :  { %v924_v33 = vpop.f32.mrf.mxu0  ;;  %v944_v37 = vpop.f32.mrf.mxu1 }
 0x313   :  { %v987_v30 = vadd.f32 %v924_v33, %v3525_v61  ;;  %v988_v39 = vadd.f32 %v944_v37, %v3526_v24  ;;  %v3528_v24 = vld [vmem:[#allocation47_spill] sm:$0xff] }
 0x315   :  { %v1882_v21 = vmul.f32 -1.442695, %v987_v30  ;;  %v1883_v40 = vmul.f32 -1.442695, %v988_v39 }
 0x317   :  { %1974 = vpow2.f32 %v1882_v21 }
 0x318   :  { %1976 = vpow2.f32 %v1883_v40 }
 0x319   :  { %v984_v43 = vpop.f32.mrf.mxu3  ;;  %v964_v15 = vpop.f32.mrf.mxu2 }
 0x31a   :  { %v990_v26 = vadd.f32 %v984_v43, %v3527_v28  ;;  %v989_v30 = vadd.f32 %v964_v15, %v3528_v24 }
 0x31c   :  { %v1884_v35 = vmul.f32 -1.442695, %v990_v26 }
 0x31d   :  { %v1975_v46 = vpop.eup %1974 }
 0x31e   :  { %v1977_v13 = vpop.eup %1976  ;;  %v994_v18 = vadd.f32 1.0, %v1975_v46  ;;  %1978 = vpow2.f32 %v1884_v35 }
 0x31f   :  { %v1013_v60 = vadd.f32 1.0, %v1977_v13 }
 0x320   :  { %1980 = vrcp.f32 %v994_v18  ;;  %v1006_v26 = vand.u32 2147483648, %v994_v18  ;;  %v1004_v35 = vand.u32 2147483647, %v994_v18  ;;  %vm1000_vm6 = vweird.f32 %v994_v18 }
 0x321   :  { %1982 = vrcp.f32 %v1013_v60  ;;  %v1025_v28 = vand.u32 2147483648, %v1013_v60  ;;  %v1023_v42 = vand.u32 2147483647, %v1013_v60  ;;  %vm1019_vm7 = vweird.f32 %v1013_v60 }
 0x322   :  { %v1007_v15 = vor.u32 1.1754944e-38, %v1006_v26  ;;  %vm1005_vm10 = vcmp.eq.f32.partialorder %v1004_v35, 8.507059e+37 }
 0x323   :  { %vm1024_vm11 = vcmp.eq.f32.partialorder %v1023_v42, 8.507059e+37 }
 0x324   :  { %v1979_v8 = vpop.eup %1978 }
 0x325   :  { %v1033_v61 = vadd.f32 1.0, %v1979_v8 }
 0x326   :  { %v1981_v33 = vpop.eup %1980 }
 0x327   :  { %v1983_v39 = vpop.eup %1982  ;;  %v996_v21 = vmul.f32 %v1981_v33, %v994_v18  ;;  %1984 = vrcp.f32 %v1033_v61  ;;  %vm1001_vm4 = vweird.f32 %v1981_v33  ;;  %v1045_v26 = vand.u32 2147483648, %v1033_v61 }
 0x328   :  { %v1015_v40 = vmul.f32 %v1983_v39, %v1013_v60  ;;  %1986 = vtanh.f32 %v989_v30  ;;  %vm1020_vm5 = vweird.f32 %v1983_v39  ;;  %vm1002_vm8 = vmor %vm1000_vm6, %vm1001_vm4  ;;  %vm1039_vm13 = vweird.f32 %v1033_v61 }
 0x329   :  { %v997_v37 = vsub.f32 1.0, %v996_v21  ;;  %vm1021_vm9 = vmor %vm1019_vm7, %vm1020_vm5  ;;  %v1026_v21 = vor.u32 1.1754944e-38, %v1025_v28  ;;  %v1046_v35 = vor.u32 1.1754944e-38, %v1045_v26  ;;  %v3556_v26 = vld [vmem:[#allocation18_spill] sm:$0xff] }
 0x32a   :  { %v1016_v43 = vsub.f32 1.0, %v1015_v40 }
 0x32b   :  { %v998_v46 = vmul.f32 %v1981_v33, %v997_v37 }
 0x32c   :  { %v1017_v13 = vmul.f32 %v1983_v39, %v1016_v43 }
 0x32d   :  { %v1985_v10 = vpop.eup %1984  ;;  %v999_v8 = vadd.f32 %v1981_v33, %v998_v46 }
 0x32e   :  { %v1018_v24 = vadd.f32 %v1983_v39, %v1017_v13  ;;  %v1035_v14 = vmul.f32 %v1985_v10, %v1033_v61  ;;  %v1987_v30 = vpop.eup %1986  ;;  %vm1040_vm12 = vweird.f32 %v1985_v10  ;;  %v3547_v13 = vld [vmem:[#allocation28_spill] sm:$0xff] }
 0x32f   :  { %v1003_v40 = vsel %vm1002_vm8, %v1981_v33, %v999_v8  ;;  %v1043_v33 = vand.u32 2147483647, %v1033_v61  ;;  %vm1041_vm14 = vmor %vm1039_vm13, %vm1040_vm12  ;;  %v3546_v61 = vld [vmem:[#allocation62_spill] sm:$0xff]  ;;  %v3548_v8 = vld [vmem:[#allocation24_spill] sm:$0xff] }
 0x330   :  { %v1008_v25 = vsel %vm1005_vm10, %v1007_v15, %v1003_v40  ;;  %v1022_v37 = vsel %vm1021_vm9, %v1983_v39, %v1018_v24  ;;  %v1036_v31 = vsub.f32 1.0, %v1035_v14  ;;  %v3549_v15 = vld [vmem:[#allocation63_spill] sm:$0xff]  ;;  %v3550_v24 = vld [vmem:[#allocation64_spill] sm:$0xff]  ;;  %v3552_v40 = vld [vmem:[#allocation25_spill] sm:$0xff] }
 0x331   :  { %v1027_v43 = vsel %vm1024_vm11, %v1026_v21, %v1022_v37  ;;  %v1050_v9 = vmul.f32 %v1987_v30, %v1008_v25  ;;  %vm1044_vm15 = vcmp.eq.f32.partialorder %v1043_v33, 8.507059e+37  ;;  %v3545_v25 = vld [vmem:[#allocation61_spill] sm:$0xff]  ;;  %v3551_v21 = vld [vmem:[#allocation27_spill] sm:$0xff]  ;;  %v3554_v37 = vld [vmem:[#allocation66_spill] sm:$0xff] }
 0x332   :  { %v1049_v48 = vmul.f32 %v1027_v43, %v3005_v6  ;;  %v1037_v46 = vmul.f32 %v1985_v10, %v1036_v31  ;;  %v3540_v31 = vld [vmem:[#allocation60_spill] sm:$0xff]  ;;  %v3543_v6 = vld [vmem:[#allocation41_spill] sm:$0xff] }
 0x333   :  { %v3553_v30 = vld [vmem:[#allocation65_spill] sm:$0xff] }
 0x334   :  { %v3147_v18 = vadd.f32 %v1050_v9, %v1049_v48  ;;  %v1038_v60 = vadd.f32 %v1985_v10, %v1037_v46  ;;  %v3541_v9 = vld [vmem:[#allocation35_spill] sm:$0xff]  ;;  %v3555_v43 = vld [vmem:[#allocation29_spill] sm:$0xff] }
 0x335   :  { %v3544_v48 = vld [vmem:[#allocation23_spill] sm:$0xff] }
 0x336   :  { %1988 = vtanh.f32 %v3147_v18  ;;  %v1042_v28 = vsel %vm1041_vm14, %v1985_v10, %v1038_v60  ;;  %v3542_v10 = vld [vmem:[#allocation44_spill] sm:$0xff] }
 0x337   :  { %v1047_v14 = vsel %vm1044_vm15, %v1046_v35, %v1042_v28  ;;  %v3557_v28 = vld [vmem:[#allocation49_spill] sm:$0xff] }
 0x33c   :  { %v1989_v42 = vpop.eup %1988 }
 0x33d   :  { %v3150_v39 = vmul.f32 %v1989_v42, %v1047_v14 }
 0x33f   :  { %3529 = vst [vmem:[#allocation36_spill] sm:$0xff] %v3150_v39  ;;  %1077 = vmatmul.f32.vlgmr.msra.gmra.mxu0 %v3150_v39  ;;  %1097 = vmatmul.f32.vlgmr.msra.gmra.mxu1 %v3150_v39 }
 0x340   :  { %1117 = vmatmul.f32.vlgmr.msra.gmra.mxu2 %v3150_v39  ;;  %1137 = vmatmul.f32.vlgmr.msrb.gmra.mxu3 %v3150_v39 }
 0x341   :  { %1369 = vmatpush.msra.mxu0 %v2794_v32  ;;  %1389 = vmatpush.msra.mxu1 %v3015_v34  ;;  %v3530_v32 = vld [vmem:[#allocation31_spill] sm:$0xff] }
 0x342   :  { %1409 = vmatpush.msra.mxu2 %v3018_v38  ;;  %1429 = vmatpush.msrb.mxu3 %v2907_v57 }
 0x343   :  { %1370 = vmatpush.msra.mxu0 %v2800_v1  ;;  %1390 = vmatpush.msra.mxu1 %v3023_v45  ;;  %v3531_v1 = vld [vmem:[#allocation19_spill] sm:$0xff] }
 0x344   :  { %1410 = vmatpush.msra.mxu2 %v3026_v49  ;;  %1430 = vmatpush.msrb.mxu3 %v2913_v19 }
 0x345   :  { %1371 = vmatpush.msra.mxu0 %v2806_v53  ;;  %1391 = vmatpush.msra.mxu1 %v3031_v50  ;;  %v3532_v53 = vld [vmem:[#allocation58_spill] sm:$0xff] }
 0x346   :  { %1411 = vmatpush.msra.mxu2 %v3034_v52  ;;  %1431 = vmatpush.msrb.mxu3 %v2919_v54 }
 0x347   :  { %1372 = vmatpush.msra.mxu0 %v2812_v55  ;;  %1392 = vmatpush.msra.mxu1 %v3039_v16  ;;  %v3533_v55 = vld [vmem:[#allocation32_spill] sm:$0xff] }
 0x348   :  { %1412 = vmatpush.msra.mxu2 %v3042_v20  ;;  %1432 = vmatpush.msrb.mxu3 %v2925_v56 }
 0x349   :  { %1373 = vmatpush.msra.mxu0 %v2818_v59  ;;  %1393 = vmatpush.msra.mxu1 %v3047_v41  ;;  %v3534_v59 = vld [vmem:[#allocation33_spill] sm:$0xff] }
 0x34a   :  { %1413 = vmatpush.msra.mxu2 %v3050_v4  ;;  %1433 = vmatpush.msrb.mxu3 %v2931_v58 }
 0x34b   :  { %1374 = vmatpush.msra.mxu0 %v2824_v2  ;;  %1394 = vmatpush.msra.mxu1 %v3055_v44  ;;  %v3535_v2 = vld [vmem:[#allocation40_spill] sm:$0xff] }
 0x34c   :  { %1414 = vmatpush.msra.mxu2 %v3058_v29  ;;  %1434 = vmatpush.msrb.mxu3 %v2937_v63 }
 0x34d   :  { %1375 = vmatpush.msra.mxu0 %v2830_v7  ;;  %1395 = vmatpush.msra.mxu1 %v3063_v36  ;;  %v3536_v7 = vld [vmem:[#allocation59_spill] sm:$0xff] }
 0x34e   :  { %1415 = vmatpush.msra.mxu2 %v3066_v47  ;;  %1435 = vmatpush.msrb.mxu3 %v2943_v0 }
 0x34f   :  { %1376 = vmatpush.msra.mxu0 %v2836_v12  ;;  %1396 = vmatpush.msra.mxu1 %v3071_v62  ;;  %v3537_v12 = vld [vmem:[#allocation22_spill] sm:$0xff] }
 0x350   :  { %1416 = vmatpush.msra.mxu2 %v3074_v17  ;;  %1436 = vmatpush.msrb.mxu3 %v2949_v3 }
 0x351   :  { %1377 = vmatpush.msra.mxu0 %v2842_v22  ;;  %1397 = vmatpush.msra.mxu1 %v3079_v11  ;;  %v3538_v22 = vld [vmem:[#allocation43_spill] sm:$0xff] }
 0x352   :  { %1417 = vmatpush.msra.mxu2 %v3082_v51  ;;  %1437 = vmatpush.msrb.mxu3 %v2955_v5 }
 0x353   :  { %1378 = vmatpush.msra.mxu0 %v2848_v27  ;;  %1398 = vmatpush.msra.mxu1 %v3087_v23  ;;  %v3539_v27 = vld [vmem:[#allocation21_spill] sm:$0xff] }
 0x354   :  { %1418 = vmatpush.msra.mxu2 %v3530_v32  ;;  %1438 = vmatpush.msrb.mxu3 %v3531_v1 }
 0x355   :  { %1379 = vmatpush.msra.mxu0 %v3532_v53  ;;  %1399 = vmatpush.msra.mxu1 %v3533_v55 }
 0x356   :  { %1419 = vmatpush.msra.mxu2 %v3534_v59  ;;  %1439 = vmatpush.msrb.mxu3 %v3535_v2 }
 0x357   :  { %1380 = vmatpush.msra.mxu0 %v3536_v7  ;;  %1400 = vmatpush.msra.mxu1 %v3537_v12  ;;  %v3558_v7 = vld [vmem:[#allocation39_spill] sm:$0xff] }
 0x358   :  { %1420 = vmatpush.msra.mxu2 %v3538_v22  ;;  %1440 = vmatpush.msrb.mxu3 %v3539_v27 }
 0x359   :  { %1381 = vmatpush.msra.mxu0 %v3540_v31  ;;  %1401 = vmatpush.msra.mxu1 %v3541_v9 }
 0x35a   :  { %1421 = vmatpush.msra.mxu2 %v3542_v10  ;;  %1441 = vmatpush.msrb.mxu3 %v3543_v6 }
 0x35b   :  { %1382 = vmatpush.msra.mxu0 %v3544_v48  ;;  %1402 = vmatpush.msra.mxu1 %v3545_v25 }
 0x35c   :  { %1422 = vmatpush.msra.mxu2 %v3546_v61  ;;  %1442 = vmatpush.msrb.mxu3 %v3547_v13 }
 0x35d   :  { %1383 = vmatpush.msra.mxu0 %v3548_v8  ;;  %1403 = vmatpush.msra.mxu1 %v3549_v15 }
 0x35e   :  { %1423 = vmatpush.msra.mxu2 %v3550_v24  ;;  %1443 = vmatpush.msrb.mxu3 %v3551_v21 }
 0x35f   :  { %1384 = vmatpush.msra.mxu0 %v3552_v40  ;;  %1404 = vmatpush.msra.mxu1 %v3553_v30 }
 0x360   :  { %1424 = vmatpush.msra.mxu2 %v3554_v37  ;;  %1444 = vmatpush.msrb.mxu3 %v3555_v43 }
 0x3bc   :  { %v1078_v46 = vpop.f32.mrf.mxu0  ;;  %v1098_v60 = vpop.f32.mrf.mxu1 }
 0x3bd   :  { %v1141_v33 = vadd.f32 %v1078_v46, %v3556_v26  ;;  %v1142_v35 = vadd.f32 %v1098_v60, %v3557_v28  ;;  %v3559_v60 = vld [vmem:[#allocation50_spill] sm:$0xff] }
 0x3bf   :  { %v1885_v42 = vmul.f32 -1.442695, %v1141_v33  ;;  %v1886_v14 = vmul.f32 -1.442695, %v1142_v35 }
 0x3c1   :  { %1990 = vpow2.f32 %v1885_v42 }
 0x3c2   :  { %1992 = vpow2.f32 %v1886_v14 }
 0x3c3   :  { %v1138_v53 = vpop.f32.mrf.mxu3  ;;  %v1118_v43 = vpop.f32.mrf.mxu2 }
 0x3c4   :  { %v1144_v31 = vadd.f32 %v1138_v53, %v3558_v7  ;;  %v1143_v33 = vadd.f32 %v1118_v43, %v3559_v60 }
 0x3c6   :  { %v1887_v48 = vmul.f32 -1.442695, %v1144_v31 }
 0x3c7   :  { %v1991_v8 = vpop.eup %1990 }
 0x3c8   :  { %v1993_v40 = vpop.eup %1992  ;;  %v1148_v39 = vadd.f32 1.0, %v1991_v8  ;;  %1994 = vpow2.f32 %v1887_v48 }
 0x3c9   :  { %v1167_v37 = vadd.f32 1.0, %v1993_v40 }
 0x3ca   :  { %1996 = vrcp.f32 %v1148_v39  ;;  %v1160_v7 = vand.u32 2147483648, %v1148_v39  ;;  %v1158_v48 = vand.u32 2147483647, %v1148_v39  ;;  %vm1154_vm2 = vweird.f32 %v1148_v39 }
 0x3cb   :  { %1998 = vrcp.f32 %v1167_v37  ;;  %v1179_v31 = vand.u32 2147483648, %v1167_v37  ;;  %v1177_v21 = vand.u32 2147483647, %v1167_v37  ;;  %vm1173_vm3 = vweird.f32 %v1167_v37 }
 0x3cc   :  { %v1161_v43 = vor.u32 1.1754944e-38, %v1160_v7  ;;  %vm1159_vm6 = vcmp.eq.f32.partialorder %v1158_v48, 8.507059e+37 }
 0x3cd   :  { %vm1178_vm7 = vcmp.eq.f32.partialorder %v1177_v21, 8.507059e+37 }
 0x3ce   :  { %v1995_v30 = vpop.eup %1994 }
 0x3cf   :  { %v1187_v46 = vadd.f32 1.0, %v1995_v30 }
 0x3d0   :  { %v1997_v26 = vpop.eup %1996 }
 0x3d1   :  { %v1999_v28 = vpop.eup %1998  ;;  %v1150_v35 = vmul.f32 %v1997_v26, %v1148_v39  ;;  %2000 = vrcp.f32 %v1187_v46  ;;  %vm1155_vm0 = vweird.f32 %v1997_v26  ;;  %v1199_v7 = vand.u32 2147483648, %v1187_v46 }
 0x3d2   :  { %v1169_v42 = vmul.f32 %v1999_v28, %v1167_v37  ;;  %2002 = vtanh.f32 %v1143_v33  ;;  %vm1174_vm1 = vweird.f32 %v1999_v28  ;;  %vm1156_vm4 = vmor %vm1154_vm2, %vm1155_vm0  ;;  %vm1193_vm9 = vweird.f32 %v1187_v46 }
 0x3d3   :  { %v1151_v14 = vsub.f32 1.0, %v1150_v35  ;;  %vm1175_vm5 = vmor %vm1173_vm3, %vm1174_vm1  ;;  %v1180_v35 = vor.u32 1.1754944e-38, %v1179_v31  ;;  %v1200_v48 = vor.u32 1.1754944e-38, %v1199_v7 }
 0x3d4   :  { %v1170_v53 = vsub.f32 1.0, %v1169_v42 }
 0x3d5   :  { %v1152_v8 = vmul.f32 %v1997_v26, %v1151_v14 }
 0x3d6   :  { %v1171_v40 = vmul.f32 %v1999_v28, %v1170_v53 }
 0x3d7   :  { %v2001_v24 = vpop.eup %2000  ;;  %v1153_v30 = vadd.f32 %v1997_v26, %v1152_v8 }
 0x3d8   :  { %v1172_v60 = vadd.f32 %v1999_v28, %v1171_v40  ;;  %v1189_v15 = vmul.f32 %v2001_v24, %v1187_v46  ;;  %v2003_v33 = vpop.eup %2002  ;;  %vm1194_vm8 = vweird.f32 %v2001_v24 }
 0x3d9   :  { %v1157_v42 = vsel %vm1156_vm4, %v1997_v26, %v1153_v30  ;;  %v1197_v26 = vand.u32 2147483647, %v1187_v46  ;;  %vm1195_vm10 = vmor %vm1193_vm9, %vm1194_vm8  ;;  %v3573_v30 = vld [vmem:[#allocation52_spill] sm:$0xff] }
 0x3da   :  { %v1162_v13 = vsel %vm1159_vm6, %v1161_v43, %v1157_v42  ;;  %v1176_v14 = vsel %vm1175_vm5, %v1999_v28, %v1172_v60  ;;  %v1190_v61 = vsub.f32 1.0, %v1189_v15 }
 0x3db   :  { %v1181_v53 = vsel %vm1178_vm7, %v1180_v35, %v1176_v14  ;;  %v1204_v25 = vmul.f32 %v2003_v33, %v1162_v13  ;;  %vm1198_vm11 = vcmp.eq.f32.partialorder %v1197_v26, 8.507059e+37 }
 0x3dc   :  { %v1203_v6 = vmul.f32 %v1181_v53, %v3147_v18  ;;  %v1191_v8 = vmul.f32 %v2001_v24, %v1190_v61  ;;  %v2124_v18 = vld [vmem:[#allocation9 + $0x1e0] sm:$0xff] }
 0x3de   :  { %v3225_v39 = vadd.f32 %v1204_v25, %v1203_v6  ;;  %v1192_v37 = vadd.f32 %v2001_v24, %v1191_v8  ;;  %v2125_v6 = vld [vmem:[#allocation9 + $0x1c0] sm:$0xff] }
 0x3df   :  { %v2126_v25 = vld [vmem:[#allocation9 + $0x1a0] sm:$0xff] }
 0x3e0   :  { %2004 = vtanh.f32 %v3225_v39  ;;  %v1196_v31 = vsel %vm1195_vm10, %v2001_v24, %v1192_v37 }
 0x3e1   :  { %v1201_v15 = vsel %vm1198_vm11, %v1200_v48, %v1196_v31 }
 0x3e6   :  { %v2005_v21 = vpop.eup %2004 }
 0x3e7   :  { %v3228_v28 = vmul.f32 %v2005_v21, %v1201_v15 }
 0x3e9   :  { %1231 = vmatmul.f32.vlgmr.msrb.gmra.mxu0 %v3228_v28  ;;  %1251 = vmatmul.f32.vlgmr.msrb.gmra.mxu1 %v3228_v28 }
 0x3ea   :  { %1271 = vmatmul.f32.vlgmr.msrb.gmra.mxu2 %v3228_v28  ;;  %1291 = vmatmul.f32.vlgmr.msra.gmra.mxu3 %v3228_v28 }
 0x3eb   :  { %1523 = vmatpush.msrb.mxu0 %v2124_v18  ;;  %1543 = vmatpush.msrb.mxu1 %v3015_v34  ;;  %v2127_v34 = vld [vmem:[#allocation9 + $0x180] sm:$0xff] }
 0x3ec   :  { %1563 = vmatpush.msrb.mxu2 %v3018_v38  ;;  %1583 = vmatpush.msra.mxu3 %v2907_v57  ;;  %v2128_v57 = vld [vmem:[#allocation9 + $0x160] sm:$0xff] }
 0x3ed   :  { %1524 = vmatpush.msrb.mxu0 %v2125_v6  ;;  %1544 = vmatpush.msrb.mxu1 %v3023_v45  ;;  %v3560_v38 = vld [vmem:[#allocation41_spill] sm:$0xff] }
 0x3ee   :  { %1564 = vmatpush.msrb.mxu2 %v3026_v49  ;;  %1584 = vmatpush.msra.mxu3 %v2913_v19  ;;  %v2129_v19 = vld [vmem:[#allocation9 + $0x140] sm:$0xff] }
 0x3ef   :  { %1525 = vmatpush.msrb.mxu0 %v2126_v25  ;;  %1545 = vmatpush.msrb.mxu1 %v3031_v50  ;;  %v2137_v45 = vld [vmem:[#allocation9 + $0x40] sm:$0xff]  ;;  %v3562_v50 = vld [vmem:[#allocation62_spill] sm:$0xff] }
 0x3f0   :  { %1565 = vmatpush.msrb.mxu2 %v3034_v52  ;;  %1585 = vmatpush.msra.mxu3 %v2919_v54  ;;  %v2130_v54 = vld [vmem:[#allocation9 + $0x120] sm:$0xff] }
 0x3f1   :  { %1526 = vmatpush.msrb.mxu0 %v2127_v34  ;;  %1546 = vmatpush.msrb.mxu1 %v3039_v16  ;;  %v3561_v49 = vld [vmem:[#allocation61_spill] sm:$0xff]  ;;  %v3563_v52 = vld [vmem:[#allocation28_spill] sm:$0xff] }
 0x3f2   :  { %1566 = vmatpush.msrb.mxu2 %v3042_v20  ;;  %1586 = vmatpush.msra.mxu3 %v2925_v56  ;;  %v2131_v56 = vld [vmem:[#allocation9 + $0x100] sm:$0xff]  ;;  %v3564_v20 = vld [vmem:[#allocation63_spill] sm:$0xff] }
 0x3f3   :  { %1527 = vmatpush.msrb.mxu0 %v2128_v57  ;;  %1547 = vmatpush.msrb.mxu1 %v3047_v41  ;;  %v2138_v16 = vld [vmem:[#allocation9 + $0x20] sm:$0xff] }
 0x3f4   :  { %1567 = vmatpush.msrb.mxu2 %v3050_v4  ;;  %1587 = vmatpush.msra.mxu3 %v2931_v58  ;;  %v2132_v58 = vld [vmem:[#allocation9 + $0xe0] sm:$0xff]  ;;  %v3566_v4 = vld [vmem:[#allocation27_spill] sm:$0xff] }
 0x3f5   :  { %1528 = vmatpush.msrb.mxu0 %v2129_v19  ;;  %1548 = vmatpush.msrb.mxu1 %v3055_v44  ;;  %v3565_v41 = vld [vmem:[#allocation64_spill] sm:$0xff] }
 0x3f6   :  { %1568 = vmatpush.msrb.mxu2 %v3058_v29  ;;  %1588 = vmatpush.msra.mxu3 %v2937_v63  ;;  %v2133_v63 = vld [vmem:[#allocation9 + $0xc0] sm:$0xff] }
 0x3f7   :  { %1529 = vmatpush.msrb.mxu0 %v2130_v54  ;;  %1549 = vmatpush.msrb.mxu1 %v3063_v36  ;;  %v2139_v44 = vld [vmem:[#allocation9] sm:$0xff]  ;;  %v3568_v36 = vld [vmem:[#allocation66_spill] sm:$0xff] }
 0x3f8   :  { %1569 = vmatpush.msrb.mxu2 %v3066_v47  ;;  %1589 = vmatpush.msra.mxu3 %v2943_v0  ;;  %v2134_v0 = vld [vmem:[#allocation9 + $0xa0] sm:$0xff] }
 0x3f9   :  { %1530 = vmatpush.msrb.mxu0 %v2131_v56  ;;  %1550 = vmatpush.msrb.mxu1 %v3071_v62  ;;  %v3567_v29 = vld [vmem:[#allocation65_spill] sm:$0xff] }
 0x3fa   :  { %1570 = vmatpush.msrb.mxu2 %v3074_v17  ;;  %1590 = vmatpush.msra.mxu3 %v2949_v3  ;;  %v2135_v3 = vld [vmem:[#allocation9 + $0x80] sm:$0xff] }
 0x3fb   :  { %1531 = vmatpush.msrb.mxu0 %v2132_v58  ;;  %1551 = vmatpush.msrb.mxu1 %v3079_v11  ;;  %v3569_v47 = vld [vmem:[#allocation29_spill] sm:$0xff]  ;;  %v3570_v11 = vld [vmem:[#allocation20_spill] sm:$0xff] }
 0x3fc   :  { %1571 = vmatpush.msrb.mxu2 %v3082_v51  ;;  %1591 = vmatpush.msra.mxu3 %v2955_v5  ;;  %v2136_v5 = vld [vmem:[#allocation9 + $0x60] sm:$0xff] }
 0x3fd   :  { %1532 = vmatpush.msrb.mxu0 %v2133_v63  ;;  %1552 = vmatpush.msrb.mxu1 %v3087_v23  ;;  %v3571_v23 = vld [vmem:[#allocation51_spill] sm:$0xff] }
 0x3fe   :  { %1572 = vmatpush.msrb.mxu2 %v3530_v32  ;;  %1592 = vmatpush.msra.mxu3 %v3531_v1 }
 0x3ff   :  { %1533 = vmatpush.msrb.mxu0 %v2134_v0  ;;  %1553 = vmatpush.msrb.mxu1 %v3533_v55 }
 0x400   :  { %1573 = vmatpush.msrb.mxu2 %v3534_v59  ;;  %1593 = vmatpush.msra.mxu3 %v3535_v2  ;;  %v3572_v2 = vld [vmem:[#allocation42_spill] sm:$0xff] }
 0x401   :  { %1534 = vmatpush.msrb.mxu0 %v2135_v3  ;;  %1554 = vmatpush.msrb.mxu1 %v3537_v12 }
 0x402   :  { %1574 = vmatpush.msrb.mxu2 %v3538_v22  ;;  %1594 = vmatpush.msra.mxu3 %v3539_v27 }
 0x403   :  { %1535 = vmatpush.msrb.mxu0 %v2136_v5  ;;  %1555 = vmatpush.msrb.mxu1 %v3541_v9 }
 0x404   :  { %1575 = vmatpush.msrb.mxu2 %v3542_v10  ;;  %1595 = vmatpush.msra.mxu3 %v3560_v38 }
 0x405   :  { %1536 = vmatpush.msrb.mxu0 %v2137_v45  ;;  %1556 = vmatpush.msrb.mxu1 %v3561_v49 }
 0x406   :  { %1576 = vmatpush.msrb.mxu2 %v3562_v50  ;;  %1596 = vmatpush.msra.mxu3 %v3563_v52 }
 0x407   :  { %1537 = vmatpush.msrb.mxu0 %v2138_v16  ;;  %1557 = vmatpush.msrb.mxu1 %v3564_v20 }
 0x408   :  { %1577 = vmatpush.msrb.mxu2 %v3565_v41  ;;  %1597 = vmatpush.msra.mxu3 %v3566_v4  ;;  %v1694_v4 = vld [vmem:[#allocation12 + $0x70] sm:$0xff] }
 0x409   :  { %1538 = vmatpush.msrb.mxu0 %v2139_v44  ;;  %1558 = vmatpush.msrb.mxu1 %v3567_v29  ;;  %v1693_v44 = vld [vmem:[#allocation12 + $0x68] sm:$0xff]  ;;  %v1692_v29 = vld [vmem:[#allocation12 + $0x60] sm:$0xff] }
 0x40a   :  { %1578 = vmatpush.msrb.mxu2 %v3568_v36  ;;  %1598 = vmatpush.msra.mxu3 %v3569_v47  ;;  %v1691_v36 = vld [vmem:[#allocation12 + $0x58] sm:$0xff] }
 0x466   :  { %v1232_v62 = vpop.f32.mrf.mxu0  ;;  %v1252_v17 = vpop.f32.mrf.mxu1 }
 0x467   :  { %v1295_v51 = vadd.f32 %v1232_v62, %v3570_v11  ;;  %v1296_v32 = vadd.f32 %v1252_v17, %v3571_v23  ;;  %v1690_v17 = vld [vmem:[#allocation12 + $0x50] sm:$0xff]  ;;  %v3574_v11 = vld [vmem:[#allocation34_spill] sm:$0xff]  ;;  %v3575_v23 = vld [vmem:[#allocation53_spill] sm:$0xff] }
 0x469   :  { %v1888_v1 = vmul.f32 -1.442695, %v1295_v51  ;;  %v1889_v55 = vmul.f32 -1.442695, %v1296_v32 }
 0x46b   :  { %2006 = vpow2.f32 %v1888_v1  ;;  %v1689_v1 = vld [vmem:[#allocation12 + $0x48] sm:$0xff] }
 0x46c   :  { %2008 = vpow2.f32 %v1889_v55 }
 0x46d   :  { %v1292_v59 = vpop.f32.mrf.mxu3  ;;  %v1272_v13 = vpop.f32.mrf.mxu2 }
 0x46e   :  { %v1298_v12 = vadd.f32 %v1292_v59, %v3572_v2  ;;  %v1297_v43 = vadd.f32 %v1272_v13, %v3573_v30  ;;  %v1688_v2 = vld [vmem:[#allocation12 + $0x40] sm:$0xff] }
 0x470   :  { %v1890_v22 = vmul.f32 -1.442695, %v1298_v12  ;;  %v1687_v12 = vld [vmem:[#allocation12 + $0x38] sm:$0xff] }
 0x471   :  { %v2007_v27 = vpop.eup %2006 }
 0x472   :  { %v2009_v9 = vpop.eup %2008  ;;  %v1302_v10 = vadd.f32 1.0, %v2007_v27  ;;  %2010 = vpow2.f32 %v1890_v22  ;;  %v1686_v22 = vld [vmem:[#allocation12 + $0x30] sm:$0xff] }
 0x473   :  { %v1321_v61 = vadd.f32 1.0, %v2009_v9  ;;  %v3576_v9 = vld [vmem:[#allocation45_spill] sm:$0xff] }
 0x474   :  { %2012 = vrcp.f32 %v1302_v10  ;;  %v1314_v53 = vand.u32 2147483648, %v1302_v10  ;;  %v1312_v7 = vand.u32 2147483647, %v1302_v10  ;;  %vm1308_vm14 = vweird.f32 %v1302_v10 }
 0x475   :  { %2014 = vrcp.f32 %v1321_v61  ;;  %v1333_v8 = vand.u32 2147483648, %v1321_v61  ;;  %v1331_v31 = vand.u32 2147483647, %v1321_v61  ;;  %vm1327_vm15 = vweird.f32 %v1321_v61 }
 0x476   :  { %v1315_v15 = vor.u32 1.1754944e-38, %v1314_v53  ;;  %vm1313_vm2 = vcmp.eq.f32.partialorder %v1312_v7, 8.507059e+37  ;;  %v1680_v53 = vld [vmem:[#allocation12] sm:$0xff]  ;;  %v3577_v7 = vld [vmem:[#allocation54_spill] sm:$0xff] }
 0x477   :  { %v1334_v25 = vor.u32 1.1754944e-38, %v1333_v8  ;;  %vm1332_vm3 = vcmp.eq.f32.partialorder %v1331_v31, 8.507059e+37 }
 0x478   :  { %v2011_v24 = vpop.eup %2010 }
 0x479   :  { %v1341_v46 = vadd.f32 1.0, %v2011_v24  ;;  %v1684_v24 = vld [vmem:[#allocation12 + $0x20] sm:$0xff] }
 0x47a   :  { %v2013_v40 = vpop.eup %2012 }
 0x47b   :  { %v2015_v60 = vpop.eup %2014  ;;  %v1304_v35 = vmul.f32 %v2013_v40, %v1302_v10  ;;  %2016 = vrcp.f32 %v1341_v46  ;;  %vm1309_vm12 = vweird.f32 %v2013_v40  ;;  %v1353_v45 = vand.u32 2147483648, %v1341_v46 }
 0x47c   :  { %v1323_v42 = vmul.f32 %v2015_v60, %v1321_v61  ;;  %2018 = vtanh.f32 %v1297_v43  ;;  %vm1328_vm13 = vweird.f32 %v2015_v60  ;;  %vm1310_vm0 = vmor %vm1308_vm14, %vm1309_vm12  ;;  %vm1347_vm5 = vweird.f32 %v1341_v46  ;;  %v1685_v61 = vld [vmem:[#allocation12 + $0x28] sm:$0xff] }
 0x47d   :  { %v1305_v33 = vsub.f32 1.0, %v1304_v35  ;;  %vm1329_vm1 = vmor %vm1327_vm15, %vm1328_vm13  ;;  %v1351_v49 = vand.u32 2147483647, %v1341_v46  ;;  %v1354_v52 = vor.u32 1.1754944e-38, %v1353_v45  ;;  %v1682_v35 = vld [vmem:[#allocation12 + $0x10] sm:$0xff] }
 0x47e   :  { %v1324_v14 = vsub.f32 1.0, %v1323_v42  ;;  %v1681_v42 = vld [vmem:[#allocation12 + $0x8] sm:$0xff] }
 0x47f   :  { %v1306_v37 = vmul.f32 %v2013_v40, %v1305_v33  ;;  %vm1352_vm7 = vcmp.eq.f32.partialorder %v1351_v49, 8.507059e+37 }
 0x480   :  { %v1325_v26 = vmul.f32 %v2015_v60, %v1324_v14 }
 0x481   :  { %v2017_v48 = vpop.eup %2016  ;;  %v1307_v21 = vadd.f32 %v2013_v40, %v1306_v37 }
 0x482   :  { %v1326_v18 = vadd.f32 %v2015_v60, %v1325_v26  ;;  %v1343_v6 = vmul.f32 %v2017_v48, %v1341_v46  ;;  %v2019_v57 = vpop.eup %2018  ;;  %vm1348_vm4 = vweird.f32 %v2017_v48 }
 0x483   :  { %v1311_v34 = vsel %vm1310_vm0, %v2013_v40, %v1307_v21  ;;  %vm1349_vm6 = vmor %vm1347_vm5, %vm1348_vm4 }
 0x484   :  { %v1316_v19 = vsel %vm1313_vm2, %v1315_v15, %v1311_v34  ;;  %v1330_v54 = vsel %vm1329_vm1, %v2015_v60, %v1326_v18  ;;  %v1344_v56 = vsub.f32 1.0, %v1343_v6  ;;  %v1683_v60 = vld [vmem:[#allocation12 + $0x18] sm:$0xff] }
 0x485   :  { %v1335_v58 = vsel %vm1332_vm3, %v1334_v25, %v1330_v54  ;;  %v1358_v63 = vmul.f32 %v2019_v57, %v1316_v19 }
 0x486   :  { %v1357_v0 = vmul.f32 %v1335_v58, %v3225_v39  ;;  %v1345_v3 = vmul.f32 %v2017_v48, %v1344_v56  ;;  %v1695_v39 = vld [vmem:[#allocation12 + $0x78] sm:$0xff] }
 0x488   :  { %v3287_v5 = vadd.f32 %v1358_v63, %v1357_v0  ;;  %v1346_v38 = vadd.f32 %v2017_v48, %v1345_v3 }
 0x48a   :  { %2020 = vtanh.f32 %v3287_v5  ;;  %v1350_v50 = vsel %vm1349_vm6, %v2017_v48, %v1346_v38 }
 0x48b   :  { %v1355_v20 = vsel %vm1352_vm7, %v1354_v52, %v1350_v50 }
 0x490   :  { %v2021_v16 = vpop.eup %2020 }
 0x491   :  { %v3290_v41 = vmul.f32 %v2021_v16, %v1355_v20 }
 0x493   :  { %1385 = vmatmul.f32.vlgmr.msra.gmra.mxu0 %v3290_v41  ;;  %1405 = vmatmul.f32.vlgmr.msra.gmra.mxu1 %v3290_v41 }
 0x494   :  { %1425 = vmatmul.f32.vlgmr.msra.gmra.mxu2 %v3290_v41  ;;  %1445 = vmatmul.f32.vlgmr.msrb.gmra.mxu3 %v3290_v41 }
 0x495   :  { %1700 = vmatpush.msra.mxu0 %v1695_v39 }
 0x497   :  { %1701 = vmatpush.msra.mxu0 %v1694_v4 }
 0x499   :  { %1702 = vmatpush.msra.mxu0 %v1693_v44 }
 0x49b   :  { %1703 = vmatpush.msra.mxu0 %v1692_v29 }
 0x49d   :  { %1704 = vmatpush.msra.mxu0 %v1691_v36 }
 0x49f   :  { %1705 = vmatpush.msra.mxu0 %v1690_v17 }
 0x4a1   :  { %1706 = vmatpush.msra.mxu0 %v1689_v1  ;;  %v3579_v1 = vld [vmem:[#allocation26_spill] sm:$0xff] }
 0x4a3   :  { %1707 = vmatpush.msra.mxu0 %v1688_v2 }
 0x4a5   :  { %1708 = vmatpush.msra.mxu0 %v1687_v12 }
 0x4a7   :  { %1709 = vmatpush.msra.mxu0 %v1686_v22  ;;  %v3582_v22 = vld [vmem:[#allocation37_spill] sm:$0xff] }
 0x4a9   :  { %1710 = vmatpush.msra.mxu0 %v1685_v61 }
 0x4ab   :  { %1711 = vmatpush.msra.mxu0 %v1684_v24 }
 0x4ad   :  { %1712 = vmatpush.msra.mxu0 %v1683_v60 }
 0x4af   :  { %1713 = vmatpush.msra.mxu0 %v1682_v35 }
 0x4b1   :  { %1714 = vmatpush.msra.mxu0 %v1681_v42 }
 0x4b3   :  { %1715 = vmatpush.msra.mxu0 %v1680_v53  ;;  %v3585_v53 = vld [vmem:[#allocation56_spill] sm:$0xff] }
 0x510   :  { %v1386_v47 = vpop.f32.mrf.mxu0  ;;  %v1406_v62 = vpop.f32.mrf.mxu1 }
 0x511   :  { %v1449_v51 = vadd.f32 %v1386_v47, %v3574_v11  ;;  %v1450_v32 = vadd.f32 %v1406_v62, %v3575_v23 }
 0x513   :  { %v1891_v55 = vmul.f32 -1.442695, %v1449_v51  ;;  %v1892_v59 = vmul.f32 -1.442695, %v1450_v32 }
 0x515   :  { %2022 = vpow2.f32 %v1891_v55  ;;  %v3580_v55 = vld [vmem:[#allocation30_spill] sm:$0xff] }
 0x516   :  { %2024 = vpow2.f32 %v1892_v59  ;;  %v3581_v59 = vld [vmem:[#allocation36_spill] sm:$0xff] }
 0x517   :  { %v1446_v27 = vpop.f32.mrf.mxu3  ;;  %v1426_v33 = vpop.f32.mrf.mxu2 }
 0x518   :  { %v1452_v10 = vadd.f32 %v1446_v27, %v3576_v9  ;;  %v1451_v26 = vadd.f32 %v1426_v33, %v3577_v7  ;;  %v3583_v9 = vld [vmem:[#allocation55_spill] sm:$0xff] }
 0x51a   :  { %v1893_v13 = vmul.f32 -1.442695, %v1452_v10 }
 0x51b   :  { %v2023_v46 = vpop.eup %2022 }
 0x51c   :  { %v2025_v40 = vpop.eup %2024  ;;  %v1456_v30 = vadd.f32 1.0, %v2023_v46  ;;  %2026 = vpow2.f32 %v1893_v13  ;;  %v3584_v46 = vld [vmem:[#allocation48_spill] sm:$0xff] }
 0x51d   :  { %v1475_v43 = vadd.f32 1.0, %v2025_v40 }
 0x51e   :  { %2028 = vrcp.f32 %v1456_v30  ;;  %v1468_v6 = vand.u32 2147483648, %v1456_v30  ;;  %v1466_v57 = vand.u32 2147483647, %v1456_v30  ;;  %vm1462_vm10 = vweird.f32 %v1456_v30 }
 0x51f   :  { %2030 = vrcp.f32 %v1475_v43  ;;  %v1487_v25 = vand.u32 2147483648, %v1475_v43  ;;  %v1485_v54 = vand.u32 2147483647, %v1475_v43  ;;  %vm1481_vm11 = vweird.f32 %v1475_v43 }
 0x520   :  { %v1469_v63 = vor.u32 1.1754944e-38, %v1468_v6  ;;  %vm1467_vm14 = vcmp.eq.f32.partialorder %v1466_v57, 8.507059e+37 }
 0x521   :  { %v1488_v38 = vor.u32 1.1754944e-38, %v1487_v25  ;;  %vm1486_vm15 = vcmp.eq.f32.partialorder %v1485_v54, 8.507059e+37 }
 0x522   :  { %v2027_v14 = vpop.eup %2026 }
 0x523   :  { %v1495_v8 = vadd.f32 1.0, %v2027_v14 }
 0x524   :  { %v2029_v37 = vpop.eup %2028 }
 0x525   :  { %v2031_v31 = vpop.eup %2030  ;;  %v1458_v48 = vmul.f32 %v2029_v37, %v1456_v30  ;;  %2032 = vrcp.f32 %v1495_v8  ;;  %vm1463_vm8 = vweird.f32 %v2029_v37  ;;  %v1507_v47 = vand.u32 2147483648, %v1495_v8 }
 0x526   :  { %v1477_v21 = vmul.f32 %v2031_v31, %v1475_v43  ;;  %2034 = vtanh.f32 %v1451_v26  ;;  %vm1482_vm9 = vweird.f32 %v2031_v31  ;;  %vm1464_vm12 = vmor %vm1462_vm10, %vm1463_vm8  ;;  %vm1501_vm1 = vweird.f32 %v1495_v8 }
 0x527   :  { %v1459_v15 = vsub.f32 1.0, %v1458_v48  ;;  %vm1483_vm13 = vmor %vm1481_vm11, %vm1482_vm9  ;;  %v1505_v62 = vand.u32 2147483647, %v1495_v8  ;;  %v1508_v11 = vor.u32 1.1754944e-38, %v1507_v47 }
 0x528   :  { %v1478_v18 = vsub.f32 1.0, %v1477_v21 }
 0x529   :  { %v1460_v34 = vmul.f32 %v2029_v37, %v1459_v15  ;;  %vm1506_vm3 = vcmp.eq.f32.partialorder %v1505_v62, 8.507059e+37 }
 0x52a   :  { %v1479_v19 = vmul.f32 %v2031_v31, %v1478_v18 }
 0x52b   :  { %v2033_v56 = vpop.eup %2032  ;;  %v1461_v58 = vadd.f32 %v2029_v37, %v1460_v34 }
 0x52c   :  { %v1480_v0 = vadd.f32 %v2031_v31, %v1479_v19  ;;  %v1497_v3 = vmul.f32 %v2033_v56, %v1495_v8  ;;  %v2035_v49 = vpop.eup %2034  ;;  %vm1502_vm0 = vweird.f32 %v2033_v56 }
 0x52d   :  { %v1465_v45 = vsel %vm1464_vm12, %v2029_v37, %v1461_v58  ;;  %vm1503_vm2 = vmor %vm1501_vm1, %vm1502_vm0 }
 0x52e   :  { %v1470_v50 = vsel %vm1467_vm14, %v1469_v63, %v1465_v45  ;;  %v1484_v52 = vsel %vm1483_vm13, %v2031_v31, %v1480_v0  ;;  %v1498_v16 = vsub.f32 1.0, %v1497_v3 }
 0x52f   :  { %v1489_v20 = vsel %vm1486_vm15, %v1488_v38, %v1484_v52  ;;  %v1512_v39 = vmul.f32 %v2035_v49, %v1470_v50 }
 0x530   :  { %v1511_v4 = vmul.f32 %v1489_v20, %v3287_v5  ;;  %v1499_v44 = vmul.f32 %v2033_v56, %v1498_v16  ;;  %v3578_v5 = vld [vmem:[#allocation57_spill] sm:$0xff] }
 0x532   :  { %v3301_v29 = vadd.f32 %v1512_v39, %v1511_v4  ;;  %v1500_v36 = vadd.f32 %v2033_v56, %v1499_v44 }
 0x534   :  { %2036 = vtanh.f32 %v3301_v29  ;;  %v1504_v17 = vsel %vm1503_vm2, %v2033_v56, %v1500_v36  ;;  %vm1826_vm2 = vcmask 1041409  }
 0x535   :  { %v1509_v23 = vsel %vm1506_vm3, %v1508_v11, %v1504_v17  ;;  %vm1828_vm3 = vcmask 1042434  }
 0x53a   :  { %v2037_v51 = vpop.eup %2036 }
 0x53b   :  { %v1515_v32 = vmul.f32 %v2037_v51, %v1509_v23 }
 0x53d   :  { %1539 = vmatmul.f32.vlgmr.msrb.gmra.mxu0 %v1515_v32  ;;  %1559 = vmatmul.f32.vlgmr.msrb.gmra.mxu1 %v1515_v32 }
 0x53e   :  { %1579 = vmatmul.f32.vlgmr.msrb.gmra.mxu2 %v1515_v32  ;;  %1599 = vmatmul.f32.vlgmr.msra.gmra.mxu3 %v1515_v32 }
 0x545   :  { %1716 = vmatmul.f32.vlgmr.msra.gmra.mxu0 %v3578_v5 }
 0x54d   :  { %1719 = vmatmul.f32.gmra.mxu0 %v3579_v1 }
 0x555   :  { %1722 = vmatmul.f32.gmra.mxu0 %v3580_v55 }
 0x55d   :  { %1725 = vmatmul.f32.gmra.mxu0 %v3581_v59  ;;  %v1741_v59 = vlaneseq }
 0x565   :  { %1728 = vmatmul.f32.gmra.mxu0 %v3228_v28 }
 0x56d   :  { %1731 = vmatmul.f32.gmra.mxu0 %v3290_v41 }
 0x575   :  { %1734 = vmatmul.f32.gmra.mxu0 %v1515_v32 }
 0x5ba   :  { %v1540_v2 = vpop.f32.mrf.mxu0  ;;  %v1560_v12 = vpop.f32.mrf.mxu1 }
 0x5bb   :  { %v1603_v27 = vadd.f32 %v1540_v2, %v3582_v22  ;;  %v1604_v10 = vadd.f32 %v1560_v12, %v3583_v9  ;;  %v1925_v2 = vld [vmem:[%s3336_s5] ss:$0 sm:$0xff]  ;;  %v1742_v12 = vshrl.u32 %v1741_v59, 7  ;;  %s2303_s5 = smov [#allocation13]  }
 0x5bc   :  { %s1859_s23 = sshll.u32 %s2303_s5, 4  ;;  %s1860_s23 = int_to_ptr.vmem [resolvable:$true] %s1859_s23 }
 0x5bd   :  { %v1894_v61 = vmul.f32 -1.442695, %v1603_v27  ;;  %v1895_v13 = vmul.f32 -1.442695, %v1604_v10  ;;  %vm1743_vm0 = vcmp.lt.s32.totalorder %v1742_v12, 2 }
 0x5bf   :  { %2038 = vpow2.f32 %v1894_v61 }
 0x5c0   :  { %2040 = vpow2.f32 %v1895_v13 }
 0x5c1   :  { %v1600_v24 = vpop.f32.mrf.mxu3  ;;  %v1580_v35 = vpop.f32.mrf.mxu2 }
 0x5c2   :  { %v1606_v40 = vadd.f32 %v1600_v24, %v3584_v46  ;;  %v1605_v8 = vadd.f32 %v1580_v35, %v3585_v53  ;;  %v1717_v23 = vpop.f32.mrf.mxu0 }
 0x5c3   :  { %v1718_v9 = vadd.f32 %v1925_v2, %v1717_v23 }
 0x5c4   :  { %v1896_v30 = vmul.f32 -1.442695, %v1606_v40  ;;  %v2302_v40 = vmov 2.0  }
 0x5c5   :  { %v2039_v43 = vpop.eup %2038 }
 0x5c6   :  { %v2041_v60 = vpop.eup %2040  ;;  %v1610_v28 = vadd.f32 1.0, %v2039_v43  ;;  %2042 = vpow2.f32 %v1896_v30 }
 0x5c7   :  { %v1629_v41 = vadd.f32 1.0, %v2041_v60  ;;  %v1744_v60 = vsel %vm1743_vm0, %v1718_v9, 0.0 }
 0x5c8   :  { %2044 = vrcp.f32 %v1610_v28  ;;  %v1622_v21 = vand.u32 2147483648, %v1610_v28  ;;  %v1620_v6 = vand.u32 2147483647, %v1610_v28  ;;  %vm1616_vm6 = vweird.f32 %v1610_v28 }
 0x5c9   :  { %2046 = vrcp.f32 %v1629_v41  ;;  %v1641_v15 = vand.u32 2147483648, %v1629_v41  ;;  %v1639_v34 = vand.u32 2147483647, %v1629_v41  ;;  %vm1635_vm7 = vweird.f32 %v1629_v41 }
 0x5ca   :  { %v1623_v54 = vor.u32 1.1754944e-38, %v1622_v21  ;;  %vm1621_vm9 = vcmp.eq.f32.partialorder %v1620_v6, 8.507059e+37  ;;  %v1720_v32 = vpop.f32.mrf.mxu0 }
 0x5cb   :  { %v1642_v63 = vor.u32 1.1754944e-38, %v1641_v15  ;;  %vm1640_vm11 = vcmp.eq.f32.partialorder %v1639_v34, 8.507059e+37  ;;  %v1721_v22 = vadd.f32 %v1925_v2, %v1720_v32 }
 0x5cc   :  { %v2043_v42 = vpop.eup %2042 }
 0x5cd   :  { %v1649_v33 = vadd.f32 1.0, %v2043_v42  ;;  %v1745_v24 = vsel %vm1743_vm0, %v1721_v22, 0.0 }
 0x5ce   :  { %v2045_v14 = vpop.eup %2044 }
 0x5cf   :  { %v2047_v37 = vpop.eup %2046  ;;  %v1612_v7 = vmul.f32 %v2045_v14, %v1610_v28  ;;  %2048 = vrcp.f32 %v1649_v33  ;;  %vm1617_vm4 = vweird.f32 %v2045_v14  ;;  %v1661_v44 = vand.u32 2147483648, %v1649_v33 }
 0x5d0   :  { %v1631_v26 = vmul.f32 %v2047_v37, %v1629_v41  ;;  %2050 = vtanh.f32 %v1605_v8  ;;  %vm1636_vm5 = vweird.f32 %v2047_v37  ;;  %vm1618_vm8 = vmor %vm1616_vm6, %vm1617_vm4  ;;  %vm1655_vm13 = vweird.f32 %v1649_v33 }
 0x5d1   :  { %v1613_v31 = vsub.f32 1.0, %v1612_v7  ;;  %vm1637_vm10 = vmor %vm1635_vm7, %vm1636_vm5  ;;  %v1659_v36 = vand.u32 2147483647, %v1649_v33  ;;  %v1662_v62 = vor.u32 1.1754944e-38, %v1661_v44  ;;  %v1758_v41 = vrot.slane %v1745_v24, 4 }
 0x5d2   :  { %v1632_v48 = vsub.f32 1.0, %v1631_v26  ;;  %v1723_v5 = vpop.f32.mrf.mxu0  ;;  %vm1830_vm4 = vcmask 1043459   ;;  %vm1832_vm5 = vcmask 1044484   ;;  %vm1834_vm6 = vcmask 1045509  }
 0x5d3   :  { %v1614_v18 = vmul.f32 %v2045_v14, %v1613_v31  ;;  %vm1660_vm15 = vcmp.eq.f32.partialorder %v1659_v36, 8.507059e+37  ;;  %v1724_v27 = vadd.f32 %v1925_v2, %v1723_v5  ;;  %v1759_v26 = vadd.f32 %v1758_v41, %v1745_v24 }
 0x5d4   :  { %v1633_v25 = vmul.f32 %v2047_v37, %v1632_v48  ;;  %vm1836_vm7 = vcmask 1046534  }
 0x5d5   :  { %v2049_v57 = vpop.eup %2048  ;;  %v1615_v19 = vadd.f32 %v2045_v14, %v1614_v18  ;;  %v1746_v30 = vsel %vm1743_vm0, %v1724_v27, 0.0  ;;  %v1760_v34 = vrot.slane %v1759_v26, 2 }
 0x5d6   :  { %v1634_v56 = vadd.f32 %v2047_v37, %v1633_v25  ;;  %v1651_v58 = vmul.f32 %v2049_v57, %v1649_v33  ;;  %v2051_v3 = vpop.eup %2050  ;;  %vm1656_vm12 = vweird.f32 %v2049_v57  ;;  %v1764_v42 = vrot.slane %v1746_v30, 4 }
 0x5d7   :  { %v1619_v0 = vsel %vm1618_vm8, %v2045_v14, %v1615_v19  ;;  %vm1657_vm14 = vmor %vm1655_vm13, %vm1656_vm12  ;;  %v1752_v14 = vrot.slane %v1744_v60, 4  ;;  %vm1838_vm8 = vcmask 1047559  }
 0x5d8   :  { %v1624_v38 = vsel %vm1621_vm9, %v1623_v54, %v1619_v0  ;;  %v1638_v45 = vsel %vm1637_vm10, %v2047_v37, %v1634_v56  ;;  %v1652_v52 = vsub.f32 1.0, %v1651_v58  ;;  %v1765_v48 = vadd.f32 %v1764_v42, %v1746_v30 }
 0x5d9   :  { %v1666_v49 = vmul.f32 %v2051_v3, %v1624_v38  ;;  %v1643_v50 = vsel %vm1640_vm11, %v1642_v63, %v1638_v45  ;;  %v1753_v15 = vadd.f32 %v1752_v14, %v1744_v60  ;;  %v1761_v3 = vadd.f32 %v1760_v34, %v1759_v26 }
 0x5da   :  { %v1665_v16 = vmul.f32 %v1643_v50, %v3301_v29  ;;  %v1653_v20 = vmul.f32 %v2049_v57, %v1652_v52  ;;  %v1726_v29 = vpop.f32.mrf.mxu0  ;;  %v1766_v19 = vrot.slane %v1765_v48, 2 }
 0x5db   :  { %v1727_v10 = vadd.f32 %v1925_v2, %v1726_v29  ;;  %v1754_v56 = vrot.slane %v1753_v15, 2 }
 0x5dc   :  { %v1667_v39 = vadd.f32 %v1666_v49, %v1665_v16  ;;  %v1654_v4 = vadd.f32 %v2049_v57, %v1653_v20  ;;  %v1767_v45 = vadd.f32 %v1766_v19, %v1765_v48 }
 0x5dd   :  { %v1747_v28 = vsel %vm1743_vm0, %v1727_v10, 0.0  ;;  %v1755_v50 = vadd.f32 %v1754_v56, %v1753_v15 }
 0x5de   :  { %2052 = vtanh.f32 %v1667_v39  ;;  %v1658_v47 = vsel %vm1657_vm14, %v2049_v57, %v1654_v4  ;;  %v1770_v53 = vrot.slane %v1747_v28, 4  ;;  %v1762_v39 = vrot.slane %v1761_v3, 1 }
 0x5df   :  { %v1663_v11 = vsel %vm1660_vm15, %v1662_v62, %v1658_v47  ;;  %2054 = vrcp.f32 %v2302_v40  ;;  %v1768_v36 = vrot.slane %v1767_v45, 1 }
 0x5e0   :  { %v1771_v18 = vadd.f32 %v1770_v53, %v1747_v28  ;;  %v1763_v5 = vadd.f32 %v1762_v39, %v1761_v3 }
 0x5e2   :  { %v1729_v1 = vpop.f32.mrf.mxu0  ;;  %v1772_v58 = vrot.slane %v1771_v18, 2 }
 0x5e3   :  { %v1730_v13 = vadd.f32 %v1925_v2, %v1729_v1 }
 0x5e4   :  { %v2053_v17 = vpop.eup %2052  ;;  %v1773_v52 = vadd.f32 %v1772_v58, %v1771_v18 }
 0x5e5   :  { %v1669_v51 = vmul.f32 %v2053_v17, %v1663_v11  ;;  %v1748_v35 = vsel %vm1743_vm0, %v1730_v13, 0.0  ;;  %v2055_v7 = vpop.eup %2054  ;;  %v1756_v17 = vrot.slane %v1755_v50, 1 }
 0x5e6   :  { %v1776_v37 = vrot.slane %v1748_v35, 4  ;;  %v1801_v6 = vmul.f32 2.0, %v2055_v7  ;;  %v1774_v11 = vrot.slane %v1773_v52, 1  ;;  %vm1805_vm1 = vweird.f32 %v2055_v7 }
 0x5e7   :  { %1737 = vmatmul.f32.gmra.mxu0 %v1669_v51  ;;  %v1757_v27 = vadd.f32 %v1756_v17, %v1755_v50 }
 0x5e8   :  { %v1777_v25 = vadd.f32 %v1776_v37, %v1748_v35  ;;  %v1802_v63 = vsub.f32 1.0, %v1801_v6  ;;  %v1775_v9 = vadd.f32 %v1774_v11, %v1773_v52 }
 0x5ea   :  { %v1732_v55 = vpop.f32.mrf.mxu0  ;;  %v1778_v0 = vrot.slane %v1777_v25, 2  ;;  %v1803_v16 = vmul.f32 %v2055_v7, %v1802_v63 }
 0x5eb   :  { %v1733_v46 = vadd.f32 %v1925_v2, %v1732_v55  ;;  %v1769_v55 = vadd.f32 %v1768_v36, %v1767_v45 }
 0x5ec   :  { %v1779_v20 = vadd.f32 %v1778_v0, %v1777_v25  ;;  %v1804_v51 = vadd.f32 %v2055_v7, %v1803_v16 }
 0x5ed   :  { %v1749_v33 = vsel %vm1743_vm0, %v1733_v46, 0.0 }
 0x5ee   :  { %v1782_v31 = vrot.slane %v1749_v33, 4  ;;  %v1780_v23 = vrot.slane %v1779_v20, 1 }
 0x5f0   :  { %v1783_v57 = vadd.f32 %v1782_v31, %v1749_v33  ;;  %v1781_v13 = vadd.f32 %v1780_v23, %v1779_v20  ;;  %v1816_v33 = vand.u32 127, %v1741_v59 }
 0x5f2   :  { %v1735_v61 = vpop.f32.mrf.mxu0  ;;  %v1784_v38 = vrot.slane %v1783_v57, 2  ;;  %vm1817_vm9 = vcmp.lt.s32.totalorder %v1816_v33, 10 }
 0x5f3   :  { %v1736_v43 = vadd.f32 %v1925_v2, %v1735_v61  ;;  %v1806_v61 = vsel %vm1805_vm1, %v2055_v7, %v1804_v51 }
 0x5f4   :  { %v1785_v4 = vadd.f32 %v1784_v38, %v1783_v57  ;;  %v1808_v24 = vmul.f32 %v1806_v61, %v1763_v5  ;;  %v1809_v40 = vmul.f32 %v1806_v61, %v1769_v55  ;;  %v1810_v12 = vmul.f32 %v1806_v61, %v1775_v9 }
 0x5f5   :  { %v1750_v8 = vsel %vm1743_vm0, %v1736_v43, 0.0  ;;  %v1807_v43 = vmul.f32 %v1806_v61, %v1757_v27  ;;  %v1811_v28 = vmul.f32 %v1806_v61, %v1781_v13 }
 0x5f6   :  { %v1788_v21 = vrot.slane %v1750_v8, 4  ;;  %v1786_v29 = vrot.slane %v1785_v4, 1 }
 0x5f7   :  { %v1827_v41 = vsel %vm1826_vm2, %v1808_v24, %v1807_v43 }
 0x5f8   :  { %v1789_v54 = vadd.f32 %v1788_v21, %v1750_v8  ;;  %v1787_v46 = vadd.f32 %v1786_v29, %v1785_v4  ;;  %v1829_v53 = vsel %vm1828_vm3, %v1809_v40, %v1827_v41 }
 0x5f9   :  { %v1831_v37 = vsel %vm1830_vm4, %v1810_v12, %v1829_v53 }
 0x5fa   :  { %v1790_v49 = vrot.slane %v1789_v54, 2  ;;  %v1812_v35 = vmul.f32 %v1806_v61, %v1787_v46  ;;  %v1833_v7 = vsel %vm1832_vm5, %v1811_v28, %v1831_v37 }
 0x5fc   :  { %v1791_v47 = vadd.f32 %v1790_v49, %v1789_v54  ;;  %v1835_v31 = vsel %vm1834_vm6, %v1812_v35, %v1833_v7 }
 0x5fe   :  { %v1792_v22 = vrot.slane %v1791_v47, 1 }
 0x600   :  { %v1793_v30 = vadd.f32 %v1792_v22, %v1791_v47 }
 0x602   :  { %v1813_v14 = vmul.f32 %v1806_v61, %v1793_v30 }
 0x604   :  { %v1837_v48 = vsel %vm1836_vm7, %v1813_v14, %v1835_v31 }
 0x664   :  { %v1738_v44 = vpop.f32.mrf.mxu0 }
 0x665   :  { %v1739_v62 = vadd.f32 %v1925_v2, %v1738_v44 }
 0x667   :  { %v1751_v32 = vsel %vm1743_vm0, %v1739_v62, 0.0 }
 0x668   :  { %v1794_v1 = vrot.slane %v1751_v32, 4 }
 0x66a   :  { %v1795_v10 = vadd.f32 %v1794_v1, %v1751_v32 }
 0x66c   :  { %v1796_v2 = vrot.slane %v1795_v10, 2 }
 0x66e   :  { %v1797_v60 = vadd.f32 %v1796_v2, %v1795_v10 }
 0x670   :  { %v1798_v42 = vrot.slane %v1797_v60, 1 }
 0x672   :  { %v1799_v8 = vadd.f32 %v1798_v42, %v1797_v60 }
 0x674   :  { %v1814_v26 = vmul.f32 %v1806_v61, %v1799_v8 }
 0x676   :  { %v1839_v21 = vsel %vm1838_vm8, %v1814_v26, %v1837_v48 }
 0x677   :  { %v1841_v15 = vsel %vm1817_vm9, %v1839_v21, -1e+30 }
 0x678   :  { %1842 = vmax.xlane.f32.xlu0 %v1841_v15 }
 0x6eb   :  { %v1843_v18 = vpop.xlane.xlu0 %1842 }
 0x6ec   :  { %v1844_v6 = vsub.f32 %v1841_v15, %v1843_v18 }
 0x6ee   :  { %v1845_v25 = vmul.f32 1.442695, %v1844_v6 }
 0x6f0   :  { %2056 = vpow2.f32 %v1845_v25 }
 0x6f6   :  { %v2057_v59 = vpop.eup %2056 }
 0x6f7   :  { %1847 = vadd.xlane.f32.xlu0 %v2057_v59 }
 0x76a   :  { %v1848_v34 = vpop.xlane.xlu0 %1847 }
 0x76b   :  { %2058 = vlog2.f32 %v1848_v34 }
 0x771   :  { %v2059_v57 = vpop.eup %2058 }
 0x772   :  { %v1850_v19 = vmul.f32 0.6931472, %v2059_v57 }
 0x774   :  { %v1851_v54 = vadd.f32 %v1850_v19, %v1843_v18 }
 0x776   :  { %v1852_v56 = vsub.f32 %v1841_v15, %v1851_v54 }
 0x778   :  { %1853 = vst [vmem:[#allocation13] sm:$0xff] %v1852_v56 }
 0x779   :  { %1864 = dma.vmem_to_hbm [thread:$0]  %s1860_s23, 128, %s1862_s26, [#allocation6]  }
 0x77a   :  { %2290 = dma.done.wait [#allocation6], 128  }
 0x77b   :  { %2291 = vsyncadd [#allocation6], 4294967168 }
 0x77c   :  { %1869 = vsyncpa [#allocation5], 1 }
 0x77d   :  { %1870 = vsyncpa [#allocation8], 1 }
 0x77e   :  { %1871 = vsyncpa [#allocation11], 1 }
 0x77f   :  { %1872 = vsyncpa [#allocation6], 1 }

</bundles_post_ra>
